<compile_context>
chip_gen: v5e
topology: v5e:2x2
jax: 0.10.0
libtpu: 0.0.40
codegen_flags: <defaults>
</compile_context>

<pallas_src>
import functools

import jax
import jax.numpy as jnp
from jax.experimental import pallas as pl
from jax.experimental.pallas import tpu as pltpu


def _self_attn_kernel(x_ref, w_ref, b_ref, gamma_ref, o_ref, *, W, C, c8):
    """One grid step over TN columns of the voxel-major (W*C, N) layout.

    x_ref, o_ref : (W*C, TN)  rows = w*C + c, lanes = the TN batch rows (B*D*H)
    w_ref        : (R, W*C)   fused block-diagonal projection weight, R = W*(2*c8+C)
    b_ref        : (R, 1)     fused projection bias (lane-broadcast)
    gamma_ref    : (1,)       scalar in SMEM

    Projection-output row layout:
      rows [0, W*c8)        q, row = o*W + w
      rows [W*c8, 2*W*c8)   k, row = o*W + w
      rows [2*W*c8, R)      v, row = w*C + o   (matches the x / out row layout)
    """
    x = x_ref[...].astype(jnp.float32)                       # (W*C, TN)

    # --- fused q/k/v projection: one MXU matmul, K = W*C (lane-native) -------
    proj = jnp.dot(w_ref[...], x, preferred_element_type=jnp.float32) + b_ref[...]
    nq = W * c8
    q_all = proj[:nq]                                        # (W*c8, TN)
    k_all = proj[nq:2 * nq]                                  # (W*c8, TN)
    v_all = proj[2 * nq:]                                    # (W*C,  TN)

    # --- energy[wk] : (W_q, TN), VPU broadcast-MACs over the c8 channels -----
    energies = []
    for wk in range(W):
        e = None
        for c in range(c8):
            q_c = q_all[c * W:(c + 1) * W]                   # (W_q, TN)
            k_c = k_all[c * W + wk:c * W + wk + 1]           # (1,   TN)
            t = q_c * k_c
            e = t if e is None else e + t
        energies.append(e)

    # --- softmax over wk: per-lane VPU max / EUP exp / VPU sum ---------------
    m = energies[0]
    for wk in range(1, W):
        m = jnp.maximum(m, energies[wk])
    ps = [jnp.exp(e - m) for e in energies]                  # (W_q, TN) each
    s = ps[0]
    for wk in range(1, W):
        s = s + ps[wk]
    inv = pl.reciprocal(s, approx=True)                      # (W_q, TN), EUP
    attn = [p * inv for p in ps]                             # attn[wk][wq, n]

    # --- out = attn @ v, unrolled over (wq, wk), vectorized over (C, TN) -----
    out_blocks = []
    for wq in range(W):
        acc = None
        for wk in range(W):
            a = attn[wk][wq:wq + 1]                          # (1, TN)
            t = v_all[wk * C:(wk + 1) * C] * a               # (C, TN)
            acc = t if acc is None else acc + t
        out_blocks.append(acc)
    out = jnp.concatenate(out_blocks, axis=0)                # (W*C, TN)

    # TODO(synk): for large W the W*W unrolled loops above should switch to a
    # flash-style / MXU formulation; W is the (small) last spatial axis here.
    gamma = gamma_ref[0]                                     # SMEM scalar
    o_ref[...] = (gamma * out + x).astype(o_ref.dtype)


def _vmem_capacity_bytes():
    try:
        return int(pltpu.get_tpu_info().vmem_capacity_bytes)
    except Exception:
        return 128 * 1024 * 1024                             # v5e/v6e default


def _tile_plan(N, W, C, itemsize, tile_n=None):
    """Pick TN (lanes per grid step) and a vmem limit, generation-aware."""
    c8 = C // 8
    R = W * (2 * c8 + C)
    cap = _vmem_capacity_bytes()
    small_vmem = cap <= 80 * 1024 * 1024          # v7x-class: 64 MiB per core
    tile_budget = (24 if small_vmem else 32) * 1024 * 1024
    vmem_cap = (40 if small_vmem else 64) * 1024 * 1024
    min_steps = 4 if small_vmem else 1            # 2 TCs on v7x want >1 step

    # Rough f32 working set per lane-column n.
    per_n = 4 * (4 * W * C            # 2x double-buffered in + out tiles
                 + R                  # fused projection
                 + 3 * W * W          # energy / exp / attn slices
                 + W * C)             # output accumulation
    cap_rows = max(128, tile_budget // max(per_n, 1))
    target_rows = max(128, (4 * 1024 * 1024) // (itemsize * W * C))  # ~4 MiB x

    if tile_n is None:
        cands = [d for d in range(128, N + 1, 128) if N % d == 0]
        if not cands:
            cands = [N]               # last block dim == full array dim
        cands = [d for d in cands if d <= cap_rows] or [min(cands)]
        preferred = [d for d in cands if N // d >= min_steps] or cands
        under = [d for d in preferred if d <= target_rows]
        tile_n = max(under) if under else min(preferred)

    weight_bytes = itemsize * (R * W * C + R)
    est = per_n * tile_n + weight_bytes
    vmem_limit = int(min(max(2 * est, 16 * 1024 * 1024), vmem_cap))
    return tile_n, vmem_limit


def self_attention_3d(x, params, *, tile_n=None):
    """x: (B, C, D, H, W) float32 (PyTorch NCDHW convention)."""
    B, C, D, H, W = x.shape
    assert C % 8 == 0 and C >= 8, "in_channels must be a positive multiple of 8"
    N = B * D * H
    c8 = C // 8
    R = W * (2 * c8 + C)
    itemsize = jnp.dtype(x.dtype).itemsize

    tile_n, vmem_limit = _tile_plan(N, W, C, itemsize, tile_n)
    assert N % tile_n == 0 and (tile_n % 128 == 0 or tile_n == N), \
        "tile_n must divide B*D*H and be a multiple of 128 (or equal it)"

    # Voxel-major, lanes = batch rows layout: (W*C, N).
    # TODO(synk): keep activations in this layout across adjacent layers (or use
    # allow_input_fusion / bf16 HBM I/O) to cut the NCDHW<->(W*C,N) HBM traffic.
    xT = jnp.transpose(x, (4, 1, 0, 2, 3)).reshape(W * C, N)

    # Fused block-diagonal projection: one (W*C -> W*(2*c8+C)) matmul replaces
    # the three per-voxel 1x1x1 convs.
    eye_w = jnp.eye(W, dtype=jnp.float32)
    blk_q = jnp.einsum('oc,wv->owvc', params["wq"], eye_w).reshape(c8 * W, W * C)
    blk_k = jnp.einsum('oc,wv->owvc', params["wk"], eye_w).reshape(c8 * W, W * C)
    blk_v = jnp.einsum('oc,wv->wovc', params["wv"], eye_w).reshape(C * W, W * C)
    w_full = jnp.concatenate([blk_q, blk_k, blk_v], axis=0)           # (R, W*C)
    b_full = jnp.concatenate([jnp.repeat(params["bq"], W),
                              jnp.repeat(params["bk"], W),
                              jnp.tile(params["bv"], W)]).reshape(R, 1)
    gamma = params["gamma"].reshape(1).astype(jnp.float32)

    kernel = functools.partial(_self_attn_kernel, W=W, C=C, c8=c8)

    outT = pl.pallas_call(
        kernel,
        out_shape=jax.ShapeDtypeStruct((W * C, N), x.dtype),
        grid_spec=pltpu.PrefetchScalarGridSpec(
            num_scalar_prefetch=0,
            grid=(N // tile_n,),
            in_specs=[
                pl.BlockSpec((W * C, tile_n), lambda i: (0, i)),       # x cols
                pl.BlockSpec((R, W * C), lambda i: (0, 0)),            # fused W
                pl.BlockSpec((R, 1), lambda i: (0, 0)),                # fused b
                pl.BlockSpec(memory_space=pltpu.MemorySpace.SMEM),     # gamma
            ],
            out_specs=pl.BlockSpec((W * C, tile_n), lambda i: (0, i)),
        ),
        compiler_params=pltpu.CompilerParams(
            dimension_semantics=("parallel",),
            vmem_limit_bytes=vmem_limit),
    )(xT, w_full, b_full, gamma)

    # (W*C, N) -> (B, C, D, H, W)
    return jnp.transpose(outT.reshape(W, C, B, D, H), (2, 1, 3, 4, 0))


def self_attention_3d_reference(x, params):
    """Pure-JAX reference mirroring the PyTorch forward exactly."""
    xp = jnp.transpose(x, (0, 2, 3, 4, 1))                            # (B,D,H,W,C)
    q = jnp.einsum('bdhwc,oc->bdhwo', xp, params["wq"]) + params["bq"]
    k = jnp.einsum('bdhwc,oc->bdhwo', xp, params["wk"]) + params["bk"]
    v = jnp.einsum('bdhwc,oc->bdhwo', xp, params["wv"]) + params["bv"]
    energy = jnp.einsum('bdhwc,bdhvc->bdhwv', q, k)
    attn = jax.nn.softmax(energy, axis=-1)
    out = jnp.einsum('bdhwv,bdhvc->bdhwc', attn, v)
    out = params["gamma"][0] * out + xp
    return jnp.transpose(out, (0, 4, 1, 2, 3))


def init_params(key, in_channels):
    """Deterministic synthetic init; shapes follow SelfAttention3D.__init__."""
    c8 = in_channels // 8
    ks = jax.random.split(key, 6)
    return {
        "wq": 0.1 * jax.random.normal(ks[0], (c8, in_channels), jnp.float32),
        "bq": 0.1 * jax.random.normal(ks[1], (c8,), jnp.float32),
        "wk": 0.1 * jax.random.normal(ks[2], (c8, in_channels), jnp.float32),
        "bk": 0.1 * jax.random.normal(ks[3], (c8,), jnp.float32),
        "wv": 0.1 * jax.random.normal(ks[4], (in_channels, in_channels), jnp.float32),
        "bv": 0.1 * jax.random.normal(ks[5], (in_channels,), jnp.float32),
        # PyTorch inits gamma to 0; use nonzero so the attention path matters.
        "gamma": jnp.array([0.5], jnp.float32),
    }


if __name__ == "__main__":
    key = jax.random.PRNGKey(0)
    k_x, k_p = jax.random.split(key)

    B, C, D, H, W = 2, 16, 16, 16, 8          # N = B*D*H = 512, W*C = 128 lanes
    x = jax.random.normal(k_x, (B, C, D, H, W), jnp.float32)
    params = init_params(k_p, C)

    ref = self_attention_3d_reference(x, params)

    # Auto-chosen tile (generation-aware).
    out = jax.block_until_ready(self_attention_3d(x, params))
    assert out.shape == (B, C, D, H, W)
    # Tolerance loosened slightly for the approximate (EUP) softmax reciprocal.
    assert jnp.allclose(out, ref, atol=2e-3, rtol=2e-3), "mismatch vs reference"

    # Explicit 4-step grid to exercise the multi-block pipeline path as well.
    out2 = jax.block_until_ready(self_attention_3d(x, params, tile_n=128))
    assert jnp.allclose(out2, ref, atol=2e-3, rtol=2e-3), "mismatch (tiled) vs reference"

    print("KERNEL_OK")
</pallas_src>

<mosaic_0001>
module attributes {stable_mosaic.version = 11 : i64} {
  func.func @_self_attn_kernel(%arg0: i32, %arg1: memref<128x512xf32, #tpu.memory_space<vmem>>, %arg2: memref<160x128xf32, #tpu.memory_space<vmem>>, %arg3: memref<160x1xf32, #tpu.memory_space<vmem>>, %arg4: memref<1xf32, #tpu.memory_space<smem>>, %arg5: memref<128x512xf32, #tpu.memory_space<vmem>>) attributes {dimension_semantics = [#tpu.dimension_semantics<parallel>], iteration_bounds = array<i64: 1>, scalar_prefetch = 0 : i64, scratch_operands = 0 : i64, tpu.core_type = #tpu.core_type<tc>, window_params = [{transform_indices = @transform_0, window_bounds = array<i64: 128, 512>}, {pipeline_mode = #tpu.pipeline_mode<synchronous>, transform_indices = @transform_1, window_bounds = array<i64: 160, 128>}, {pipeline_mode = #tpu.pipeline_mode<synchronous>, transform_indices = @transform_2, window_bounds = array<i64: 160, 1>}, {transform_indices = @transform_3, window_bounds = array<i64: 1>}, {transform_indices = @transform_4, window_bounds = array<i64: 128, 512>}]} {
    %c0 = arith.constant 0 : index
    %c0_0 = arith.constant 0 : index
    %0 = vector.load %arg1[%c0, %c0_0] : memref<128x512xf32, #tpu.memory_space<vmem>>, vector<128x512xf32>
    %c0_1 = arith.constant 0 : index
    %c0_2 = arith.constant 0 : index
    %1 = vector.load %arg2[%c0_1, %c0_2] : memref<160x128xf32, #tpu.memory_space<vmem>>, vector<160x128xf32>
    %cst = arith.constant dense<0.000000e+00> : vector<160x512xf32>
    %2 = tpu.matmul %1, %0, %cst {dimension_numbers = #tpu.dot_dimension_numbers<[1], [0], [0], [1], [0, 0, 1, 1], [], []>} : vector<160x128xf32>, vector<128x512xf32>, vector<160x512xf32> -> vector<160x512xf32>
    %c0_3 = arith.constant 0 : index
    %c0_4 = arith.constant 0 : index
    %3 = vector.load %arg3[%c0_3, %c0_4] : memref<160x1xf32, #tpu.memory_space<vmem>>, vector<160x1xf32>
    %4 = vector.broadcast %3 : vector<160x1xf32> to vector<160x512xf32>
    %5 = arith.addf %2, %4 : vector<160x512xf32>
    %6 = vector.extract_strided_slice %5 {offsets = [0, 0], sizes = [16, 512], strides = [1, 1]} : vector<160x512xf32> to vector<16x512xf32>
    %7 = vector.extract_strided_slice %5 {offsets = [16, 0], sizes = [16, 512], strides = [1, 1]} : vector<160x512xf32> to vector<16x512xf32>
    %8 = vector.extract_strided_slice %5 {offsets = [32, 0], sizes = [128, 512], strides = [1, 1]} : vector<160x512xf32> to vector<128x512xf32>
    %9 = vector.extract_strided_slice %6 {offsets = [0, 0], sizes = [8, 512], strides = [1, 1]} : vector<16x512xf32> to vector<8x512xf32>
    %10 = vector.extract_strided_slice %7 {offsets = [0, 0], sizes = [1, 512], strides = [1, 1]} : vector<16x512xf32> to vector<1x512xf32>
    %11 = vector.broadcast %10 : vector<1x512xf32> to vector<8x512xf32>
    %12 = arith.mulf %9, %11 : vector<8x512xf32>
    %13 = vector.extract_strided_slice %6 {offsets = [8, 0], sizes = [8, 512], strides = [1, 1]} : vector<16x512xf32> to vector<8x512xf32>
    %14 = vector.extract_strided_slice %7 {offsets = [8, 0], sizes = [1, 512], strides = [1, 1]} : vector<16x512xf32> to vector<1x512xf32>
    %15 = vector.broadcast %14 : vector<1x512xf32> to vector<8x512xf32>
    %16 = arith.mulf %13, %15 : vector<8x512xf32>
    %17 = arith.addf %12, %16 : vector<8x512xf32>
    %18 = vector.extract_strided_slice %6 {offsets = [0, 0], sizes = [8, 512], strides = [1, 1]} : vector<16x512xf32> to vector<8x512xf32>
    %19 = vector.extract_strided_slice %7 {offsets = [1, 0], sizes = [1, 512], strides = [1, 1]} : vector<16x512xf32> to vector<1x512xf32>
    %20 = vector.broadcast %19 : vector<1x512xf32> to vector<8x512xf32>
    %21 = arith.mulf %18, %20 : vector<8x512xf32>
    %22 = vector.extract_strided_slice %6 {offsets = [8, 0], sizes = [8, 512], strides = [1, 1]} : vector<16x512xf32> to vector<8x512xf32>
    %23 = vector.extract_strided_slice %7 {offsets = [9, 0], sizes = [1, 512], strides = [1, 1]} : vector<16x512xf32> to vector<1x512xf32>
    %24 = vector.broadcast %23 : vector<1x512xf32> to vector<8x512xf32>
    %25 = arith.mulf %22, %24 : vector<8x512xf32>
    %26 = arith.addf %21, %25 : vector<8x512xf32>
    %27 = vector.extract_strided_slice %6 {offsets = [0, 0], sizes = [8, 512], strides = [1, 1]} : vector<16x512xf32> to vector<8x512xf32>
    %28 = vector.extract_strided_slice %7 {offsets = [2, 0], sizes = [1, 512], strides = [1, 1]} : vector<16x512xf32> to vector<1x512xf32>
    %29 = vector.broadcast %28 : vector<1x512xf32> to vector<8x512xf32>
    %30 = arith.mulf %27, %29 : vector<8x512xf32>
    %31 = vector.extract_strided_slice %6 {offsets = [8, 0], sizes = [8, 512], strides = [1, 1]} : vector<16x512xf32> to vector<8x512xf32>
    %32 = vector.extract_strided_slice %7 {offsets = [10, 0], sizes = [1, 512], strides = [1, 1]} : vector<16x512xf32> to vector<1x512xf32>
    %33 = vector.broadcast %32 : vector<1x512xf32> to vector<8x512xf32>
    %34 = arith.mulf %31, %33 : vector<8x512xf32>
    %35 = arith.addf %30, %34 : vector<8x512xf32>
    %36 = vector.extract_strided_slice %6 {offsets = [0, 0], sizes = [8, 512], strides = [1, 1]} : vector<16x512xf32> to vector<8x512xf32>
    %37 = vector.extract_strided_slice %7 {offsets = [3, 0], sizes = [1, 512], strides = [1, 1]} : vector<16x512xf32> to vector<1x512xf32>
    %38 = vector.broadcast %37 : vector<1x512xf32> to vector<8x512xf32>
    %39 = arith.mulf %36, %38 : vector<8x512xf32>
    %40 = vector.extract_strided_slice %6 {offsets = [8, 0], sizes = [8, 512], strides = [1, 1]} : vector<16x512xf32> to vector<8x512xf32>
    %41 = vector.extract_strided_slice %7 {offsets = [11, 0], sizes = [1, 512], strides = [1, 1]} : vector<16x512xf32> to vector<1x512xf32>
    %42 = vector.broadcast %41 : vector<1x512xf32> to vector<8x512xf32>
    %43 = arith.mulf %40, %42 : vector<8x512xf32>
    %44 = arith.addf %39, %43 : vector<8x512xf32>
    %45 = vector.extract_strided_slice %6 {offsets = [0, 0], sizes = [8, 512], strides = [1, 1]} : vector<16x512xf32> to vector<8x512xf32>
    %46 = vector.extract_strided_slice %7 {offsets = [4, 0], sizes = [1, 512], strides = [1, 1]} : vector<16x512xf32> to vector<1x512xf32>
    %47 = vector.broadcast %46 : vector<1x512xf32> to vector<8x512xf32>
    %48 = arith.mulf %45, %47 : vector<8x512xf32>
    %49 = vector.extract_strided_slice %6 {offsets = [8, 0], sizes = [8, 512], strides = [1, 1]} : vector<16x512xf32> to vector<8x512xf32>
    %50 = vector.extract_strided_slice %7 {offsets = [12, 0], sizes = [1, 512], strides = [1, 1]} : vector<16x512xf32> to vector<1x512xf32>
    %51 = vector.broadcast %50 : vector<1x512xf32> to vector<8x512xf32>
    %52 = arith.mulf %49, %51 : vector<8x512xf32>
    %53 = arith.addf %48, %52 : vector<8x512xf32>
    %54 = vector.extract_strided_slice %6 {offsets = [0, 0], sizes = [8, 512], strides = [1, 1]} : vector<16x512xf32> to vector<8x512xf32>
    %55 = vector.extract_strided_slice %7 {offsets = [5, 0], sizes = [1, 512], strides = [1, 1]} : vector<16x512xf32> to vector<1x512xf32>
    %56 = vector.broadcast %55 : vector<1x512xf32> to vector<8x512xf32>
    %57 = arith.mulf %54, %56 : vector<8x512xf32>
    %58 = vector.extract_strided_slice %6 {offsets = [8, 0], sizes = [8, 512], strides = [1, 1]} : vector<16x512xf32> to vector<8x512xf32>
    %59 = vector.extract_strided_slice %7 {offsets = [13, 0], sizes = [1, 512], strides = [1, 1]} : vector<16x512xf32> to vector<1x512xf32>
    %60 = vector.broadcast %59 : vector<1x512xf32> to vector<8x512xf32>
    %61 = arith.mulf %58, %60 : vector<8x512xf32>
    %62 = arith.addf %57, %61 : vector<8x512xf32>
    %63 = vector.extract_strided_slice %6 {offsets = [0, 0], sizes = [8, 512], strides = [1, 1]} : vector<16x512xf32> to vector<8x512xf32>
    %64 = vector.extract_strided_slice %7 {offsets = [6, 0], sizes = [1, 512], strides = [1, 1]} : vector<16x512xf32> to vector<1x512xf32>
    %65 = vector.broadcast %64 : vector<1x512xf32> to vector<8x512xf32>
    %66 = arith.mulf %63, %65 : vector<8x512xf32>
    %67 = vector.extract_strided_slice %6 {offsets = [8, 0], sizes = [8, 512], strides = [1, 1]} : vector<16x512xf32> to vector<8x512xf32>
    %68 = vector.extract_strided_slice %7 {offsets = [14, 0], sizes = [1, 512], strides = [1, 1]} : vector<16x512xf32> to vector<1x512xf32>
    %69 = vector.broadcast %68 : vector<1x512xf32> to vector<8x512xf32>
    %70 = arith.mulf %67, %69 : vector<8x512xf32>
    %71 = arith.addf %66, %70 : vector<8x512xf32>
    %72 = vector.extract_strided_slice %6 {offsets = [0, 0], sizes = [8, 512], strides = [1, 1]} : vector<16x512xf32> to vector<8x512xf32>
    %73 = vector.extract_strided_slice %7 {offsets = [7, 0], sizes = [1, 512], strides = [1, 1]} : vector<16x512xf32> to vector<1x512xf32>
    %74 = vector.broadcast %73 : vector<1x512xf32> to vector<8x512xf32>
    %75 = arith.mulf %72, %74 : vector<8x512xf32>
    %76 = vector.extract_strided_slice %6 {offsets = [8, 0], sizes = [8, 512], strides = [1, 1]} : vector<16x512xf32> to vector<8x512xf32>
    %77 = vector.extract_strided_slice %7 {offsets = [15, 0], sizes = [1, 512], strides = [1, 1]} : vector<16x512xf32> to vector<1x512xf32>
    %78 = vector.broadcast %77 : vector<1x512xf32> to vector<8x512xf32>
    %79 = arith.mulf %76, %78 : vector<8x512xf32>
    %80 = arith.addf %75, %79 : vector<8x512xf32>
    %81 = arith.maximumf %17, %26 : vector<8x512xf32>
    %82 = arith.maximumf %81, %35 : vector<8x512xf32>
    %83 = arith.maximumf %82, %44 : vector<8x512xf32>
    %84 = arith.maximumf %83, %53 : vector<8x512xf32>
    %85 = arith.maximumf %84, %62 : vector<8x512xf32>
    %86 = arith.maximumf %85, %71 : vector<8x512xf32>
    %87 = arith.maximumf %86, %80 : vector<8x512xf32>
    %88 = arith.subf %17, %87 : vector<8x512xf32>
    %89 = math.exp %88 : vector<8x512xf32>
    %90 = arith.subf %26, %87 : vector<8x512xf32>
    %91 = math.exp %90 : vector<8x512xf32>
    %92 = arith.subf %35, %87 : vector<8x512xf32>
    %93 = math.exp %92 : vector<8x512xf32>
    %94 = arith.subf %44, %87 : vector<8x512xf32>
    %95 = math.exp %94 : vector<8x512xf32>
    %96 = arith.subf %53, %87 : vector<8x512xf32>
    %97 = math.exp %96 : vector<8x512xf32>
    %98 = arith.subf %62, %87 : vector<8x512xf32>
    %99 = math.exp %98 : vector<8x512xf32>
    %100 = arith.subf %71, %87 : vector<8x512xf32>
    %101 = math.exp %100 : vector<8x512xf32>
    %102 = arith.subf %80, %87 : vector<8x512xf32>
    %103 = math.exp %102 : vector<8x512xf32>
    %104 = arith.addf %89, %91 : vector<8x512xf32>
    %105 = arith.addf %104, %93 : vector<8x512xf32>
    %106 = arith.addf %105, %95 : vector<8x512xf32>
    %107 = arith.addf %106, %97 : vector<8x512xf32>
    %108 = arith.addf %107, %99 : vector<8x512xf32>
    %109 = arith.addf %108, %101 : vector<8x512xf32>
    %110 = arith.addf %109, %103 : vector<8x512xf32>
    %111 = tpu.reciprocal %110 {approx = true} : vector<8x512xf32> -> vector<8x512xf32>
    %112 = arith.mulf %89, %111 : vector<8x512xf32>
    %113 = arith.mulf %91, %111 : vector<8x512xf32>
    %114 = arith.mulf %93, %111 : vector<8x512xf32>
    %115 = arith.mulf %95, %111 : vector<8x512xf32>
    %116 = arith.mulf %97, %111 : vector<8x512xf32>
    %117 = arith.mulf %99, %111 : vector<8x512xf32>
    %118 = arith.mulf %101, %111 : vector<8x512xf32>
    %119 = arith.mulf %103, %111 : vector<8x512xf32>
    %120 = vector.extract_strided_slice %112 {offsets = [0, 0], sizes = [1, 512], strides = [1, 1]} : vector<8x512xf32> to vector<1x512xf32>
    %121 = vector.extract_strided_slice %8 {offsets = [0, 0], sizes = [16, 512], strides = [1, 1]} : vector<128x512xf32> to vector<16x512xf32>
    %122 = vector.broadcast %120 : vector<1x512xf32> to vector<16x512xf32>
    %123 = arith.mulf %121, %122 : vector<16x512xf32>
    %124 = vector.extract_strided_slice %113 {offsets = [0, 0], sizes = [1, 512], strides = [1, 1]} : vector<8x512xf32> to vector<1x512xf32>
    %125 = vector.extract_strided_slice %8 {offsets = [16, 0], sizes = [16, 512], strides = [1, 1]} : vector<128x512xf32> to vector<16x512xf32>
    %126 = vector.broadcast %124 : vector<1x512xf32> to vector<16x512xf32>
    %127 = arith.mulf %125, %126 : vector<16x512xf32>
    %128 = arith.addf %123, %127 : vector<16x512xf32>
    %129 = vector.extract_strided_slice %114 {offsets = [0, 0], sizes = [1, 512], strides = [1, 1]} : vector<8x512xf32> to vector<1x512xf32>
    %130 = vector.extract_strided_slice %8 {offsets = [32, 0], sizes = [16, 512], strides = [1, 1]} : vector<128x512xf32> to vector<16x512xf32>
    %131 = vector.broadcast %129 : vector<1x512xf32> to vector<16x512xf32>
    %132 = arith.mulf %130, %131 : vector<16x512xf32>
    %133 = arith.addf %128, %132 : vector<16x512xf32>
    %134 = vector.extract_strided_slice %115 {offsets = [0, 0], sizes = [1, 512], strides = [1, 1]} : vector<8x512xf32> to vector<1x512xf32>
    %135 = vector.extract_strided_slice %8 {offsets = [48, 0], sizes = [16, 512], strides = [1, 1]} : vector<128x512xf32> to vector<16x512xf32>
    %136 = vector.broadcast %134 : vector<1x512xf32> to vector<16x512xf32>
    %137 = arith.mulf %135, %136 : vector<16x512xf32>
    %138 = arith.addf %133, %137 : vector<16x512xf32>
    %139 = vector.extract_strided_slice %116 {offsets = [0, 0], sizes = [1, 512], strides = [1, 1]} : vector<8x512xf32> to vector<1x512xf32>
    %140 = vector.extract_strided_slice %8 {offsets = [64, 0], sizes = [16, 512], strides = [1, 1]} : vector<128x512xf32> to vector<16x512xf32>
    %141 = vector.broadcast %139 : vector<1x512xf32> to vector<16x512xf32>
    %142 = arith.mulf %140, %141 : vector<16x512xf32>
    %143 = arith.addf %138, %142 : vector<16x512xf32>
    %144 = vector.extract_strided_slice %117 {offsets = [0, 0], sizes = [1, 512], strides = [1, 1]} : vector<8x512xf32> to vector<1x512xf32>
    %145 = vector.extract_strided_slice %8 {offsets = [80, 0], sizes = [16, 512], strides = [1, 1]} : vector<128x512xf32> to vector<16x512xf32>
    %146 = vector.broadcast %144 : vector<1x512xf32> to vector<16x512xf32>
    %147 = arith.mulf %145, %146 : vector<16x512xf32>
    %148 = arith.addf %143, %147 : vector<16x512xf32>
    %149 = vector.extract_strided_slice %118 {offsets = [0, 0], sizes = [1, 512], strides = [1, 1]} : vector<8x512xf32> to vector<1x512xf32>
    %150 = vector.extract_strided_slice %8 {offsets = [96, 0], sizes = [16, 512], strides = [1, 1]} : vector<128x512xf32> to vector<16x512xf32>
    %151 = vector.broadcast %149 : vector<1x512xf32> to vector<16x512xf32>
    %152 = arith.mulf %150, %151 : vector<16x512xf32>
    %153 = arith.addf %148, %152 : vector<16x512xf32>
    %154 = vector.extract_strided_slice %119 {offsets = [0, 0], sizes = [1, 512], strides = [1, 1]} : vector<8x512xf32> to vector<1x512xf32>
    %155 = vector.extract_strided_slice %8 {offsets = [112, 0], sizes = [16, 512], strides = [1, 1]} : vector<128x512xf32> to vector<16x512xf32>
    %156 = vector.broadcast %154 : vector<1x512xf32> to vector<16x512xf32>
    %157 = arith.mulf %155, %156 : vector<16x512xf32>
    %158 = arith.addf %153, %157 : vector<16x512xf32>
    %159 = vector.extract_strided_slice %112 {offsets = [1, 0], sizes = [1, 512], strides = [1, 1]} : vector<8x512xf32> to vector<1x512xf32>
    %160 = vector.extract_strided_slice %8 {offsets = [0, 0], sizes = [16, 512], strides = [1, 1]} : vector<128x512xf32> to vector<16x512xf32>
    %161 = vector.broadcast %159 : vector<1x512xf32> to vector<16x512xf32>
    %162 = arith.mulf %160, %161 : vector<16x512xf32>
    %163 = vector.extract_strided_slice %113 {offsets = [1, 0], sizes = [1, 512], strides = [1, 1]} : vector<8x512xf32> to vector<1x512xf32>
    %164 = vector.extract_strided_slice %8 {offsets = [16, 0], sizes = [16, 512], strides = [1, 1]} : vector<128x512xf32> to vector<16x512xf32>
    %165 = vector.broadcast %163 : vector<1x512xf32> to vector<16x512xf32>
    %166 = arith.mulf %164, %165 : vector<16x512xf32>
    %167 = arith.addf %162, %166 : vector<16x512xf32>
    %168 = vector.extract_strided_slice %114 {offsets = [1, 0], sizes = [1, 512], strides = [1, 1]} : vector<8x512xf32> to vector<1x512xf32>
    %169 = vector.extract_strided_slice %8 {offsets = [32, 0], sizes = [16, 512], strides = [1, 1]} : vector<128x512xf32> to vector<16x512xf32>
    %170 = vector.broadcast %168 : vector<1x512xf32> to vector<16x512xf32>
    %171 = arith.mulf %169, %170 : vector<16x512xf32>
    %172 = arith.addf %167, %171 : vector<16x512xf32>
    %173 = vector.extract_strided_slice %115 {offsets = [1, 0], sizes = [1, 512], strides = [1, 1]} : vector<8x512xf32> to vector<1x512xf32>
    %174 = vector.extract_strided_slice %8 {offsets = [48, 0], sizes = [16, 512], strides = [1, 1]} : vector<128x512xf32> to vector<16x512xf32>
    %175 = vector.broadcast %173 : vector<1x512xf32> to vector<16x512xf32>
    %176 = arith.mulf %174, %175 : vector<16x512xf32>
    %177 = arith.addf %172, %176 : vector<16x512xf32>
    %178 = vector.extract_strided_slice %116 {offsets = [1, 0], sizes = [1, 512], strides = [1, 1]} : vector<8x512xf32> to vector<1x512xf32>
    %179 = vector.extract_strided_slice %8 {offsets = [64, 0], sizes = [16, 512], strides = [1, 1]} : vector<128x512xf32> to vector<16x512xf32>
    %180 = vector.broadcast %178 : vector<1x512xf32> to vector<16x512xf32>
    %181 = arith.mulf %179, %180 : vector<16x512xf32>
    %182 = arith.addf %177, %181 : vector<16x512xf32>
    %183 = vector.extract_strided_slice %117 {offsets = [1, 0], sizes = [1, 512], strides = [1, 1]} : vector<8x512xf32> to vector<1x512xf32>
    %184 = vector.extract_strided_slice %8 {offsets = [80, 0], sizes = [16, 512], strides = [1, 1]} : vector<128x512xf32> to vector<16x512xf32>
    %185 = vector.broadcast %183 : vector<1x512xf32> to vector<16x512xf32>
    %186 = arith.mulf %184, %185 : vector<16x512xf32>
    %187 = arith.addf %182, %186 : vector<16x512xf32>
    %188 = vector.extract_strided_slice %118 {offsets = [1, 0], sizes = [1, 512], strides = [1, 1]} : vector<8x512xf32> to vector<1x512xf32>
    %189 = vector.extract_strided_slice %8 {offsets = [96, 0], sizes = [16, 512], strides = [1, 1]} : vector<128x512xf32> to vector<16x512xf32>
    %190 = vector.broadcast %188 : vector<1x512xf32> to vector<16x512xf32>
    %191 = arith.mulf %189, %190 : vector<16x512xf32>
    %192 = arith.addf %187, %191 : vector<16x512xf32>
    %193 = vector.extract_strided_slice %119 {offsets = [1, 0], sizes = [1, 512], strides = [1, 1]} : vector<8x512xf32> to vector<1x512xf32>
    %194 = vector.extract_strided_slice %8 {offsets = [112, 0], sizes = [16, 512], strides = [1, 1]} : vector<128x512xf32> to vector<16x512xf32>
    %195 = vector.broadcast %193 : vector<1x512xf32> to vector<16x512xf32>
    %196 = arith.mulf %194, %195 : vector<16x512xf32>
    %197 = arith.addf %192, %196 : vector<16x512xf32>
    %198 = vector.extract_strided_slice %112 {offsets = [2, 0], sizes = [1, 512], strides = [1, 1]} : vector<8x512xf32> to vector<1x512xf32>
    %199 = vector.extract_strided_slice %8 {offsets = [0, 0], sizes = [16, 512], strides = [1, 1]} : vector<128x512xf32> to vector<16x512xf32>
    %200 = vector.broadcast %198 : vector<1x512xf32> to vector<16x512xf32>
    %201 = arith.mulf %199, %200 : vector<16x512xf32>
    %202 = vector.extract_strided_slice %113 {offsets = [2, 0], sizes = [1, 512], strides = [1, 1]} : vector<8x512xf32> to vector<1x512xf32>
    %203 = vector.extract_strided_slice %8 {offsets = [16, 0], sizes = [16, 512], strides = [1, 1]} : vector<128x512xf32> to vector<16x512xf32>
    %204 = vector.broadcast %202 : vector<1x512xf32> to vector<16x512xf32>
    %205 = arith.mulf %203, %204 : vector<16x512xf32>
    %206 = arith.addf %201, %205 : vector<16x512xf32>
    %207 = vector.extract_strided_slice %114 {offsets = [2, 0], sizes = [1, 512], strides = [1, 1]} : vector<8x512xf32> to vector<1x512xf32>
    %208 = vector.extract_strided_slice %8 {offsets = [32, 0], sizes = [16, 512], strides = [1, 1]} : vector<128x512xf32> to vector<16x512xf32>
    %209 = vector.broadcast %207 : vector<1x512xf32> to vector<16x512xf32>
    %210 = arith.mulf %208, %209 : vector<16x512xf32>
    %211 = arith.addf %206, %210 : vector<16x512xf32>
    %212 = vector.extract_strided_slice %115 {offsets = [2, 0], sizes = [1, 512], strides = [1, 1]} : vector<8x512xf32> to vector<1x512xf32>
    %213 = vector.extract_strided_slice %8 {offsets = [48, 0], sizes = [16, 512], strides = [1, 1]} : vector<128x512xf32> to vector<16x512xf32>
    %214 = vector.broadcast %212 : vector<1x512xf32> to vector<16x512xf32>
    %215 = arith.mulf %213, %214 : vector<16x512xf32>
    %216 = arith.addf %211, %215 : vector<16x512xf32>
    %217 = vector.extract_strided_slice %116 {offsets = [2, 0], sizes = [1, 512], strides = [1, 1]} : vector<8x512xf32> to vector<1x512xf32>
    %218 = vector.extract_strided_slice %8 {offsets = [64, 0], sizes = [16, 512], strides = [1, 1]} : vector<128x512xf32> to vector<16x512xf32>
    %219 = vector.broadcast %217 : vector<1x512xf32> to vector<16x512xf32>
    %220 = arith.mulf %218, %219 : vector<16x512xf32>
    %221 = arith.addf %216, %220 : vector<16x512xf32>
    %222 = vector.extract_strided_slice %117 {offsets = [2, 0], sizes = [1, 512], strides = [1, 1]} : vector<8x512xf32> to vector<1x512xf32>
    %223 = vector.extract_strided_slice %8 {offsets = [80, 0], sizes = [16, 512], strides = [1, 1]} : vector<128x512xf32> to vector<16x512xf32>
    %224 = vector.broadcast %222 : vector<1x512xf32> to vector<16x512xf32>
    %225 = arith.mulf %223, %224 : vector<16x512xf32>
    %226 = arith.addf %221, %225 : vector<16x512xf32>
    %227 = vector.extract_strided_slice %118 {offsets = [2, 0], sizes = [1, 512], strides = [1, 1]} : vector<8x512xf32> to vector<1x512xf32>
    %228 = vector.extract_strided_slice %8 {offsets = [96, 0], sizes = [16, 512], strides = [1, 1]} : vector<128x512xf32> to vector<16x512xf32>
    %229 = vector.broadcast %227 : vector<1x512xf32> to vector<16x512xf32>
    %230 = arith.mulf %228, %229 : vector<16x512xf32>
    %231 = arith.addf %226, %230 : vector<16x512xf32>
    %232 = vector.extract_strided_slice %119 {offsets = [2, 0], sizes = [1, 512], strides = [1, 1]} : vector<8x512xf32> to vector<1x512xf32>
    %233 = vector.extract_strided_slice %8 {offsets = [112, 0], sizes = [16, 512], strides = [1, 1]} : vector<128x512xf32> to vector<16x512xf32>
    %234 = vector.broadcast %232 : vector<1x512xf32> to vector<16x512xf32>
    %235 = arith.mulf %233, %234 : vector<16x512xf32>
    %236 = arith.addf %231, %235 : vector<16x512xf32>
    %237 = vector.extract_strided_slice %112 {offsets = [3, 0], sizes = [1, 512], strides = [1, 1]} : vector<8x512xf32> to vector<1x512xf32>
    %238 = vector.extract_strided_slice %8 {offsets = [0, 0], sizes = [16, 512], strides = [1, 1]} : vector<128x512xf32> to vector<16x512xf32>
    %239 = vector.broadcast %237 : vector<1x512xf32> to vector<16x512xf32>
    %240 = arith.mulf %238, %239 : vector<16x512xf32>
    %241 = vector.extract_strided_slice %113 {offsets = [3, 0], sizes = [1, 512], strides = [1, 1]} : vector<8x512xf32> to vector<1x512xf32>
    %242 = vector.extract_strided_slice %8 {offsets = [16, 0], sizes = [16, 512], strides = [1, 1]} : vector<128x512xf32> to vector<16x512xf32>
    %243 = vector.broadcast %241 : vector<1x512xf32> to vector<16x512xf32>
    %244 = arith.mulf %242, %243 : vector<16x512xf32>
    %245 = arith.addf %240, %244 : vector<16x512xf32>
    %246 = vector.extract_strided_slice %114 {offsets = [3, 0], sizes = [1, 512], strides = [1, 1]} : vector<8x512xf32> to vector<1x512xf32>
    %247 = vector.extract_strided_slice %8 {offsets = [32, 0], sizes = [16, 512], strides = [1, 1]} : vector<128x512xf32> to vector<16x512xf32>
    %248 = vector.broadcast %246 : vector<1x512xf32> to vector<16x512xf32>
    %249 = arith.mulf %247, %248 : vector<16x512xf32>
    %250 = arith.addf %245, %249 : vector<16x512xf32>
    %251 = vector.extract_strided_slice %115 {offsets = [3, 0], sizes = [1, 512], strides = [1, 1]} : vector<8x512xf32> to vector<1x512xf32>
    %252 = vector.extract_strided_slice %8 {offsets = [48, 0], sizes = [16, 512], strides = [1, 1]} : vector<128x512xf32> to vector<16x512xf32>
    %253 = vector.broadcast %251 : vector<1x512xf32> to vector<16x512xf32>
    %254 = arith.mulf %252, %253 : vector<16x512xf32>
    %255 = arith.addf %250, %254 : vector<16x512xf32>
    %256 = vector.extract_strided_slice %116 {offsets = [3, 0], sizes = [1, 512], strides = [1, 1]} : vector<8x512xf32> to vector<1x512xf32>
    %257 = vector.extract_strided_slice %8 {offsets = [64, 0], sizes = [16, 512], strides = [1, 1]} : vector<128x512xf32> to vector<16x512xf32>
    %258 = vector.broadcast %256 : vector<1x512xf32> to vector<16x512xf32>
    %259 = arith.mulf %257, %258 : vector<16x512xf32>
    %260 = arith.addf %255, %259 : vector<16x512xf32>
    %261 = vector.extract_strided_slice %117 {offsets = [3, 0], sizes = [1, 512], strides = [1, 1]} : vector<8x512xf32> to vector<1x512xf32>
    %262 = vector.extract_strided_slice %8 {offsets = [80, 0], sizes = [16, 512], strides = [1, 1]} : vector<128x512xf32> to vector<16x512xf32>
    %263 = vector.broadcast %261 : vector<1x512xf32> to vector<16x512xf32>
    %264 = arith.mulf %262, %263 : vector<16x512xf32>
    %265 = arith.addf %260, %264 : vector<16x512xf32>
    %266 = vector.extract_strided_slice %118 {offsets = [3, 0], sizes = [1, 512], strides = [1, 1]} : vector<8x512xf32> to vector<1x512xf32>
    %267 = vector.extract_strided_slice %8 {offsets = [96, 0], sizes = [16, 512], strides = [1, 1]} : vector<128x512xf32> to vector<16x512xf32>
    %268 = vector.broadcast %266 : vector<1x512xf32> to vector<16x512xf32>
    %269 = arith.mulf %267, %268 : vector<16x512xf32>
    %270 = arith.addf %265, %269 : vector<16x512xf32>
    %271 = vector.extract_strided_slice %119 {offsets = [3, 0], sizes = [1, 512], strides = [1, 1]} : vector<8x512xf32> to vector<1x512xf32>
    %272 = vector.extract_strided_slice %8 {offsets = [112, 0], sizes = [16, 512], strides = [1, 1]} : vector<128x512xf32> to vector<16x512xf32>
    %273 = vector.broadcast %271 : vector<1x512xf32> to vector<16x512xf32>
    %274 = arith.mulf %272, %273 : vector<16x512xf32>
    %275 = arith.addf %270, %274 : vector<16x512xf32>
    %276 = vector.extract_strided_slice %112 {offsets = [4, 0], sizes = [1, 512], strides = [1, 1]} : vector<8x512xf32> to vector<1x512xf32>
    %277 = vector.extract_strided_slice %8 {offsets = [0, 0], sizes = [16, 512], strides = [1, 1]} : vector<128x512xf32> to vector<16x512xf32>
    %278 = vector.broadcast %276 : vector<1x512xf32> to vector<16x512xf32>
    %279 = arith.mulf %277, %278 : vector<16x512xf32>
    %280 = vector.extract_strided_slice %113 {offsets = [4, 0], sizes = [1, 512], strides = [1, 1]} : vector<8x512xf32> to vector<1x512xf32>
    %281 = vector.extract_strided_slice %8 {offsets = [16, 0], sizes = [16, 512], strides = [1, 1]} : vector<128x512xf32> to vector<16x512xf32>
    %282 = vector.broadcast %280 : vector<1x512xf32> to vector<16x512xf32>
    %283 = arith.mulf %281, %282 : vector<16x512xf32>
    %284 = arith.addf %279, %283 : vector<16x512xf32>
    %285 = vector.extract_strided_slice %114 {offsets = [4, 0], sizes = [1, 512], strides = [1, 1]} : vector<8x512xf32> to vector<1x512xf32>
    %286 = vector.extract_strided_slice %8 {offsets = [32, 0], sizes = [16, 512], strides = [1, 1]} : vector<128x512xf32> to vector<16x512xf32>
    %287 = vector.broadcast %285 : vector<1x512xf32> to vector<16x512xf32>
    %288 = arith.mulf %286, %287 : vector<16x512xf32>
    %289 = arith.addf %284, %288 : vector<16x512xf32>
    %290 = vector.extract_strided_slice %115 {offsets = [4, 0], sizes = [1, 512], strides = [1, 1]} : vector<8x512xf32> to vector<1x512xf32>
    %291 = vector.extract_strided_slice %8 {offsets = [48, 0], sizes = [16, 512], strides = [1, 1]} : vector<128x512xf32> to vector<16x512xf32>
    %292 = vector.broadcast %290 : vector<1x512xf32> to vector<16x512xf32>
    %293 = arith.mulf %291, %292 : vector<16x512xf32>
    %294 = arith.addf %289, %293 : vector<16x512xf32>
    %295 = vector.extract_strided_slice %116 {offsets = [4, 0], sizes = [1, 512], strides = [1, 1]} : vector<8x512xf32> to vector<1x512xf32>
    %296 = vector.extract_strided_slice %8 {offsets = [64, 0], sizes = [16, 512], strides = [1, 1]} : vector<128x512xf32> to vector<16x512xf32>
    %297 = vector.broadcast %295 : vector<1x512xf32> to vector<16x512xf32>
    %298 = arith.mulf %296, %297 : vector<16x512xf32>
    %299 = arith.addf %294, %298 : vector<16x512xf32>
    %300 = vector.extract_strided_slice %117 {offsets = [4, 0], sizes = [1, 512], strides = [1, 1]} : vector<8x512xf32> to vector<1x512xf32>
    %301 = vector.extract_strided_slice %8 {offsets = [80, 0], sizes = [16, 512], strides = [1, 1]} : vector<128x512xf32> to vector<16x512xf32>
    %302 = vector.broadcast %300 : vector<1x512xf32> to vector<16x512xf32>
    %303 = arith.mulf %301, %302 : vector<16x512xf32>
    %304 = arith.addf %299, %303 : vector<16x512xf32>
    %305 = vector.extract_strided_slice %118 {offsets = [4, 0], sizes = [1, 512], strides = [1, 1]} : vector<8x512xf32> to vector<1x512xf32>
    %306 = vector.extract_strided_slice %8 {offsets = [96, 0], sizes = [16, 512], strides = [1, 1]} : vector<128x512xf32> to vector<16x512xf32>
    %307 = vector.broadcast %305 : vector<1x512xf32> to vector<16x512xf32>
    %308 = arith.mulf %306, %307 : vector<16x512xf32>
    %309 = arith.addf %304, %308 : vector<16x512xf32>
    %310 = vector.extract_strided_slice %119 {offsets = [4, 0], sizes = [1, 512], strides = [1, 1]} : vector<8x512xf32> to vector<1x512xf32>
    %311 = vector.extract_strided_slice %8 {offsets = [112, 0], sizes = [16, 512], strides = [1, 1]} : vector<128x512xf32> to vector<16x512xf32>
    %312 = vector.broadcast %310 : vector<1x512xf32> to vector<16x512xf32>
    %313 = arith.mulf %311, %312 : vector<16x512xf32>
    %314 = arith.addf %309, %313 : vector<16x512xf32>
    %315 = vector.extract_strided_slice %112 {offsets = [5, 0], sizes = [1, 512], strides = [1, 1]} : vector<8x512xf32> to vector<1x512xf32>
    %316 = vector.extract_strided_slice %8 {offsets = [0, 0], sizes = [16, 512], strides = [1, 1]} : vector<128x512xf32> to vector<16x512xf32>
    %317 = vector.broadcast %315 : vector<1x512xf32> to vector<16x512xf32>
    %318 = arith.mulf %316, %317 : vector<16x512xf32>
    %319 = vector.extract_strided_slice %113 {offsets = [5, 0], sizes = [1, 512], strides = [1, 1]} : vector<8x512xf32> to vector<1x512xf32>
    %320 = vector.extract_strided_slice %8 {offsets = [16, 0], sizes = [16, 512], strides = [1, 1]} : vector<128x512xf32> to vector<16x512xf32>
    %321 = vector.broadcast %319 : vector<1x512xf32> to vector<16x512xf32>
    %322 = arith.mulf %320, %321 : vector<16x512xf32>
    %323 = arith.addf %318, %322 : vector<16x512xf32>
    %324 = vector.extract_strided_slice %114 {offsets = [5, 0], sizes = [1, 512], strides = [1, 1]} : vector<8x512xf32> to vector<1x512xf32>
    %325 = vector.extract_strided_slice %8 {offsets = [32, 0], sizes = [16, 512], strides = [1, 1]} : vector<128x512xf32> to vector<16x512xf32>
    %326 = vector.broadcast %324 : vector<1x512xf32> to vector<16x512xf32>
    %327 = arith.mulf %325, %326 : vector<16x512xf32>
    %328 = arith.addf %323, %327 : vector<16x512xf32>
    %329 = vector.extract_strided_slice %115 {offsets = [5, 0], sizes = [1, 512], strides = [1, 1]} : vector<8x512xf32> to vector<1x512xf32>
    %330 = vector.extract_strided_slice %8 {offsets = [48, 0], sizes = [16, 512], strides = [1, 1]} : vector<128x512xf32> to vector<16x512xf32>
    %331 = vector.broadcast %329 : vector<1x512xf32> to vector<16x512xf32>
    %332 = arith.mulf %330, %331 : vector<16x512xf32>
    %333 = arith.addf %328, %332 : vector<16x512xf32>
    %334 = vector.extract_strided_slice %116 {offsets = [5, 0], sizes = [1, 512], strides = [1, 1]} : vector<8x512xf32> to vector<1x512xf32>
    %335 = vector.extract_strided_slice %8 {offsets = [64, 0], sizes = [16, 512], strides = [1, 1]} : vector<128x512xf32> to vector<16x512xf32>
    %336 = vector.broadcast %334 : vector<1x512xf32> to vector<16x512xf32>
    %337 = arith.mulf %335, %336 : vector<16x512xf32>
    %338 = arith.addf %333, %337 : vector<16x512xf32>
    %339 = vector.extract_strided_slice %117 {offsets = [5, 0], sizes = [1, 512], strides = [1, 1]} : vector<8x512xf32> to vector<1x512xf32>
    %340 = vector.extract_strided_slice %8 {offsets = [80, 0], sizes = [16, 512], strides = [1, 1]} : vector<128x512xf32> to vector<16x512xf32>
    %341 = vector.broadcast %339 : vector<1x512xf32> to vector<16x512xf32>
    %342 = arith.mulf %340, %341 : vector<16x512xf32>
    %343 = arith.addf %338, %342 : vector<16x512xf32>
    %344 = vector.extract_strided_slice %118 {offsets = [5, 0], sizes = [1, 512], strides = [1, 1]} : vector<8x512xf32> to vector<1x512xf32>
    %345 = vector.extract_strided_slice %8 {offsets = [96, 0], sizes = [16, 512], strides = [1, 1]} : vector<128x512xf32> to vector<16x512xf32>
    %346 = vector.broadcast %344 : vector<1x512xf32> to vector<16x512xf32>
    %347 = arith.mulf %345, %346 : vector<16x512xf32>
    %348 = arith.addf %343, %347 : vector<16x512xf32>
    %349 = vector.extract_strided_slice %119 {offsets = [5, 0], sizes = [1, 512], strides = [1, 1]} : vector<8x512xf32> to vector<1x512xf32>
    %350 = vector.extract_strided_slice %8 {offsets = [112, 0], sizes = [16, 512], strides = [1, 1]} : vector<128x512xf32> to vector<16x512xf32>
    %351 = vector.broadcast %349 : vector<1x512xf32> to vector<16x512xf32>
    %352 = arith.mulf %350, %351 : vector<16x512xf32>
    %353 = arith.addf %348, %352 : vector<16x512xf32>
    %354 = vector.extract_strided_slice %112 {offsets = [6, 0], sizes = [1, 512], strides = [1, 1]} : vector<8x512xf32> to vector<1x512xf32>
    %355 = vector.extract_strided_slice %8 {offsets = [0, 0], sizes = [16, 512], strides = [1, 1]} : vector<128x512xf32> to vector<16x512xf32>
    %356 = vector.broadcast %354 : vector<1x512xf32> to vector<16x512xf32>
    %357 = arith.mulf %355, %356 : vector<16x512xf32>
    %358 = vector.extract_strided_slice %113 {offsets = [6, 0], sizes = [1, 512], strides = [1, 1]} : vector<8x512xf32> to vector<1x512xf32>
    %359 = vector.extract_strided_slice %8 {offsets = [16, 0], sizes = [16, 512], strides = [1, 1]} : vector<128x512xf32> to vector<16x512xf32>
    %360 = vector.broadcast %358 : vector<1x512xf32> to vector<16x512xf32>
    %361 = arith.mulf %359, %360 : vector<16x512xf32>
    %362 = arith.addf %357, %361 : vector<16x512xf32>
    %363 = vector.extract_strided_slice %114 {offsets = [6, 0], sizes = [1, 512], strides = [1, 1]} : vector<8x512xf32> to vector<1x512xf32>
    %364 = vector.extract_strided_slice %8 {offsets = [32, 0], sizes = [16, 512], strides = [1, 1]} : vector<128x512xf32> to vector<16x512xf32>
    %365 = vector.broadcast %363 : vector<1x512xf32> to vector<16x512xf32>
    %366 = arith.mulf %364, %365 : vector<16x512xf32>
    %367 = arith.addf %362, %366 : vector<16x512xf32>
    %368 = vector.extract_strided_slice %115 {offsets = [6, 0], sizes = [1, 512], strides = [1, 1]} : vector<8x512xf32> to vector<1x512xf32>
    %369 = vector.extract_strided_slice %8 {offsets = [48, 0], sizes = [16, 512], strides = [1, 1]} : vector<128x512xf32> to vector<16x512xf32>
    %370 = vector.broadcast %368 : vector<1x512xf32> to vector<16x512xf32>
    %371 = arith.mulf %369, %370 : vector<16x512xf32>
    %372 = arith.addf %367, %371 : vector<16x512xf32>
    %373 = vector.extract_strided_slice %116 {offsets = [6, 0], sizes = [1, 512], strides = [1, 1]} : vector<8x512xf32> to vector<1x512xf32>
    %374 = vector.extract_strided_slice %8 {offsets = [64, 0], sizes = [16, 512], strides = [1, 1]} : vector<128x512xf32> to vector<16x512xf32>
    %375 = vector.broadcast %373 : vector<1x512xf32> to vector<16x512xf32>
    %376 = arith.mulf %374, %375 : vector<16x512xf32>
    %377 = arith.addf %372, %376 : vector<16x512xf32>
    %378 = vector.extract_strided_slice %117 {offsets = [6, 0], sizes = [1, 512], strides = [1, 1]} : vector<8x512xf32> to vector<1x512xf32>
    %379 = vector.extract_strided_slice %8 {offsets = [80, 0], sizes = [16, 512], strides = [1, 1]} : vector<128x512xf32> to vector<16x512xf32>
    %380 = vector.broadcast %378 : vector<1x512xf32> to vector<16x512xf32>
    %381 = arith.mulf %379, %380 : vector<16x512xf32>
    %382 = arith.addf %377, %381 : vector<16x512xf32>
    %383 = vector.extract_strided_slice %118 {offsets = [6, 0], sizes = [1, 512], strides = [1, 1]} : vector<8x512xf32> to vector<1x512xf32>
    %384 = vector.extract_strided_slice %8 {offsets = [96, 0], sizes = [16, 512], strides = [1, 1]} : vector<128x512xf32> to vector<16x512xf32>
    %385 = vector.broadcast %383 : vector<1x512xf32> to vector<16x512xf32>
    %386 = arith.mulf %384, %385 : vector<16x512xf32>
    %387 = arith.addf %382, %386 : vector<16x512xf32>
    %388 = vector.extract_strided_slice %119 {offsets = [6, 0], sizes = [1, 512], strides = [1, 1]} : vector<8x512xf32> to vector<1x512xf32>
    %389 = vector.extract_strided_slice %8 {offsets = [112, 0], sizes = [16, 512], strides = [1, 1]} : vector<128x512xf32> to vector<16x512xf32>
    %390 = vector.broadcast %388 : vector<1x512xf32> to vector<16x512xf32>
    %391 = arith.mulf %389, %390 : vector<16x512xf32>
    %392 = arith.addf %387, %391 : vector<16x512xf32>
    %393 = vector.extract_strided_slice %112 {offsets = [7, 0], sizes = [1, 512], strides = [1, 1]} : vector<8x512xf32> to vector<1x512xf32>
    %394 = vector.extract_strided_slice %8 {offsets = [0, 0], sizes = [16, 512], strides = [1, 1]} : vector<128x512xf32> to vector<16x512xf32>
    %395 = vector.broadcast %393 : vector<1x512xf32> to vector<16x512xf32>
    %396 = arith.mulf %394, %395 : vector<16x512xf32>
    %397 = vector.extract_strided_slice %113 {offsets = [7, 0], sizes = [1, 512], strides = [1, 1]} : vector<8x512xf32> to vector<1x512xf32>
    %398 = vector.extract_strided_slice %8 {offsets = [16, 0], sizes = [16, 512], strides = [1, 1]} : vector<128x512xf32> to vector<16x512xf32>
    %399 = vector.broadcast %397 : vector<1x512xf32> to vector<16x512xf32>
    %400 = arith.mulf %398, %399 : vector<16x512xf32>
    %401 = arith.addf %396, %400 : vector<16x512xf32>
    %402 = vector.extract_strided_slice %114 {offsets = [7, 0], sizes = [1, 512], strides = [1, 1]} : vector<8x512xf32> to vector<1x512xf32>
    %403 = vector.extract_strided_slice %8 {offsets = [32, 0], sizes = [16, 512], strides = [1, 1]} : vector<128x512xf32> to vector<16x512xf32>
    %404 = vector.broadcast %402 : vector<1x512xf32> to vector<16x512xf32>
    %405 = arith.mulf %403, %404 : vector<16x512xf32>
    %406 = arith.addf %401, %405 : vector<16x512xf32>
    %407 = vector.extract_strided_slice %115 {offsets = [7, 0], sizes = [1, 512], strides = [1, 1]} : vector<8x512xf32> to vector<1x512xf32>
    %408 = vector.extract_strided_slice %8 {offsets = [48, 0], sizes = [16, 512], strides = [1, 1]} : vector<128x512xf32> to vector<16x512xf32>
    %409 = vector.broadcast %407 : vector<1x512xf32> to vector<16x512xf32>
    %410 = arith.mulf %408, %409 : vector<16x512xf32>
    %411 = arith.addf %406, %410 : vector<16x512xf32>
    %412 = vector.extract_strided_slice %116 {offsets = [7, 0], sizes = [1, 512], strides = [1, 1]} : vector<8x512xf32> to vector<1x512xf32>
    %413 = vector.extract_strided_slice %8 {offsets = [64, 0], sizes = [16, 512], strides = [1, 1]} : vector<128x512xf32> to vector<16x512xf32>
    %414 = vector.broadcast %412 : vector<1x512xf32> to vector<16x512xf32>
    %415 = arith.mulf %413, %414 : vector<16x512xf32>
    %416 = arith.addf %411, %415 : vector<16x512xf32>
    %417 = vector.extract_strided_slice %117 {offsets = [7, 0], sizes = [1, 512], strides = [1, 1]} : vector<8x512xf32> to vector<1x512xf32>
    %418 = vector.extract_strided_slice %8 {offsets = [80, 0], sizes = [16, 512], strides = [1, 1]} : vector<128x512xf32> to vector<16x512xf32>
    %419 = vector.broadcast %417 : vector<1x512xf32> to vector<16x512xf32>
    %420 = arith.mulf %418, %419 : vector<16x512xf32>
    %421 = arith.addf %416, %420 : vector<16x512xf32>
    %422 = vector.extract_strided_slice %118 {offsets = [7, 0], sizes = [1, 512], strides = [1, 1]} : vector<8x512xf32> to vector<1x512xf32>
    %423 = vector.extract_strided_slice %8 {offsets = [96, 0], sizes = [16, 512], strides = [1, 1]} : vector<128x512xf32> to vector<16x512xf32>
    %424 = vector.broadcast %422 : vector<1x512xf32> to vector<16x512xf32>
    %425 = arith.mulf %423, %424 : vector<16x512xf32>
    %426 = arith.addf %421, %425 : vector<16x512xf32>
    %427 = vector.extract_strided_slice %119 {offsets = [7, 0], sizes = [1, 512], strides = [1, 1]} : vector<8x512xf32> to vector<1x512xf32>
    %428 = vector.extract_strided_slice %8 {offsets = [112, 0], sizes = [16, 512], strides = [1, 1]} : vector<128x512xf32> to vector<16x512xf32>
    %429 = vector.broadcast %427 : vector<1x512xf32> to vector<16x512xf32>
    %430 = arith.mulf %428, %429 : vector<16x512xf32>
    %431 = arith.addf %426, %430 : vector<16x512xf32>
    %432 = tpu.concatenate %158, %197, %236, %275, %314, %353, %392, %431 in 0 : vector<16x512xf32>, vector<16x512xf32>, vector<16x512xf32>, vector<16x512xf32>, vector<16x512xf32>, vector<16x512xf32>, vector<16x512xf32>, vector<16x512xf32> -> vector<128x512xf32>
    %c0_5 = arith.constant 0 : index
    %433 = memref.load %arg4[%c0_5] : memref<1xf32, #tpu.memory_space<smem>>
    %434 = vector.broadcast %433 : f32 to vector<128x512xf32>
    %435 = arith.mulf %434, %432 : vector<128x512xf32>
    %436 = arith.addf %435, %0 : vector<128x512xf32>
    %c0_6 = arith.constant 0 : index
    %c0_7 = arith.constant 0 : index
    %437 = vector.load %arg5[%c0_6, %c0_7] : memref<128x512xf32, #tpu.memory_space<vmem>>, vector<128x512xf32>
    tpu.vector_store %arg5[%c0_6, %c0_7], %436 {strides = array<i32>} : memref<128x512xf32, #tpu.memory_space<vmem>>, vector<128x512xf32>,
    return
  }
  func.func @transform_0(%arg0: i32) -> (i32, i32) {
    %c0_i32 = arith.constant 0 : i32
    %c0_i32_0 = arith.constant 0 : i32
    return %c0_i32, %arg0 : i32, i32
  }
  func.func @transform_1(%arg0: i32) -> (i32, i32) {
    %c0_i32 = arith.constant 0 : i32
    %c0_i32_0 = arith.constant 0 : i32
    %c0_i32_1 = arith.constant 0 : i32
    return %c0_i32, %c0_i32_0 : i32, i32
  }
  func.func @transform_2(%arg0: i32) -> (i32, i32) {
    %c0_i32 = arith.constant 0 : i32
    %c0_i32_0 = arith.constant 0 : i32
    %c0_i32_1 = arith.constant 0 : i32
    return %c0_i32, %c0_i32_0 : i32, i32
  }
  func.func @transform_3(%arg0: i32) -> i32 {
    %c0_i32 = arith.constant 0 : i32
    %c0_i32_0 = arith.constant 0 : i32
    return %c0_i32 : i32
  }
  func.func @transform_4(%arg0: i32) -> (i32, i32) {
    %c0_i32 = arith.constant 0 : i32
    %c0_i32_0 = arith.constant 0 : i32
    return %c0_i32, %arg0 : i32, i32
  }
}

</mosaic_0001>

<bundles_post_ra>
// kernel: tpu_custom_call.1
= control target key start
LH: loop header
LB: loop body
LE: loop exit
PB: predicated region body
PF: predicated region fallthrough
CT: control target
= control target key end

     0   :  { %10 = vsyncpa [#allocation4], 0  ;;  %s5872_s0 = inlined_call_operand.hbm [shape: f32[128,512], index: 0, kind: input, shape index: {}]   ;;  %s5873_s1 = inlined_call_operand.vmem [shape: f32[160,128], index: 1, kind: input, shape index: {}]   ;;  %s5874_s2 = inlined_call_operand.vmem [shape: f32[160,1], index: 2, kind: input, shape index: {}]   ;;  %s5875_s3 = inlined_call_operand.<no memory space> [shape: f32[1], index: 3, kind: input, shape index: {}]   ;;  %s5876_s4 = inlined_call_operand.hbm [shape: f32[128,512], index: 4, kind: output, shape index: {}]  }
   0x1   :  { %11 = vsyncpa [#allocation5], 0  ;;  %s16_s17 = sshll.u32 %s5872_s0, 4  ;;  %s2520_s18 = smov [#allocation3]   ;;  %s17_s17 = int_to_ptr.hbm [resolvable:$true] %s16_s17 }
   0x2   :  { %s18_s19 = sshll.u32 %s2520_s18, 4  ;;  %s2521_s20 = smov 512   ;;  %s19_s19 = int_to_ptr.vmem [resolvable:$true] %s18_s19 }
   0x3   :  { %s2522_s21 = smov 32  }
   0x4   :  { %24 = dma.hbm_to_vmem [thread:$0]  %s17_s17, 8192, %s19_s19, [#allocation4], %s2521_s20, %s2521_s20, %s2522_s21  }
   0x5   :  { %2516 = dma.done.wait [#allocation4], 8192  }
   0x6   :  { %2517 = vsyncadd [#allocation4], 4294959104  ;;  %v95_v0 = vld [vmem:[#allocation3 + $0x1e0] sm:$0xff]  ;;  %v96_v1 = vld [vmem:[#allocation3 + $0x1e8] sm:$0xff]  ;;  %s2311_s29 = sshll.u32 %s5876_s4, 4  ;;  %s2312_s29 = int_to_ptr.hbm [resolvable:$true] %s2311_s29 }
   0x7   :  { %v97_v2 = vld [vmem:[#allocation3 + $0x1f0] sm:$0xff]  ;;  %239 = vmatpush.msra.mxu0 %v95_v0  ;;  %316 = vmatpush.msra.mxu1 %v96_v1  ;;  %v98_v3 = vld [vmem:[#allocation3 + $0x1f8] sm:$0xff]  ;;  %v91_v4 = vld [vmem:[#allocation3 + $0x1c0] sm:$0xff] }
   0x8   :  { %v92_v5 = vld [vmem:[#allocation3 + $0x1c8] sm:$0xff]  ;;  %393 = vmatpush.msra.mxu2 %v97_v2  ;;  %470 = vmatpush.msra.mxu3 %v98_v3  ;;  %v93_v6 = vld [vmem:[#allocation3 + $0x1d0] sm:$0xff]  ;;  %v94_v7 = vld [vmem:[#allocation3 + $0x1d8] sm:$0xff]  ;;  %v2523_v3 = vmov 0  }
   0x9   :  { %v87_v8 = vld [vmem:[#allocation3 + $0x1a0] sm:$0xff]  ;;  %240 = vmatpush.msra.mxu0 %v91_v4  ;;  %317 = vmatpush.msra.mxu1 %v92_v5  ;;  %v88_v9 = vld [vmem:[#allocation3 + $0x1a8] sm:$0xff]  ;;  %v89_v10 = vld [vmem:[#allocation3 + $0x1b0] sm:$0xff] }
   0xa   :  { %v90_v11 = vld [vmem:[#allocation3 + $0x1b8] sm:$0xff]  ;;  %394 = vmatpush.msra.mxu2 %v93_v6  ;;  %471 = vmatpush.msra.mxu3 %v94_v7  ;;  %v83_v12 = vld [vmem:[#allocation3 + $0x180] sm:$0xff]  ;;  %v84_v13 = vld [vmem:[#allocation3 + $0x188] sm:$0xff] }
   0xb   :  { %241 = vmatpush.msra.mxu0 %v87_v8  ;;  %318 = vmatpush.msra.mxu1 %v88_v9  ;;  %v85_v14 = vld [vmem:[#allocation3 + $0x190] sm:$0xff]  ;;  %v86_v15 = vld [vmem:[#allocation3 + $0x198] sm:$0xff]  ;;  %v79_v16 = vld [vmem:[#allocation3 + $0x160] sm:$0xff] }
   0xc   :  { %395 = vmatpush.msra.mxu2 %v89_v10  ;;  %472 = vmatpush.msra.mxu3 %v90_v11  ;;  %v80_v17 = vld [vmem:[#allocation3 + $0x168] sm:$0xff]  ;;  %v81_v18 = vld [vmem:[#allocation3 + $0x170] sm:$0xff]  ;;  %v82_v19 = vld [vmem:[#allocation3 + $0x178] sm:$0xff] }
   0xd   :  { %242 = vmatpush.msra.mxu0 %v83_v12  ;;  %319 = vmatpush.msra.mxu1 %v84_v13  ;;  %v75_v20 = vld [vmem:[#allocation3 + $0x140] sm:$0xff]  ;;  %v76_v21 = vld [vmem:[#allocation3 + $0x148] sm:$0xff]  ;;  %v77_v22 = vld [vmem:[#allocation3 + $0x150] sm:$0xff] }
   0xe   :  { %396 = vmatpush.msra.mxu2 %v85_v14  ;;  %473 = vmatpush.msra.mxu3 %v86_v15  ;;  %v78_v23 = vld [vmem:[#allocation3 + $0x158] sm:$0xff]  ;;  %v71_v24 = vld [vmem:[#allocation3 + $0x120] sm:$0xff]  ;;  %v72_v25 = vld [vmem:[#allocation3 + $0x128] sm:$0xff] }
   0xf   :  { %243 = vmatpush.msra.mxu0 %v79_v16  ;;  %320 = vmatpush.msra.mxu1 %v80_v17  ;;  %v73_v26 = vld [vmem:[#allocation3 + $0x130] sm:$0xff]  ;;  %v74_v27 = vld [vmem:[#allocation3 + $0x138] sm:$0xff]  ;;  %v67_v28 = vld [vmem:[#allocation3 + $0x100] sm:$0xff] }
  0x10   :  { %397 = vmatpush.msra.mxu2 %v81_v18  ;;  %474 = vmatpush.msra.mxu3 %v82_v19  ;;  %v68_v29 = vld [vmem:[#allocation3 + $0x108] sm:$0xff]  ;;  %v69_v30 = vld [vmem:[#allocation3 + $0x110] sm:$0xff]  ;;  %v70_v31 = vld [vmem:[#allocation3 + $0x118] sm:$0xff] }
  0x11   :  { %244 = vmatpush.msra.mxu0 %v75_v20  ;;  %321 = vmatpush.msra.mxu1 %v76_v21  ;;  %v63_v32 = vld [vmem:[#allocation3 + $0xe0] sm:$0xff]  ;;  %v64_v33 = vld [vmem:[#allocation3 + $0xe8] sm:$0xff]  ;;  %v65_v34 = vld [vmem:[#allocation3 + $0xf0] sm:$0xff] }
  0x12   :  { %398 = vmatpush.msra.mxu2 %v77_v22  ;;  %475 = vmatpush.msra.mxu3 %v78_v23  ;;  %v66_v35 = vld [vmem:[#allocation3 + $0xf8] sm:$0xff]  ;;  %v59_v36 = vld [vmem:[#allocation3 + $0xc0] sm:$0xff]  ;;  %v60_v37 = vld [vmem:[#allocation3 + $0xc8] sm:$0xff] }
  0x13   :  { %245 = vmatpush.msra.mxu0 %v71_v24  ;;  %322 = vmatpush.msra.mxu1 %v72_v25  ;;  %v61_v38 = vld [vmem:[#allocation3 + $0xd0] sm:$0xff]  ;;  %v62_v39 = vld [vmem:[#allocation3 + $0xd8] sm:$0xff]  ;;  %v55_v40 = vld [vmem:[#allocation3 + $0xa0] sm:$0xff] }
  0x14   :  { %399 = vmatpush.msra.mxu2 %v73_v26  ;;  %476 = vmatpush.msra.mxu3 %v74_v27  ;;  %v56_v41 = vld [vmem:[#allocation3 + $0xa8] sm:$0xff]  ;;  %v57_v42 = vld [vmem:[#allocation3 + $0xb0] sm:$0xff]  ;;  %v58_v43 = vld [vmem:[#allocation3 + $0xb8] sm:$0xff] }
  0x15   :  { %246 = vmatpush.msra.mxu0 %v67_v28  ;;  %323 = vmatpush.msra.mxu1 %v68_v29  ;;  %v51_v44 = vld [vmem:[#allocation3 + $0x80] sm:$0xff]  ;;  %v52_v45 = vld [vmem:[#allocation3 + $0x88] sm:$0xff]  ;;  %v53_v46 = vld [vmem:[#allocation3 + $0x90] sm:$0xff] }
  0x16   :  { %400 = vmatpush.msra.mxu2 %v69_v30  ;;  %477 = vmatpush.msra.mxu3 %v70_v31  ;;  %v54_v47 = vld [vmem:[#allocation3 + $0x98] sm:$0xff]  ;;  %v47_v48 = vld [vmem:[#allocation3 + $0x60] sm:$0xff]  ;;  %v48_v49 = vld [vmem:[#allocation3 + $0x68] sm:$0xff] }
  0x17   :  { %247 = vmatpush.msra.mxu0 %v63_v32  ;;  %324 = vmatpush.msra.mxu1 %v64_v33  ;;  %v49_v50 = vld [vmem:[#allocation3 + $0x70] sm:$0xff]  ;;  %v50_v51 = vld [vmem:[#allocation3 + $0x78] sm:$0xff]  ;;  %v43_v52 = vld [vmem:[#allocation3 + $0x40] sm:$0xff] }
  0x18   :  { %401 = vmatpush.msra.mxu2 %v65_v34  ;;  %478 = vmatpush.msra.mxu3 %v66_v35  ;;  %v44_v53 = vld [vmem:[#allocation3 + $0x48] sm:$0xff]  ;;  %v45_v54 = vld [vmem:[#allocation3 + $0x50] sm:$0xff]  ;;  %v46_v55 = vld [vmem:[#allocation3 + $0x58] sm:$0xff] }
  0x19   :  { %248 = vmatpush.msra.mxu0 %v59_v36  ;;  %325 = vmatpush.msra.mxu1 %v60_v37  ;;  %v39_v56 = vld [vmem:[#allocation3 + $0x20] sm:$0xff]  ;;  %v40_v57 = vld [vmem:[#allocation3 + $0x28] sm:$0xff]  ;;  %v41_v58 = vld [vmem:[#allocation3 + $0x30] sm:$0xff] }
  0x1a   :  { %402 = vmatpush.msra.mxu2 %v61_v38  ;;  %479 = vmatpush.msra.mxu3 %v62_v39  ;;  %v42_v59 = vld [vmem:[#allocation3 + $0x38] sm:$0xff]  ;;  %v35_v60 = vld [vmem:[#allocation3] sm:$0xff]  ;;  %v36_v61 = vld [vmem:[#allocation3 + $0x8] sm:$0xff] }
  0x1b   :  { %249 = vmatpush.msra.mxu0 %v55_v40  ;;  %326 = vmatpush.msra.mxu1 %v56_v41  ;;  %v37_v62 = vld [vmem:[#allocation3 + $0x10] sm:$0xff]  ;;  %v38_v63 = vld [vmem:[#allocation3 + $0x18] sm:$0xff]  ;;  %v99_v0 = vld [vmem:[%s5873_s1] sm:$0xff] }
  0x1c   :  { %403 = vmatpush.msra.mxu2 %v57_v42  ;;  %480 = vmatpush.msra.mxu3 %v58_v43  ;;  %v119_v1 = vld [vmem:[%s5874_s2] sm:$0xff]  ;;  %v121_v2 = vld [vmem:[%s5874_s2 + $0x10] sm:$0xff]  ;;  %v100_v4 = vld [vmem:[%s5873_s1 + $0x8] sm:$0xff] }
  0x1d   :  { %250 = vmatpush.msra.mxu0 %v51_v44  ;;  %327 = vmatpush.msra.mxu1 %v52_v45  ;;  %v120_v5 = vld [vmem:[%s5874_s2 + $0x8] sm:$0xff]  ;;  %v122_v6 = vld [vmem:[%s5874_s2 + $0x18] sm:$0xff]  ;;  %v101_v7 = vld [vmem:[%s5873_s1 + $0x10] sm:$0xff] }
  0x1e   :  { %404 = vmatpush.msra.mxu2 %v53_v46  ;;  %481 = vmatpush.msra.mxu3 %v54_v47  ;;  %v102_v8 = vld [vmem:[%s5873_s1 + $0x18] sm:$0xff]  ;;  %v125_v9 = vld [vmem:[%s5874_s2 + $0x30] sm:$0xff]  ;;  %v103_v11 = vld [vmem:[%s5873_s1 + $0x20] sm:$0xff] }
  0x1f   :  { %251 = vmatpush.msra.mxu0 %v47_v48  ;;  %328 = vmatpush.msra.mxu1 %v48_v49  ;;  %v126_v10 = vld [vmem:[%s5874_s2 + $0x38] sm:$0xff]  ;;  %v128_v12 = vld [vmem:[%s5874_s2 + $0x48] sm:$0xff]  ;;  %v129_v13 = vld [vmem:[%s5874_s2 + $0x50] sm:$0xff] }
  0x20   :  { %405 = vmatpush.msra.mxu2 %v49_v50  ;;  %482 = vmatpush.msra.mxu3 %v50_v51  ;;  %v104_v14 = vld [vmem:[%s5873_s1 + $0x28] sm:$0xff]  ;;  %v123_v15 = vld [vmem:[%s5874_s2 + $0x20] sm:$0xff]  ;;  %v105_v18 = vld [vmem:[%s5873_s1 + $0x30] sm:$0xff] }
  0x21   :  { %252 = vmatpush.msra.mxu0 %v43_v52  ;;  %329 = vmatpush.msra.mxu1 %v44_v53  ;;  %v131_v16 = vld [vmem:[%s5874_s2 + $0x60] sm:$0xff]  ;;  %v132_v17 = vld [vmem:[%s5874_s2 + $0x68] sm:$0xff]  ;;  %v134_v20 = vld [vmem:[%s5874_s2 + $0x78] sm:$0xff] }
  0x22   :  { %406 = vmatpush.msra.mxu2 %v45_v54  ;;  %483 = vmatpush.msra.mxu3 %v46_v55  ;;  %v124_v19 = vld [vmem:[%s5874_s2 + $0x28] sm:$0xff]  ;;  %v135_v21 = vld [vmem:[%s5874_s2 + $0x80] sm:$0xff]  ;;  %v106_v22 = vld [vmem:[%s5873_s1 + $0x38] sm:$0xff] }
  0x23   :  { %253 = vmatpush.msra.mxu0 %v39_v56  ;;  %330 = vmatpush.msra.mxu1 %v40_v57  ;;  %v137_v23 = vld [vmem:[%s5874_s2 + $0x90] sm:$0xff]  ;;  %v138_v24 = vld [vmem:[%s5874_s2 + $0x98] sm:$0xff]  ;;  %v107_v25 = vld [vmem:[%s5873_s1 + $0x40] sm:$0xff] }
  0x24   :  { %407 = vmatpush.msra.mxu2 %v41_v58  ;;  %484 = vmatpush.msra.mxu3 %v42_v59  ;;  %v108_v26 = vld [vmem:[%s5873_s1 + $0x48] sm:$0xff]  ;;  %v127_v27 = vld [vmem:[%s5874_s2 + $0x40] sm:$0xff]  ;;  %v109_v28 = vld [vmem:[%s5873_s1 + $0x50] sm:$0xff] }
  0x25   :  { %254 = vmatpush.msra.mxu0 %v35_v60  ;;  %331 = vmatpush.msra.mxu1 %v36_v61  ;;  %v110_v29 = vld [vmem:[%s5873_s1 + $0x58] sm:$0xff]  ;;  %v111_v31 = vld [vmem:[%s5873_s1 + $0x60] sm:$0xff]  ;;  %v112_v32 = vld [vmem:[%s5873_s1 + $0x68] sm:$0xff] }
  0x26   :  { %408 = vmatpush.msra.mxu2 %v37_v62  ;;  %485 = vmatpush.msra.mxu3 %v38_v63  ;;  %v130_v30 = vld [vmem:[%s5874_s2 + $0x58] sm:$0xff]  ;;  %v113_v33 = vld [vmem:[%s5873_s1 + $0x70] sm:$0xff]  ;;  %v115_v38 = vld [vmem:[%s5873_s1 + $0x80] sm:$0xff] }
  0x27   :  { %255 = vmatmul.f32.vlgmr.msra.gmra.mxu0 %v99_v0  ;;  %332 = vmatmul.f32.vlgmr.msra.gmra.mxu1 %v99_v0  ;;  %v133_v34 = vld [vmem:[%s5874_s2 + $0x70] sm:$0xff]  ;;  %v114_v35 = vld [vmem:[%s5873_s1 + $0x78] sm:$0xff]  ;;  %v116_v44 = vld [vmem:[%s5873_s1 + $0x88] sm:$0xff] }
  0x28   :  { %409 = vmatmul.f32.vlgmr.msra.gmra.mxu2 %v99_v0  ;;  %486 = vmatmul.f32.vlgmr.msra.gmra.mxu3 %v99_v0  ;;  %v117_v50 = vld [vmem:[%s5873_s1 + $0x90] sm:$0xff]  ;;  %v136_v55 = vld [vmem:[%s5874_s2 + $0x88] sm:$0xff] }
  0x29   :  { %2330 = vset.pattern.permute.xlu1 %v2523_v3  ;;  %2329 = vset.pattern.permute.xlu0 %v2523_v3 }
  0x2a   :  { %141 = vperm.xlu1 %2330, %v119_v1   ;;  %151 = vperm.xlu0 %2329, %v121_v2  }
  0x2b   :  { %2331 = vset.pattern.permute.xlu2 %v2523_v3 }
  0x2c   :  { %161 = vperm.xlu2 %2331, %v123_v15  }
  0x2f   :  { %258 = vmatmul.f32.gmra.mxu0 %v100_v4  ;;  %335 = vmatmul.f32.gmra.mxu1 %v100_v4 }
  0x30   :  { %412 = vmatmul.f32.gmra.mxu2 %v100_v4  ;;  %489 = vmatmul.f32.gmra.mxu3 %v100_v4 }
  0x32   :  { %146 = vperm.xlu1 %2330, %v120_v5   ;;  %156 = vperm.xlu0 %2329, %v122_v6  }
  0x34   :  { %166 = vperm.xlu2 %2331, %v124_v19  }
  0x37   :  { %261 = vmatmul.f32.gmra.mxu0 %v101_v7  ;;  %338 = vmatmul.f32.gmra.mxu1 %v101_v7 }
  0x38   :  { %415 = vmatmul.f32.gmra.mxu2 %v101_v7  ;;  %492 = vmatmul.f32.gmra.mxu3 %v101_v7 }
  0x3a   :  { %171 = vperm.xlu0 %2329, %v125_v9   ;;  %176 = vperm.xlu1 %2330, %v126_v10  }
  0x3c   :  { %181 = vperm.xlu2 %2331, %v127_v27  }
  0x3f   :  { %264 = vmatmul.f32.gmra.mxu0 %v102_v8  ;;  %341 = vmatmul.f32.gmra.mxu1 %v102_v8 }
  0x40   :  { %418 = vmatmul.f32.gmra.mxu2 %v102_v8  ;;  %495 = vmatmul.f32.gmra.mxu3 %v102_v8 }
  0x42   :  { %186 = vperm.xlu0 %2329, %v128_v12   ;;  %191 = vperm.xlu1 %2330, %v129_v13  }
  0x44   :  { %196 = vperm.xlu2 %2331, %v130_v30  }
  0x47   :  { %267 = vmatmul.f32.gmra.mxu0 %v103_v11  ;;  %344 = vmatmul.f32.gmra.mxu1 %v103_v11 }
  0x48   :  { %421 = vmatmul.f32.gmra.mxu2 %v103_v11  ;;  %498 = vmatmul.f32.gmra.mxu3 %v103_v11 }
  0x4a   :  { %201 = vperm.xlu0 %2329, %v131_v16   ;;  %206 = vperm.xlu1 %2330, %v132_v17   ;;  %v118_v17 = vld [vmem:[%s5873_s1 + $0x98] sm:$0xff] }
  0x4c   :  { %211 = vperm.xlu2 %2331, %v133_v34  }
  0x4f   :  { %270 = vmatmul.f32.gmra.mxu0 %v104_v14  ;;  %347 = vmatmul.f32.gmra.mxu1 %v104_v14 }
  0x50   :  { %424 = vmatmul.f32.gmra.mxu2 %v104_v14  ;;  %501 = vmatmul.f32.gmra.mxu3 %v104_v14 }
  0x52   :  { %216 = vperm.xlu0 %2329, %v134_v20   ;;  %221 = vperm.xlu1 %2330, %v135_v21  }
  0x54   :  { %226 = vperm.xlu2 %2331, %v136_v55  }
  0x57   :  { %273 = vmatmul.f32.gmra.mxu0 %v105_v18  ;;  %350 = vmatmul.f32.gmra.mxu1 %v105_v18 }
  0x58   :  { %427 = vmatmul.f32.gmra.mxu2 %v105_v18  ;;  %504 = vmatmul.f32.gmra.mxu3 %v105_v18 }
  0x5a   :  { %231 = vperm.xlu0 %2329, %v137_v23   ;;  %236 = vperm.xlu1 %2330, %v138_v24  }
  0x5f   :  { %276 = vmatmul.f32.gmra.mxu0 %v106_v22  ;;  %353 = vmatmul.f32.gmra.mxu1 %v106_v22 }
  0x60   :  { %430 = vmatmul.f32.gmra.mxu2 %v106_v22  ;;  %507 = vmatmul.f32.gmra.mxu3 %v106_v22 }
  0x67   :  { %279 = vmatmul.f32.gmra.mxu0 %v107_v25  ;;  %356 = vmatmul.f32.gmra.mxu1 %v107_v25 }
  0x68   :  { %433 = vmatmul.f32.gmra.mxu2 %v107_v25  ;;  %510 = vmatmul.f32.gmra.mxu3 %v107_v25 }
  0x6f   :  { %282 = vmatmul.f32.gmra.mxu0 %v108_v26  ;;  %359 = vmatmul.f32.gmra.mxu1 %v108_v26 }
  0x70   :  { %436 = vmatmul.f32.gmra.mxu2 %v108_v26  ;;  %513 = vmatmul.f32.gmra.mxu3 %v108_v26 }
  0x77   :  { %285 = vmatmul.f32.gmra.mxu0 %v109_v28  ;;  %362 = vmatmul.f32.gmra.mxu1 %v109_v28 }
  0x78   :  { %439 = vmatmul.f32.gmra.mxu2 %v109_v28  ;;  %516 = vmatmul.f32.gmra.mxu3 %v109_v28 }
  0x7f   :  { %288 = vmatmul.f32.gmra.mxu0 %v110_v29  ;;  %365 = vmatmul.f32.gmra.mxu1 %v110_v29 }
  0x80   :  { %442 = vmatmul.f32.gmra.mxu2 %v110_v29  ;;  %519 = vmatmul.f32.gmra.mxu3 %v110_v29 }
  0x87   :  { %291 = vmatmul.f32.gmra.mxu0 %v111_v31  ;;  %368 = vmatmul.f32.gmra.mxu1 %v111_v31 }
  0x88   :  { %445 = vmatmul.f32.gmra.mxu2 %v111_v31  ;;  %522 = vmatmul.f32.gmra.mxu3 %v111_v31 }
  0x8f   :  { %294 = vmatmul.f32.gmra.mxu0 %v112_v32  ;;  %371 = vmatmul.f32.gmra.mxu1 %v112_v32 }
  0x90   :  { %448 = vmatmul.f32.gmra.mxu2 %v112_v32  ;;  %525 = vmatmul.f32.gmra.mxu3 %v112_v32 }
  0x97   :  { %297 = vmatmul.f32.gmra.mxu0 %v113_v33  ;;  %374 = vmatmul.f32.gmra.mxu1 %v113_v33 }
  0x98   :  { %451 = vmatmul.f32.gmra.mxu2 %v113_v33  ;;  %528 = vmatmul.f32.gmra.mxu3 %v113_v33 }
  0x9c   :  { %v142_v39 = vpop.permute.xlu1 %141  ;;  %v152_v45 = vpop.permute.xlu0 %151 }
  0x9f   :  { %300 = vmatmul.f32.gmra.mxu0 %v114_v35  ;;  %377 = vmatmul.f32.gmra.mxu1 %v114_v35 }
  0xa0   :  { %454 = vmatmul.f32.gmra.mxu2 %v114_v35  ;;  %531 = vmatmul.f32.gmra.mxu3 %v114_v35 }
  0xa4   :  { %v256_v36 = vpop.f32.mrf.mxu0  ;;  %v333_v37 = vpop.f32.mrf.mxu1 }
  0xa5   :  { %v147_v51 = vpop.permute.xlu1 %146  ;;  %v257_v53 = vadd.f32 %v256_v36, %v142_v39  ;;  %v2670_v54 = vadd.f32 %v333_v37, %v142_v39  ;;  %v2718_v31 = vpop.permute.xlu0 %156 }
  0xa7   :  { %303 = vmatmul.f32.gmra.mxu0 %v115_v38  ;;  %380 = vmatmul.f32.gmra.mxu1 %v115_v38 }
  0xa8   :  { %457 = vmatmul.f32.gmra.mxu2 %v115_v38  ;;  %534 = vmatmul.f32.gmra.mxu3 %v115_v38 }
  0xab   :  { %v410_v40 = vpop.f32.mrf.mxu2  ;;  %v487_v41 = vpop.f32.mrf.mxu3 }
  0xac   :  { %v259_v42 = vpop.f32.mrf.mxu0  ;;  %v336_v43 = vpop.f32.mrf.mxu1  ;;  %v2675_v56 = vadd.f32 %v410_v40, %v142_v39  ;;  %v2677_v57 = vadd.f32 %v487_v41, %v142_v39 }
  0xad   :  { %v2679_v60 = vadd.f32 %v259_v42, %v147_v51  ;;  %v2681_v61 = vadd.f32 %v336_v43, %v147_v51 }
  0xaf   :  { %306 = vmatmul.f32.gmra.mxu0 %v116_v44  ;;  %383 = vmatmul.f32.gmra.mxu1 %v116_v44 }
  0xb0   :  { %460 = vmatmul.f32.gmra.mxu2 %v116_v44  ;;  %537 = vmatmul.f32.gmra.mxu3 %v116_v44 }
  0xb3   :  { %v413_v46 = vpop.f32.mrf.mxu2  ;;  %v490_v47 = vpop.f32.mrf.mxu3 }
  0xb4   :  { %v262_v48 = vpop.f32.mrf.mxu0  ;;  %v339_v49 = vpop.f32.mrf.mxu1  ;;  %v2683_v4 = vadd.f32 %v413_v46, %v147_v51  ;;  %v2685_v5 = vadd.f32 %v490_v47, %v147_v51 }
  0xb5   :  { %v263_v52 = vadd.f32 %v262_v48, %v152_v45  ;;  %v340_v59 = vadd.f32 %v339_v49, %v152_v45 }
  0xb7   :  { %v547_v58 = vperm.slane %v263_v52, 0  ;;  %309 = vmatmul.f32.gmra.mxu0 %v117_v50  ;;  %386 = vmatmul.f32.gmra.mxu1 %v117_v50  ;;  %v567_v62 = vperm.slane %v263_v52, 1  ;;  %v587_v63 = vperm.slane %v263_v52, 2  ;;  %v607_v0 = vperm.slane %v263_v52, 3 }
  0xb8   :  { %463 = vmatmul.f32.gmra.mxu2 %v117_v50  ;;  %540 = vmatmul.f32.gmra.mxu3 %v117_v50  ;;  %v627_v1 = vperm.slane %v263_v52, 4  ;;  %v647_v2 = vperm.slane %v263_v52, 5  ;;  %v667_v3 = vperm.slane %v263_v52, 6  ;;  %v687_v7 = vperm.slane %v263_v52, 7 }
  0xb9   :  { %v2687_v6 = vmul.f32 %v547_v58, %v257_v53  ;;  %v548_v8 = vperm.slane %v340_v59, 0  ;;  %v568_v9 = vperm.slane %v340_v59, 1  ;;  %v588_v10 = vperm.slane %v340_v59, 2 }
  0xba   :  { %v608_v11 = vperm.slane %v340_v59, 3  ;;  %v2689_v12 = vmul.f32 %v567_v62, %v257_v53  ;;  %v2691_v13 = vmul.f32 %v587_v63, %v257_v53  ;;  %v628_v14 = vperm.slane %v340_v59, 4 }
  0xbb   :  { %v648_v15 = vperm.slane %v340_v59, 5  ;;  %v416_v16 = vpop.f32.mrf.mxu2  ;;  %v2696_v18 = vmul.f32 %v607_v0, %v257_v53  ;;  %v2698_v19 = vmul.f32 %v627_v1, %v257_v53  ;;  %v2700_v20 = vmul.f32 %v647_v2, %v257_v53  ;;  %v493_v22 = vpop.f32.mrf.mxu3 }
  0xbc   :  { %v2702_v21 = vmul.f32 %v667_v3, %v257_v53  ;;  %v2704_v23 = vmul.f32 %v687_v7, %v257_v53  ;;  %v2707_v24 = vmul.f32 %v548_v8, %v2670_v54  ;;  %v668_v25 = vperm.slane %v340_v59, 6  ;;  %v265_v35 = vpop.f32.mrf.mxu0  ;;  %v342_v36 = vpop.f32.mrf.mxu1 }
  0xbd   :  { %v688_v26 = vperm.slane %v340_v59, 7  ;;  %v2710_v27 = vmul.f32 %v568_v9, %v2670_v54  ;;  %v2713_v28 = vmul.f32 %v588_v10, %v2670_v54  ;;  %v2716_v29 = vmul.f32 %v608_v11, %v2670_v54 }
  0xbe   :  { %v417_v30 = vadd.f32 %v416_v16, %v152_v45  ;;  %v2721_v32 = vmul.f32 %v628_v14, %v2670_v54  ;;  %v2724_v33 = vmul.f32 %v648_v15, %v2670_v54  ;;  %v2726_v34 = vadd.f32 %v493_v22, %v152_v45 }
  0xbf   :  { %312 = vmatmul.f32.gmra.mxu0 %v118_v17  ;;  %389 = vmatmul.f32.gmra.mxu1 %v118_v17  ;;  %v2729_v46 = vmul.f32 %v668_v25, %v2670_v54  ;;  %v2732_v47 = vmul.f32 %v688_v26, %v2670_v54  ;;  %v266_v45 = vadd.f32 %v265_v35, %v2718_v31 }
  0xc0   :  { %466 = vmatmul.f32.gmra.mxu2 %v118_v17  ;;  %v549_v37 = vperm.slane %v417_v30, 0  ;;  %v569_v38 = vperm.slane %v417_v30, 1  ;;  %v589_v39 = vperm.slane %v417_v30, 2  ;;  %v609_v40 = vperm.slane %v417_v30, 3  ;;  %543 = vmatmul.f32.gmra.mxu3 %v118_v17 }
  0xc1   :  { %v629_v41 = vperm.slane %v417_v30, 4  ;;  %v649_v42 = vperm.slane %v417_v30, 5  ;;  %v669_v43 = vperm.slane %v417_v30, 6  ;;  %v689_v44 = vperm.slane %v417_v30, 7 }
  0xc2   :  { %v2736_v48 = vadd.f32 %v342_v36, %v2718_v31  ;;  %v2739_v49 = vmul.f32 %v549_v37, %v2675_v56  ;;  %v2742_v50 = vmul.f32 %v569_v38, %v2675_v56  ;;  %v2745_v51 = vmul.f32 %v589_v39, %v2675_v56 }
  0xc3   :  { %v2748_v52 = vmul.f32 %v609_v40, %v2675_v56  ;;  %v550_v53 = vperm.slane %v2726_v34, 0  ;;  %v570_v54 = vperm.slane %v2726_v34, 1  ;;  %v590_v55 = vperm.slane %v2726_v34, 2 }
  0xc4   :  { %v610_v58 = vperm.slane %v2726_v34, 3  ;;  %v2755_v59 = vmul.f32 %v629_v41, %v2675_v56  ;;  %v2758_v62 = vmul.f32 %v649_v42, %v2675_v56  ;;  %v2761_v63 = vmul.f32 %v669_v43, %v2675_v56 }
  0xc5   :  { %v2764_v0 = vmul.f32 %v689_v44, %v2675_v56  ;;  %v630_v1 = vperm.slane %v2726_v34, 4  ;;  %v650_v2 = vperm.slane %v2726_v34, 5  ;;  %v670_v3 = vperm.slane %v2726_v34, 6 }
  0xc6   :  { %v690_v7 = vperm.slane %v2726_v34, 7  ;;  %v2771_v8 = vmul.f32 %v550_v53, %v2677_v57  ;;  %v2774_v9 = vmul.f32 %v570_v54, %v2677_v57  ;;  %v2777_v10 = vmul.f32 %v590_v55, %v2677_v57 }
  0xc7   :  { %v2780_v56 = vmul.f32 %v610_v58, %v2677_v57  ;;  %v555_v11 = vperm.slane %v266_v45, 0  ;;  %v575_v14 = vperm.slane %v266_v45, 1  ;;  %v595_v15 = vperm.slane %v266_v45, 2 }
  0xc8   :  { %v615_v16 = vperm.slane %v266_v45, 3  ;;  %v635_v17 = vperm.slane %v266_v45, 4  ;;  %v655_v22 = vperm.slane %v266_v45, 5  ;;  %v675_v25 = vperm.slane %v266_v45, 6 }
  0xc9   :  { %v695_v26 = vperm.slane %v266_v45, 7  ;;  %v559_v30 = vmul.f32 %v555_v11, %v2679_v60  ;;  %v579_v35 = vmul.f32 %v575_v14, %v2679_v60  ;;  %v599_v36 = vmul.f32 %v595_v15, %v2679_v60 }
  0xca   :  { %v619_v37 = vmul.f32 %v615_v16, %v2679_v60  ;;  %v639_v38 = vmul.f32 %v635_v17, %v2679_v60  ;;  %v659_v39 = vmul.f32 %v655_v22, %v2679_v60  ;;  %v679_v40 = vmul.f32 %v675_v25, %v2679_v60 }
  0xcb   :  { %v699_v41 = vmul.f32 %v695_v26, %v2679_v60  ;;  %v2791_v42 = vadd.f32 %v559_v30, %v2687_v6  ;;  %v2794_v43 = vadd.f32 %v579_v35, %v2689_v12  ;;  %v2797_v44 = vadd.f32 %v599_v36, %v2691_v13  ;;  %v419_v26 = vpop.f32.mrf.mxu2 }
  0xcc   :  { %v2800_v45 = vadd.f32 %v619_v37, %v2696_v18  ;;  %v2803_v53 = vadd.f32 %v639_v38, %v2698_v19  ;;  %v2806_v54 = vadd.f32 %v659_v39, %v2700_v20  ;;  %v2809_v60 = vadd.f32 %v679_v40, %v2702_v21  ;;  %v496_v38 = vpop.f32.mrf.mxu3 }
  0xcd   :  { %v2812_v6 = vadd.f32 %v699_v41, %v2704_v23  ;;  %v707_v12 = vmax.f32 %v2791_v42, %v2794_v43  ;;  %v556_v13 = vperm.slane %v2736_v48, 0  ;;  %v576_v18 = vperm.slane %v2736_v48, 1 }
  0xce   :  { %v596_v55 = vperm.slane %v2736_v48, 2  ;;  %v616_v19 = vperm.slane %v2736_v48, 3  ;;  %v636_v20 = vperm.slane %v2736_v48, 4  ;;  %v656_v58 = vperm.slane %v2736_v48, 5 }
  0xcf   :  { %v676_v21 = vperm.slane %v2736_v48, 6  ;;  %v711_v23 = vmax.f32 %v707_v12, %v2797_v44  ;;  %v560_v11 = vmul.f32 %v556_v13, %v2681_v61  ;;  %v580_v14 = vmul.f32 %v576_v18, %v2681_v61 }
  0xd0   :  { %v600_v15 = vmul.f32 %v596_v55, %v2681_v61  ;;  %v620_v16 = vmul.f32 %v616_v19, %v2681_v61  ;;  %v640_v17 = vmul.f32 %v636_v20, %v2681_v61  ;;  %v660_v22 = vmul.f32 %v656_v58, %v2681_v61 }
  0xd1   :  { %v680_v25 = vmul.f32 %v676_v21, %v2681_v61  ;;  %v715_v30 = vmax.f32 %v711_v23, %v2800_v45  ;;  %v2833_v35 = vadd.f32 %v560_v11, %v2707_v24  ;;  %v2836_v36 = vadd.f32 %v580_v14, %v2710_v27 }
  0xd2   :  { %v2839_v37 = vadd.f32 %v600_v15, %v2713_v28  ;;  %v2842_v39 = vadd.f32 %v620_v16, %v2716_v29  ;;  %v2845_v40 = vadd.f32 %v640_v17, %v2721_v32  ;;  %v2848_v41 = vadd.f32 %v660_v22, %v2724_v33 }
  0xd3   :  { %v2851_v12 = vadd.f32 %v680_v25, %v2729_v46  ;;  %v719_v24 = vmax.f32 %v715_v30, %v2803_v53  ;;  %v696_v27 = vperm.slane %v2736_v48, 7  ;;  %v708_v28 = vmax.f32 %v2833_v35, %v2836_v36 }
  0xd4   :  { %v420_v13 = vadd.f32 %v419_v26, %v2718_v31  ;;  %v2859_v29 = vmul.f32 %v630_v1, %v2677_v57  ;;  %v2862_v32 = vmul.f32 %v650_v2, %v2677_v57  ;;  %v2865_v33 = vmul.f32 %v670_v3, %v2677_v57 }
  0xd5   :  { %v2868_v46 = vadd.f32 %v496_v38, %v2718_v31  ;;  %v723_v18 = vmax.f32 %v719_v24, %v2806_v54  ;;  %v700_v48 = vmul.f32 %v696_v27, %v2681_v61  ;;  %v712_v55 = vmax.f32 %v708_v28, %v2839_v37 }
  0xd6   :  { %v557_v19 = vperm.slane %v420_v13, 0  ;;  %v577_v20 = vperm.slane %v420_v13, 1  ;;  %v597_v58 = vperm.slane %v420_v13, 2  ;;  %v617_v1 = vperm.slane %v420_v13, 3 }
  0xd7   :  { %v637_v21 = vperm.slane %v420_v13, 4  ;;  %v727_v2 = vmax.f32 %v723_v18, %v2809_v60  ;;  %v2875_v23 = vadd.f32 %v700_v48, %v2732_v47  ;;  %v716_v3 = vmax.f32 %v712_v55, %v2842_v39 }
  0xd8   :  { %v561_v31 = vmul.f32 %v557_v19, %v2683_v4  ;;  %v581_v11 = vmul.f32 %v577_v20, %v2683_v4  ;;  %v601_v61 = vmul.f32 %v597_v58, %v2683_v4  ;;  %v621_v14 = vmul.f32 %v617_v1, %v2683_v4 }
  0xd9   :  { %v641_v15 = vmul.f32 %v637_v21, %v2683_v4  ;;  %v731_v16 = vmax.f32 %v727_v2, %v2812_v6  ;;  %v720_v17 = vmax.f32 %v716_v3, %v2845_v40  ;;  %v657_v47 = vperm.slane %v420_v13, 5 }
  0xda   :  { %v2886_v22 = vadd.f32 %v561_v31, %v2739_v49  ;;  %v2889_v25 = vadd.f32 %v581_v11, %v2742_v50  ;;  %v2892_v26 = vadd.f32 %v601_v61, %v2745_v51  ;;  %v2895_v30 = vadd.f32 %v621_v14, %v2748_v52 }
  0xdb   :  { %v2898_v38 = vadd.f32 %v641_v15, %v2755_v59  ;;  %v735_v24 = vsub.f32 %v2791_v42, %v731_v16  ;;  %v747_v27 = vsub.f32 %v2794_v43, %v731_v16  ;;  %v759_v49 = vsub.f32 %v2797_v44, %v731_v16 }
  0xdc   :  { %v771_v28 = vsub.f32 %v2800_v45, %v731_v16  ;;  %v783_v50 = vsub.f32 %v2803_v53, %v731_v16  ;;  %v795_v18 = vsub.f32 %v2806_v54, %v731_v16  ;;  %v807_v51 = vsub.f32 %v2809_v60, %v731_v16 }
  0xdd   :  { %v819_v52 = vsub.f32 %v2812_v6, %v731_v16  ;;  %v739_v48 = vmul.f32 1.442695, %v735_v24  ;;  %v751_v55 = vmul.f32 1.442695, %v747_v27  ;;  %v763_v59 = vmul.f32 1.442695, %v759_v49 }
  0xde   :  { %v724_v19 = vmax.f32 %v720_v17, %v2848_v41  ;;  %v775_v42 = vmul.f32 1.442695, %v771_v28  ;;  %v787_v20 = vmul.f32 1.442695, %v783_v50  ;;  %v799_v43 = vmul.f32 1.442695, %v795_v18  ;;  %v2927_v17 = vpop.f32.mrf.mxu0 }
  0xdf   :  { %v661_v44 = vmul.f32 %v657_v47, %v2683_v4  ;;  %2332 = vpow2.f32 %v739_v48  ;;  %v811_v45 = vmul.f32 1.442695, %v807_v51  ;;  %v823_v58 = vmul.f32 1.442695, %v819_v52 }
  0xe0   :  { %v728_v53 = vmax.f32 %v724_v19, %v2851_v12  ;;  %2334 = vpow2.f32 %v751_v55  ;;  %v677_v60 = vperm.slane %v420_v13, 6  ;;  %v697_v6 = vperm.slane %v420_v13, 7 }
  0xe1   :  { %v2912_v54 = vadd.f32 %v661_v44, %v2758_v62  ;;  %2336 = vpow2.f32 %v763_v59  ;;  %v709_v21 = vmax.f32 %v2886_v22, %v2889_v25  ;;  %v558_v2 = vperm.slane %v2868_v46, 0 }
  0xe2   :  { %v732_v1 = vmax.f32 %v728_v53, %v2875_v23  ;;  %2338 = vpow2.f32 %v775_v42  ;;  %v681_v3 = vmul.f32 %v677_v60, %v2683_v4  ;;  %v701_v31 = vmul.f32 %v697_v6, %v2683_v4  ;;  %v2970_v6 = vpop.f32.mrf.mxu2 }
  0xe3   :  { %v578_v11 = vperm.slane %v2868_v46, 1  ;;  %2340 = vpow2.f32 %v787_v20  ;;  %v713_v52 = vmax.f32 %v709_v21, %v2892_v26  ;;  %v618_v44 = vperm.slane %v2868_v46, 3 }
  0xe4   :  { %v736_v62 = vsub.f32 %v2833_v35, %v732_v1  ;;  %v748_v13 = vsub.f32 %v2836_v36, %v732_v1  ;;  %v760_v61 = vsub.f32 %v2839_v37, %v732_v1  ;;  %2342 = vpow2.f32 %v799_v43 }
  0xe5   :  { %v772_v14 = vsub.f32 %v2842_v39, %v732_v1  ;;  %v784_v15 = vsub.f32 %v2845_v40, %v732_v1  ;;  %v796_v16 = vsub.f32 %v2848_v41, %v732_v1  ;;  %v2929_v47 = vpop.eup %2332  ;;  %2344 = vpow2.f32 %v811_v45 }
  0xe6   :  { %v741_v4 = vmul.f32 1.442695, %v736_v62  ;;  %v753_v24 = vmul.f32 1.442695, %v748_v13  ;;  %v765_v27 = vmul.f32 1.442695, %v760_v61  ;;  %v2931_v35 = vpop.eup %2334  ;;  %2346 = vpow2.f32 %v823_v58  ;;  %v2986_v61 = vpop.f32.mrf.mxu0 }
  0xe7   :  { %v777_v36 = vmul.f32 1.442695, %v772_v14  ;;  %v789_v37 = vmul.f32 1.442695, %v784_v15  ;;  %v801_v49 = vmul.f32 1.442695, %v796_v16  ;;  %v2933_v28 = vpop.eup %2336  ;;  %v831_v39 = vadd.f32 %v2931_v35, %v2929_v47 }
  0xe8   :  { %2348 = vpow2.f32 %v741_v4  ;;  %v808_v40 = vsub.f32 %v2851_v12, %v732_v1  ;;  %v820_v41 = vsub.f32 %v2875_v23, %v732_v1  ;;  %v2939_v50 = vpop.eup %2338  ;;  %v2942_v18 = vadd.f32 %v681_v3, %v2761_v63  ;;  %v2972_v1 = vpop.f32.mrf.mxu3 }
  0xe9   :  { %2350 = vpow2.f32 %v753_v24  ;;  %v2945_v51 = vadd.f32 %v701_v31, %v2764_v0  ;;  %v2948_v48 = vpop.eup %2340  ;;  %v835_v55 = vadd.f32 %v2933_v28, %v831_v39  ;;  %v717_v23 = vmax.f32 %v713_v52, %v2895_v30 }
  0xea   :  { %2352 = vpow2.f32 %v765_v27  ;;  %v813_v59 = vmul.f32 1.442695, %v808_v40  ;;  %v825_v12 = vmul.f32 1.442695, %v820_v41  ;;  %v2951_v19 = vpop.eup %2342  ;;  %v562_v63 = vmul.f32 %v558_v2, %v2685_v5 }
  0xeb   :  { %2354 = vpow2.f32 %v777_v36  ;;  %v582_v42 = vmul.f32 %v578_v11, %v2685_v5  ;;  %v2956_v0 = vpop.eup %2344  ;;  %v839_v20 = vadd.f32 %v2939_v50, %v835_v55  ;;  %v598_v43 = vperm.slane %v2868_v46, 2  ;;  %v2979_v11 = vpop.f32.mrf.mxu1 }
  0xec   :  { %2356 = vpow2.f32 %v789_v37  ;;  %v2961_v45 = vpop.eup %2346  ;;  %v721_v58 = vmax.f32 %v717_v23, %v2898_v38  ;;  %v2965_v53 = vadd.f32 %v562_v63, %v2771_v8  ;;  %v622_v31 = vmul.f32 %v618_v44, %v2685_v5 }
  0xed   :  { %2358 = vpow2.f32 %v801_v49  ;;  %v2968_v60 = vadd.f32 %v582_v42, %v2774_v9  ;;  %v843_v2 = vadd.f32 %v2948_v48, %v839_v20  ;;  %v602_v3 = vmul.f32 %v598_v43, %v2685_v5  ;;  %v3022_v42 = vpop.permute.xlu2 %161 }
  0xee   :  { %v2974_v21 = vpop.eup %2348  ;;  %2360 = vpow2.f32 %v813_v59  ;;  %v725_v9 = vmax.f32 %v721_v58, %v2912_v54  ;;  %v638_v62 = vperm.slane %v2868_v46, 4  ;;  %v658_v13 = vperm.slane %v2868_v46, 5 }
  0xef   :  { %v2981_v8 = vpop.eup %2350  ;;  %2362 = vpow2.f32 %v825_v12  ;;  %v847_v15 = vadd.f32 %v2951_v19, %v843_v2  ;;  %v2994_v4 = vadd.f32 %v602_v3, %v2777_v10  ;;  %v2997_v24 = vadd.f32 %v622_v31, %v2780_v56 }
  0xf0   :  { %v2988_v14 = vpop.eup %2352  ;;  %v832_v16 = vadd.f32 %v2981_v8, %v2974_v21  ;;  %v729_v36 = vmax.f32 %v725_v9, %v2942_v18  ;;  %v642_v37 = vmul.f32 %v638_v62, %v2685_v5  ;;  %v662_v49 = vmul.f32 %v658_v13, %v2685_v5 }
  0xf1   :  { %v2999_v27 = vpop.eup %2354  ;;  %v678_v39 = vperm.slane %v2868_v46, 6  ;;  %v851_v41 = vadd.f32 %v2956_v0, %v847_v15  ;;  %v698_v52 = vperm.slane %v2868_v46, 7  ;;  %v710_v56 = vmax.f32 %v2965_v53, %v2968_v60 }
  0xf2   :  { %v3005_v40 = vpop.eup %2356  ;;  %v836_v10 = vadd.f32 %v2988_v14, %v832_v16  ;;  %v733_v59 = vmax.f32 %v729_v36, %v2945_v51  ;;  %v3016_v12 = vadd.f32 %v642_v37, %v2859_v29  ;;  %v3019_v23 = vadd.f32 %v662_v49, %v2862_v32  ;;  %v425_v37 = vpop.f32.mrf.mxu2 }
  0xf3   :  { %v3012_v55 = vpop.eup %2358  ;;  %v682_v63 = vmul.f32 %v678_v39, %v2685_v5  ;;  %v855_v46 = vadd.f32 %v2961_v45, %v851_v41  ;;  %v702_v44 = vmul.f32 %v698_v52, %v2685_v5  ;;  %v714_v58 = vmax.f32 %v710_v56, %v2994_v4  ;;  %v348_v49 = vpop.f32.mrf.mxu1 }
  0xf4   :  { %v3024_v20 = vpop.eup %2360  ;;  %v840_v43 = vadd.f32 %v2999_v27, %v836_v10  ;;  %v737_v29 = vsub.f32 %v2886_v22, %v733_v59  ;;  %v749_v32 = vsub.f32 %v2889_v25, %v733_v59  ;;  %v761_v3 = vsub.f32 %v2892_v26, %v733_v59  ;;  %v502_v22 = vpop.f32.mrf.mxu3 }
  0xf5   :  { %v3030_v2 = vpop.eup %2362  ;;  %v773_v31 = vsub.f32 %v2895_v30, %v733_v59  ;;  %2364 = vrcp.f32 %v855_v46  ;;  %v785_v62 = vsub.f32 %v2898_v38, %v733_v59  ;;  %v797_v13 = vsub.f32 %v2912_v54, %v733_v59  ;;  %v274_v39 = vpop.f32.mrf.mxu0 }
  0xf6   :  { %v844_v9 = vadd.f32 %v3005_v40, %v840_v43  ;;  %v743_v5 = vmul.f32 1.442695, %v737_v29  ;;  %v755_v15 = vmul.f32 1.442695, %v749_v32  ;;  %v767_v16 = vmul.f32 1.442695, %v761_v3  ;;  %v167_v43 = vpop.permute.xlu2 %166 }
  0xf7   :  { %v809_v36 = vsub.f32 %v2942_v18, %v733_v59  ;;  %v694_v25 = vmul.f32 %v690_v7, %v2677_v57  ;;  %v779_v30 = vmul.f32 1.442695, %v773_v31  ;;  %v821_v38 = vsub.f32 %v2945_v51, %v733_v59  ;;  %v172_v31 = vpop.permute.xlu0 %171 }
  0xf8   :  { %v848_v26 = vadd.f32 %v3012_v55, %v844_v9  ;;  %2366 = vpow2.f32 %v743_v5  ;;  %v3046_v54 = vadd.f32 %v682_v63, %v2865_v33  ;;  %v718_v10 = vmax.f32 %v714_v58, %v2997_v24 }
  0xf9   :  { %2368 = vpow2.f32 %v755_v15  ;;  %v3049_v18 = vadd.f32 %v702_v44, %v694_v25  ;;  %v791_v57 = vmul.f32 1.442695, %v785_v62  ;;  %v803_v34 = vmul.f32 1.442695, %v797_v13 }
  0xfa   :  { %v852_v41 = vadd.f32 %v3024_v20, %v848_v26  ;;  %2370 = vpow2.f32 %v767_v16  ;;  %v815_v56 = vmul.f32 1.442695, %v809_v36  ;;  %v722_v51 = vmax.f32 %v718_v10, %v3016_v12 }
  0xfb   :  { %v2365_v7 = vpop.eup %2364  ;;  %2372 = vpow2.f32 %v779_v30  ;;  %v3083_v32 = vadd.f32 %v2927_v17, %v3022_v42  ;;  %v3095_v3 = vadd.f32 %v502_v22, %v167_v43  ;;  %v3104_v13 = vadd.f32 %v2970_v6, %v3022_v42  ;;  %v3121_v30 = vpop.permute.xlu1 %176 }
  0xfc   :  { %v856_v52 = vadd.f32 %v3030_v2, %v852_v41  ;;  %v3055_v33 = vmul.f32 %v2365_v7, %v2929_v47  ;;  %v3058_v59 = vmul.f32 %v2365_v7, %v2931_v35  ;;  %v3061_v63 = vmul.f32 %v2365_v7, %v2933_v28  ;;  %v505_v5 = vpop.f32.mrf.mxu3 }
  0xfd   :  { %v3064_v46 = vmul.f32 %v2365_v7, %v2939_v50  ;;  %v3067_v44 = vmul.f32 %v2365_v7, %v2948_v48  ;;  %v3070_v58 = vmul.f32 %v2365_v7, %v2951_v19  ;;  %v3073_v29 = vmul.f32 %v2365_v7, %v2956_v0 }
  0xfe   :  { %6067 = vst [vmem:[#allocation9_spill] sm:$0xff] %v3061_v63  ;;  %v3076_v47 = vmul.f32 %v2365_v7, %v2961_v45  ;;  %v3078_v35 = vpop.eup %2366  ;;  %2374 = vrcp.f32 %v856_v52  ;;  %v827_v28 = vmul.f32 1.442695, %v821_v38  ;;  %v726_v50 = vmax.f32 %v722_v51, %v3019_v23 }
  0xff   :  { %6068 = vst [vmem:[#allocation10_spill] sm:$0xff] %v3064_v46  ;;  %v3085_v48 = vpop.eup %2368  ;;  %v3089_v19 = vadd.f32 %v2979_v11, %v3022_v42  ;;  %v3091_v0 = vadd.f32 %v348_v49, %v167_v43  ;;  %v3093_v45 = vadd.f32 %v425_v37, %v167_v43  ;;  %2376 = vpow2.f32 %v791_v57  ;;  %v428_v11 = vpop.f32.mrf.mxu2 }
 0x100   :  { %6069 = vst [vmem:[#allocation11_spill] sm:$0xff] %v3067_v44  ;;  %v3097_v9 = vpop.eup %2370  ;;  %v833_v17 = vadd.f32 %v3085_v48, %v3078_v35  ;;  %v730_v62 = vmax.f32 %v726_v50, %v3046_v54  ;;  %2378 = vpow2.f32 %v803_v34  ;;  %v3110_v16 = vadd.f32 %v2972_v1, %v3022_v42  ;;  %v351_v37 = vpop.f32.mrf.mxu1 }
 0x101   :  { %6070 = vst [vmem:[#allocation12_spill] sm:$0xff] %v3070_v58  ;;  %v3106_v15 = vpop.eup %2372  ;;  %v3113_v36 = vadd.f32 %v2986_v61, %v167_v43  ;;  %v3115_v22 = vadd.f32 %v274_v39, %v172_v31  ;;  %2380 = vpow2.f32 %v815_v56  ;;  %v3119_v26 = vadd.f32 %v351_v37, %v172_v31  ;;  %v277_v49 = vpop.f32.mrf.mxu0 }
 0x102   :  { %6071 = vst [vmem:[#allocation13_spill] sm:$0xff] %v3073_v29  ;;  %v837_v25 = vadd.f32 %v3097_v9, %v833_v17  ;;  %v734_v6 = vmax.f32 %v730_v62, %v3049_v18  ;;  %2382 = vpow2.f32 %v827_v28  ;;  %v3123_v38 = vadd.f32 %v428_v11, %v172_v31 }
 0x103   :  { %6072 = vst [vmem:[#allocation14_spill] sm:$0xff] %v3076_v47  ;;  %v3125_v1 = vadd.f32 %v505_v5, %v172_v31  ;;  %v3128_v61 = vadd.f32 %v277_v49, %v3121_v30  ;;  %v895_v11 = vperm.slane %v3055_v33, 0 }
 0x104   :  { %v2375_v42 = vpop.eup %2374  ;;  %v841_v39 = vadd.f32 %v3106_v15, %v837_v25  ;;  %v738_v41 = vsub.f32 %v2965_v53, %v734_v6  ;;  %v750_v10 = vsub.f32 %v2968_v60, %v734_v6  ;;  %v762_v57 = vsub.f32 %v2994_v4, %v734_v6 }
 0x105   :  { %v3135_v34 = vmul.f32 %v2375_v42, %v2974_v21  ;;  %v3138_v7 = vmul.f32 %v2375_v42, %v2981_v8  ;;  %v3141_v52 = vmul.f32 %v2375_v42, %v2988_v14  ;;  %v3144_v56 = vmul.f32 %v2375_v42, %v2999_v27  ;;  %v3146_v51 = vpop.eup %2376 }
 0x106   :  { %v3149_v53 = vmul.f32 %v2375_v42, %v3005_v40  ;;  %v3152_v60 = vmul.f32 %v2375_v42, %v3012_v55  ;;  %v3155_v21 = vmul.f32 %v2375_v42, %v3024_v20  ;;  %v3158_v8 = vmul.f32 %v2375_v42, %v3030_v2  ;;  %v3160_v4 = vpop.eup %2378 }
 0x107   :  { %6073 = vst [vmem:[#allocation15_spill] sm:$0xff] %v3141_v52  ;;  %v845_v14 = vadd.f32 %v3146_v51, %v841_v39  ;;  %v745_v27 = vmul.f32 1.442695, %v738_v41  ;;  %v757_v43 = vmul.f32 1.442695, %v750_v10  ;;  %v3163_v50 = vpop.eup %2380  ;;  %v774_v40 = vsub.f32 %v2997_v24, %v734_v6 }
 0x108   :  { %6074 = vst [vmem:[#allocation16_spill] sm:$0xff] %v3144_v56  ;;  %v769_v28 = vmul.f32 1.442695, %v762_v57  ;;  %v786_v55 = vsub.f32 %v3016_v12, %v734_v6  ;;  %v798_v31 = vsub.f32 %v3019_v23, %v734_v6  ;;  %v810_v20 = vsub.f32 %v3046_v54, %v734_v6  ;;  %v3169_v17 = vpop.eup %2382 }
 0x109   :  { %6075 = vst [vmem:[#allocation17_spill] sm:$0xff] %v3149_v53  ;;  %v849_v2 = vadd.f32 %v3160_v4, %v845_v14  ;;  %2384 = vpow2.f32 %v745_v27  ;;  %v822_v62 = vsub.f32 %v3049_v18, %v734_v6  ;;  %v781_v5 = vmul.f32 1.442695, %v774_v40 }
 0x10a   :  { %6076 = vst [vmem:[#allocation18_spill] sm:$0xff] %v3152_v60  ;;  %2386 = vpow2.f32 %v757_v43  ;;  %v793_v37 = vmul.f32 1.442695, %v786_v55  ;;  %v805_v25 = vmul.f32 1.442695, %v798_v31  ;;  %v5879_v54 = vperm.slane %v3135_v34, 0 }
 0x10b   :  { %6077 = vst [vmem:[#allocation19_spill] sm:$0xff] %v3155_v21  ;;  %v853_v24 = vadd.f32 %v3163_v50, %v849_v2  ;;  %2388 = vpow2.f32 %v769_v28  ;;  %v817_v12 = vmul.f32 1.442695, %v810_v20  ;;  %v829_v23 = vmul.f32 1.442695, %v822_v62 }
 0x10c   :  { %6078 = vst [vmem:[#allocation20_spill] sm:$0xff] %v3158_v8  ;;  %2390 = vpow2.f32 %v781_v5  ;;  %v3177_v49 = vmul.f32 %v895_v11, %v3083_v32  ;;  %v5884_v42 = vperm.slane %v3055_v33, 1  ;;  %v5878_v6 = vperm.slane %v3135_v34, 1 }
 0x10d   :  { %v857_v18 = vadd.f32 %v3169_v17, %v853_v24  ;;  %2392 = vpow2.f32 %v793_v37  ;;  %v5882_v39 = vperm.slane %v3055_v33, 2  ;;  %v3186_v41 = vmul.f32 %v5879_v54, %v3089_v19 }
 0x10e   :  { %6079 = vst [vmem:[#allocation21_spill] sm:$0xff] %v3177_v49  ;;  %2394 = vpow2.f32 %v805_v25  ;;  %v3191_v10 = vmul.f32 %v5884_v42, %v3083_v32  ;;  %v5877_v57 = vperm.slane %v3135_v34, 2  ;;  %v3199_v27 = vmul.f32 %v5878_v6, %v3089_v19 }
 0x10f   :  { %6080 = vst [vmem:[#allocation22_spill] sm:$0xff] %v3186_v41  ;;  %v3194_v14 = vpop.eup %2384  ;;  %2396 = vrcp.f32 %v857_v18  ;;  %v3204_v43 = vmul.f32 %v5882_v39, %v3083_v32  ;;  %v5881_v28 = vperm.slane %v3055_v33, 3  ;;  %v5880_v31 = vperm.slane %v3135_v34, 3 }
 0x110   :  { %6081 = vst [vmem:[#allocation23_spill] sm:$0xff] %v3191_v10  ;;  %v3207_v40 = vpop.eup %2386  ;;  %2398 = vpow2.f32 %v817_v12  ;;  %v3212_v55 = vmul.f32 %v5877_v57, %v3089_v19  ;;  %v5883_v20 = vperm.slane %v3055_v33, 4  ;;  %v5885_v37 = vperm.slane %v3135_v34, 4 }
 0x111   :  { %6082 = vst [vmem:[#allocation24_spill] sm:$0xff] %v3199_v27  ;;  %v3216_v2 = vpop.eup %2388  ;;  %2400 = vpow2.f32 %v829_v23  ;;  %v834_v62 = vadd.f32 %v3207_v40, %v3194_v14  ;;  %v3223_v5 = vmul.f32 %v5881_v28, %v3083_v32  ;;  %v3231_v24 = vmul.f32 %v5880_v31, %v3089_v19 }
 0x112   :  { %6083 = vst [vmem:[#allocation25_spill] sm:$0xff] %v3204_v43  ;;  %v3226_v25 = vpop.eup %2390  ;;  %v3236_v12 = vmul.f32 %v5883_v20, %v3083_v32  ;;  %v5888_v23 = vperm.slane %v3055_v33, 5  ;;  %v5890_v18 = vperm.slane %v3135_v34, 5  ;;  %v3246_v54 = vmul.f32 %v5885_v37, %v3089_v19 }
 0x113   :  { %6084 = vst [vmem:[#allocation26_spill] sm:$0xff] %v3212_v55  ;;  %v3240_v57 = vpop.eup %2392  ;;  %v838_v6 = vadd.f32 %v3216_v2, %v834_v62  ;;  %v6091_v28 = vperm.slane %v3055_v33, 6 }
 0x114   :  { %6085 = vst [vmem:[#allocation27_spill] sm:$0xff] %v3223_v5  ;;  %v3250_v39 = vpop.eup %2394  ;;  %v3255_v20 = vmul.f32 %v5888_v23, %v3083_v32  ;;  %v3260_v62 = vmul.f32 %v5890_v18, %v3089_v19  ;;  %v6093_v23 = vperm.slane %v3135_v34, 6  ;;  %v3276_v18 = vmul.f32 %v895_v11, %v3113_v36 }
 0x115   :  { %6086 = vst [vmem:[#allocation28_spill] sm:$0xff] %v3231_v24  ;;  %v2397_v8 = vpop.eup %2396  ;;  %v842_v31 = vadd.f32 %v3226_v25, %v838_v6  ;;  %v3268_v47 = vmul.f32 %v6091_v28, %v3083_v32 }
 0x116   :  { %6087 = vst [vmem:[#allocation29_spill] sm:$0xff] %v3236_v12  ;;  %v3273_v21 = vmul.f32 %v6093_v23, %v3089_v19  ;;  %v3278_v29 = vpop.eup %2398  ;;  %v865_v37 = vmul.f32 %v2397_v8, %v3078_v35  ;;  %v3282_v42 = vmul.f32 %v2397_v8, %v3085_v48  ;;  %v3285_v6 = vmul.f32 %v2397_v8, %v3097_v9 }
 0x117   :  { %6088 = vst [vmem:[#allocation30_spill] sm:$0xff] %v3246_v54  ;;  %v3288_v28 = vmul.f32 %v2397_v8, %v3106_v15  ;;  %v3290_v60 = vpop.eup %2400  ;;  %v3293_v23 = vmul.f32 %v2397_v8, %v3146_v51  ;;  %v3296_v11 = vmul.f32 %v2397_v8, %v3160_v4  ;;  %v3299_v58 = vmul.f32 %v2397_v8, %v3163_v50 }
 0x118   :  { %6089 = vst [vmem:[#allocation31_spill] sm:$0xff] %v3255_v20  ;;  %v3302_v35 = vmul.f32 %v2397_v8, %v3169_v17  ;;  %v846_v48 = vadd.f32 %v3240_v57, %v842_v31  ;;  %v6100_v9 = vperm.slane %v3055_v33, 7  ;;  %v6102_v51 = vperm.slane %v3135_v34, 7 }
 0x119   :  { %6090 = vst [vmem:[#allocation32_spill] sm:$0xff] %v3260_v62  ;;  %v897_v4 = vperm.slane %v865_v37, 0  ;;  %v1201_v53 = vperm.slane %v865_v37, 2  ;;  %v1353_v50 = vperm.slane %v865_v37, 3  ;;  %v1657_v31 = vperm.slane %v865_v37, 5 }
 0x11a   :  { %6092 = vst [vmem:[#allocation33_spill] sm:$0xff] %v3268_v47  ;;  %v3308_v15 = vmul.f32 %v6100_v9, %v3083_v32  ;;  %v850_v8 = vadd.f32 %v3250_v39, %v846_v48  ;;  %v6104_v56 = vperm.slane %v3282_v42, 4  ;;  %v5906_v41 = vperm.slane %v3282_v42, 7 }
 0x11b   :  { %6094 = vst [vmem:[#allocation34_spill] sm:$0xff] %v3273_v21  ;;  %v901_v17 = vmul.f32 %v897_v4, %v3104_v13  ;;  %v1205_v32 = vmul.f32 %v1201_v53, %v3104_v13  ;;  %v1357_v9 = vmul.f32 %v1353_v50, %v3104_v13  ;;  %v1961_v21 = vperm.slane %v865_v37, 7 }
 0x11c   :  { %6095 = vst [vmem:[#allocation35_spill] sm:$0xff] %v3288_v28  ;;  %v1661_v28 = vmul.f32 %v1657_v31, %v3104_v13  ;;  %v3325_v48 = vmul.f32 %v897_v4, %v3093_v45  ;;  %v3331_v54 = vmul.f32 %v1201_v53, %v3093_v45  ;;  %v3334_v24 = vmul.f32 %v1353_v50, %v3093_v45 }
 0x11d   :  { %6096 = vst [vmem:[#allocation36_spill] sm:$0xff] %v3293_v23  ;;  %v3313_v23 = vmul.f32 %v6102_v51, %v3089_v19  ;;  %v854_v51 = vadd.f32 %v3278_v29, %v850_v8  ;;  %v1965_v8 = vmul.f32 %v1961_v21, %v3104_v13  ;;  %v5902_v53 = vperm.slane %v3282_v42, 0 }
 0x11e   :  { %6097 = vst [vmem:[#allocation37_spill] sm:$0xff] %v3296_v11  ;;  %v1049_v11 = vperm.slane %v865_v37, 1  ;;  %v5903_v50 = vperm.slane %v3282_v42, 1 }
 0x11f   :  { %6098 = vst [vmem:[#allocation38_spill] sm:$0xff] %v3299_v58  ;;  %v1505_v58 = vperm.slane %v865_v37, 4  ;;  %v858_v55 = vadd.f32 %v3290_v60, %v854_v51  ;;  %v5904_v51 = vperm.slane %v3282_v42, 2 }
 0x120   :  { %6099 = vst [vmem:[#allocation39_spill] sm:$0xff] %v3302_v35  ;;  %v1809_v35 = vperm.slane %v865_v37, 6  ;;  %v1053_v44 = vmul.f32 %v1049_v11, %v3104_v13  ;;  %v3328_v62 = vmul.f32 %v1049_v11, %v3093_v45  ;;  %v3342_v37 = vmul.f32 %v1657_v31, %v3093_v45 }
 0x121   :  { %6101 = vst [vmem:[#allocation40_spill] sm:$0xff] %v3308_v15  ;;  %v1509_v19 = vmul.f32 %v1505_v58, %v3104_v13  ;;  %v3339_v27 = vmul.f32 %v1505_v58, %v3093_v45  ;;  %v3348_v11 = vmul.f32 %v1961_v21, %v3093_v45  ;;  %2402 = vrcp.f32 %v858_v55 }
 0x122   :  { %6103 = vst [vmem:[#allocation41_spill] sm:$0xff] %v3313_v23  ;;  %v1813_v23 = vmul.f32 %v1809_v35, %v3104_v13  ;;  %v3345_v4 = vmul.f32 %v1809_v35, %v3093_v45  ;;  %v5905_v13 = vperm.slane %v3282_v42, 3  ;;  %v913_v31 = vmul.f32 %v5902_v53, %v3123_v38 }
 0x123   :  { %v1065_v45 = vmul.f32 %v5903_v50, %v3123_v38  ;;  %v5907_v21 = vperm.slane %v3282_v42, 5  ;;  %v1217_v55 = vmul.f32 %v5904_v51, %v3123_v38  ;;  %v1521_v53 = vmul.f32 %v6104_v56, %v3123_v38 }
 0x124   :  { %v1369_v58 = vmul.f32 %v5905_v13, %v3123_v38  ;;  %v3373_v15 = vadd.f32 %v913_v31, %v901_v17  ;;  %v6105_v51 = vperm.slane %v3282_v42, 6  ;;  %v1977_v56 = vmul.f32 %v5906_v41, %v3123_v38 }
 0x125   :  { %v3375_v50 = vadd.f32 %v1065_v45, %v1053_v44  ;;  %v1673_v35 = vmul.f32 %v5907_v21, %v3123_v38  ;;  %v3383_v20 = vadd.f32 %v1217_v55, %v1205_v32  ;;  %v3387_v12 = vadd.f32 %v1521_v53, %v1509_v19 }
 0x126   :  { %v1825_v47 = vmul.f32 %v6105_v51, %v3123_v38  ;;  %v3385_v13 = vadd.f32 %v1369_v58, %v1357_v9  ;;  %v6110_v45 = vperm.slane %v3055_v33, 1  ;;  %v3402_v9 = vadd.f32 %v1977_v56, %v1965_v8 }
 0x127   :  { %6107 = vst [vmem:[#allocation43_spill] sm:$0xff] %v3387_v12  ;;  %v3392_v44 = vadd.f32 %v1673_v35, %v1661_v28  ;;  %v2403_v32 = vpop.eup %2402  ;;  %v1059_v19 = vperm.slane %v3058_v59, 1  ;;  %v6112_v53 = vperm.slane %v3055_v33, 2 }
 0x128   :  { %6106 = vst [vmem:[#allocation42_spill] sm:$0xff] %v3385_v13  ;;  %v3394_v17 = vadd.f32 %v1825_v47, %v1813_v23  ;;  %v3400_v51 = vmul.f32 %v6110_v45, %v3113_v36  ;;  %v1211_v47 = vperm.slane %v3058_v59, 2  ;;  %v866_v28 = vmul.f32 %v2403_v32, %v3194_v14 }
 0x129   :  { %6108 = vst [vmem:[#allocation44_spill] sm:$0xff] %v3392_v44  ;;  %v3408_v38 = vmul.f32 %v6112_v53, %v3113_v36  ;;  %v3413_v23 = vmul.f32 %v2403_v32, %v3207_v40  ;;  %v3416_v58 = vmul.f32 %v2403_v32, %v3216_v2  ;;  %v3419_v8 = vmul.f32 %v2403_v32, %v3226_v25 }
 0x12a   :  { %6109 = vst [vmem:[#allocation45_spill] sm:$0xff] %v3394_v17  ;;  %v3422_v35 = vmul.f32 %v2403_v32, %v3240_v57  ;;  %v3425_v55 = vmul.f32 %v2403_v32, %v3250_v39  ;;  %v3428_v56 = vmul.f32 %v2403_v32, %v3278_v29  ;;  %v3431_v14 = vmul.f32 %v2403_v32, %v3290_v60 }
 0x12b   :  { %6111 = vst [vmem:[#allocation46_spill] sm:$0xff] %v3402_v9  ;;  %v898_v40 = vperm.slane %v866_v28, 0  ;;  %v1050_v45 = vperm.slane %v866_v28, 1  ;;  %v1202_v53 = vperm.slane %v866_v28, 2  ;;  %v1354_v2 = vperm.slane %v866_v28, 3 }
 0x12c   :  { %6113 = vst [vmem:[#allocation47_spill] sm:$0xff] %v3416_v58  ;;  %v1506_v41 = vperm.slane %v866_v28, 4  ;;  %v1658_v21 = vperm.slane %v866_v28, 5  ;;  %v1810_v25 = vperm.slane %v866_v28, 6  ;;  %v1962_v31 = vperm.slane %v866_v28, 7 }
 0x12d   :  { %6114 = vst [vmem:[#allocation48_spill] sm:$0xff] %v3419_v8  ;;  %v902_v57 = vmul.f32 %v898_v40, %v3110_v16  ;;  %v1206_v39 = vmul.f32 %v1202_v53, %v3110_v16  ;;  %v1358_v29 = vmul.f32 %v1354_v2, %v3110_v16  ;;  %v3445_v28 = vmul.f32 %v1050_v45, %v3095_v3 }
 0x12e   :  { %6115 = vst [vmem:[#allocation49_spill] sm:$0xff] %v3422_v35  ;;  %v1054_v35 = vmul.f32 %v1050_v45, %v3110_v16  ;;  %v1662_v60 = vmul.f32 %v1658_v21, %v3110_v16  ;;  %v1814_v32 = vmul.f32 %v1810_v25, %v3110_v16  ;;  %v3448_v8 = vmul.f32 %v1202_v53, %v3095_v3 }
 0x12f   :  { %6116 = vst [vmem:[#allocation50_spill] sm:$0xff] %v3425_v55  ;;  %v3442_v55 = vmul.f32 %v898_v40, %v3095_v3  ;;  %v3451_v5 = vmul.f32 %v1354_v2, %v3095_v3  ;;  %v3454_v43 = vmul.f32 %v1506_v41, %v3095_v3  ;;  %v3457_v10 = vmul.f32 %v1658_v21, %v3095_v3 }
 0x130   :  { %6117 = vst [vmem:[#allocation51_spill] sm:$0xff] %v3428_v56  ;;  %v1510_v56 = vmul.f32 %v1506_v41, %v3110_v16  ;;  %v3463_v40 = vmul.f32 %v1962_v31, %v3095_v3  ;;  %v5915_v45 = vperm.slane %v3413_v23, 0  ;;  %v5917_v53 = vperm.slane %v3413_v23, 1 }
 0x131   :  { %6118 = vst [vmem:[#allocation52_spill] sm:$0xff] %v3431_v14  ;;  %v1966_v14 = vmul.f32 %v1962_v31, %v3110_v16  ;;  %v3460_v16 = vmul.f32 %v1810_v25, %v3095_v3  ;;  %v5919_v46 = vperm.slane %v3413_v23, 2  ;;  %v6119_v41 = vperm.slane %v3413_v23, 3 }
 0x132   :  { %v914_v3 = vmul.f32 %v5915_v45, %v3125_v1  ;;  %v1066_v31 = vmul.f32 %v5917_v53, %v3125_v1  ;;  %v6120_v21 = vperm.slane %v3413_v23, 4  ;;  %v6121_v52 = vperm.slane %v3413_v23, 5 }
 0x133   :  { %v1218_v2 = vmul.f32 %v5919_v46, %v3125_v1  ;;  %v1370_v49 = vmul.f32 %v6119_v41, %v3125_v1  ;;  %v6122_v63 = vperm.slane %v3413_v23, 6  ;;  %v6123_v58 = vperm.slane %v3413_v23, 7 }
 0x134   :  { %v1522_v25 = vmul.f32 %v6120_v21, %v3125_v1  ;;  %v1674_v45 = vmul.f32 %v6121_v52, %v3125_v1  ;;  %v3497_v9 = vadd.f32 %v914_v3, %v902_v57  ;;  %v3499_v17 = vadd.f32 %v1066_v31, %v1054_v35 }
 0x135   :  { %v1826_v53 = vmul.f32 %v6122_v63, %v3125_v1  ;;  %v1978_v46 = vmul.f32 %v6123_v58, %v3125_v1  ;;  %v3501_v41 = vadd.f32 %v1218_v2, %v1206_v39  ;;  %v3503_v44 = vadd.f32 %v1370_v49, %v1358_v29 }
 0x136   :  { %v3505_v21 = vadd.f32 %v1522_v25, %v1510_v56  ;;  %v3507_v12 = vadd.f32 %v1674_v45, %v1662_v60  ;;  %v6124_v63 = vperm.slane %v3058_v59, 0  ;;  %v3522_v49 = vmul.f32 %v1059_v19, %v3115_v22 }
 0x137   :  { %v3509_v52 = vadd.f32 %v1826_v53, %v1814_v32  ;;  %v3511_v13 = vadd.f32 %v1978_v46, %v1966_v14  ;;  %v1067_v56 = vmul.f32 %v1059_v19, %v3128_v61  ;;  %v3526_v57 = vmul.f32 %v1211_v47, %v3115_v22 }
 0x138   :  { %v3516_v1 = vmul.f32 %v6124_v63, %v3115_v22  ;;  %v6126_v58 = vmov %v6124_v63  ;;  %6127 = vst [vmem:[#allocation54_spill] sm:$0xff] %v3522_v49  ;;  %v1219_v46 = vmul.f32 %v1211_v47, %v3128_v61  ;;  %v6129_v14 = vperm.slane %v3055_v33, 3 }
 0x139   :  { %v915_v35 = vmul.f32 %v6126_v58, %v3128_v61  ;;  %6128 = vst [vmem:[#allocation55_spill] sm:$0xff] %v3526_v57  ;;  %v1363_v29 = vperm.slane %v3058_v59, 3  ;;  %v3537_v32 = vadd.f32 %v1067_v56, %v3400_v51  ;;  %v6130_v19 = vperm.slane %v3055_v33, 4 }
 0x13a   :  { %6125 = vst [vmem:[#allocation53_spill] sm:$0xff] %v3516_v1  ;;  %v1359_v39 = vmul.f32 %v6129_v14, %v3113_v36  ;;  %v1515_v53 = vperm.slane %v3058_v59, 4  ;;  %v3544_v47 = vadd.f32 %v1219_v46, %v3408_v38  ;;  %v1667_v63 = vperm.slane %v3058_v59, 5 }
 0x13b   :  { %v3534_v60 = vadd.f32 %v915_v35, %v3276_v18  ;;  %v1511_v45 = vmul.f32 %v6130_v19, %v3113_v36  ;;  %v3547_v2 = vmul.f32 %v1363_v29, %v3115_v22  ;;  %v1371_v25 = vmul.f32 %v1363_v29, %v3128_v61  ;;  %v354_v19 = vpop.f32.mrf.mxu1 }
 0x13c   :  { %v6132_v18 = vperm.slane %v3055_v33, 5  ;;  %v3554_v51 = vmul.f32 %v1515_v53, %v3115_v22  ;;  %v1523_v31 = vmul.f32 %v1515_v53, %v3128_v61  ;;  %v6134_v38 = vperm.slane %v3055_v33, 6 }
 0x13d   :  { %6131 = vst [vmem:[#allocation56_spill] sm:$0xff] %v3547_v2  ;;  %v3561_v35 = vadd.f32 %v1371_v25, %v1359_v39  ;;  %v1819_v56 = vperm.slane %v3058_v59, 6  ;;  %v6135_v46 = vperm.slane %v3055_v33, 7  ;;  %v1971_v29 = vperm.slane %v3058_v59, 7 }
 0x13e   :  { %v1663_v3 = vmul.f32 %v6132_v18, %v3113_v36  ;;  %6133 = vst [vmem:[#allocation57_spill] sm:$0xff] %v3554_v51  ;;  %v1815_v58 = vmul.f32 %v6134_v38, %v3113_v36  ;;  %v3568_v18 = vadd.f32 %v1523_v31, %v1511_v45  ;;  %v3571_v53 = vmul.f32 %v1667_v63, %v3115_v22 }
 0x13f   :  { %v1967_v14 = vmul.f32 %v6135_v46, %v3113_v36  ;;  %v1675_v51 = vmul.f32 %v1667_v63, %v3128_v61  ;;  %v355_v38 = vadd.f32 %v354_v19, %v3121_v30  ;;  %v3576_v39 = vmul.f32 %v1819_v56, %v3115_v22 }
 0x140   :  { %6136 = vst [vmem:[#allocation58_spill] sm:$0xff] %v3571_v53  ;;  %v1827_v25 = vmul.f32 %v1819_v56, %v3128_v61  ;;  %v3580_v33 = vmul.f32 %v1971_v29, %v3115_v22  ;;  %v1979_v59 = vmul.f32 %v1971_v29, %v3128_v61  ;;  %v6139_v45 = vperm.slane %v3135_v34, 0 }
 0x141   :  { %6137 = vst [vmem:[#allocation59_spill] sm:$0xff] %v3576_v39  ;;  %v3583_v36 = vadd.f32 %v1675_v51, %v1663_v3  ;;  %v908_v63 = vperm.slane %v3138_v7, 0  ;;  %v6140_v46 = vperm.slane %v3135_v34, 1  ;;  %v1060_v22 = vperm.slane %v3138_v7, 1 }
 0x142   :  { %6138 = vst [vmem:[#allocation60_spill] sm:$0xff] %v3580_v33  ;;  %v904_v31 = vmul.f32 %v6139_v45, %v3091_v0  ;;  %v3592_v39 = vadd.f32 %v1827_v25, %v1815_v58  ;;  %v3594_v56 = vadd.f32 %v1979_v59, %v1967_v14  ;;  %v6141_v61 = vperm.slane %v3135_v34, 2 }
 0x143   :  { %v1056_v19 = vmul.f32 %v6140_v46, %v3091_v0  ;;  %v3601_v51 = vmul.f32 %v908_v63, %v3119_v26  ;;  %v916_v29 = vmul.f32 %v908_v63, %v355_v38  ;;  %v1212_v45 = vperm.slane %v3138_v7, 2 }
 0x144   :  { %v1208_v3 = vmul.f32 %v6141_v61, %v3091_v0  ;;  %v6143_v33 = vperm.slane %v3135_v34, 3  ;;  %v3608_v58 = vmul.f32 %v1060_v22, %v3119_v26  ;;  %v1068_v14 = vmul.f32 %v1060_v22, %v355_v38 }
 0x145   :  { %6142 = vst [vmem:[#allocation61_spill] sm:$0xff] %v3601_v51  ;;  %v1364_v25 = vperm.slane %v3138_v7, 3  ;;  %v6145_v59 = vperm.slane %v3135_v34, 4  ;;  %v3614_v53 = vadd.f32 %v916_v29, %v904_v31  ;;  %v3617_v63 = vmul.f32 %v1212_v45, %v3119_v26 }
 0x146   :  { %v1360_v46 = vmul.f32 %v6143_v33, %v3091_v0  ;;  %6144 = vst [vmem:[#allocation62_spill] sm:$0xff] %v3608_v58  ;;  %v1220_v51 = vmul.f32 %v1212_v45, %v355_v38  ;;  %v1516_v2 = vperm.slane %v3138_v7, 4  ;;  %v3620_v57 = vadd.f32 %v1068_v14, %v1056_v19 }
 0x147   :  { %v1512_v61 = vmul.f32 %v6145_v59, %v3091_v0  ;;  %6146 = vst [vmem:[#allocation63_spill] sm:$0xff] %v3617_v63  ;;  %v3623_v33 = vmul.f32 %v1364_v25, %v3119_v26  ;;  %v1372_v22 = vmul.f32 %v1364_v25, %v355_v38  ;;  %v6149_v58 = vperm.slane %v3135_v34, 5  ;;  %v431_v59 = vpop.f32.mrf.mxu2  ;;  %v508_v63 = vpop.f32.mrf.mxu3 }
 0x148   :  { %6147 = vst [vmem:[#allocation64_spill] sm:$0xff] %v3620_v57  ;;  %v3628_v1 = vadd.f32 %v1220_v51, %v1208_v3  ;;  %v3631_v31 = vmul.f32 %v1516_v2, %v3119_v26  ;;  %v1524_v29 = vmul.f32 %v1516_v2, %v355_v38  ;;  %v1668_v45 = vperm.slane %v3138_v7, 5 }
 0x149   :  { %6148 = vst [vmem:[#allocation65_spill] sm:$0xff] %v3623_v33  ;;  %v1664_v49 = vmul.f32 %v6149_v58, %v3091_v0  ;;  %v3634_v19 = vadd.f32 %v1372_v22, %v1360_v46  ;;  %v6153_v14 = vperm.slane %v3135_v34, 6  ;;  %v1820_v33 = vperm.slane %v3138_v7, 6  ;;  %v3643_v58 = vpop.permute.xlu2 %181 }
 0x14a   :  { %6150 = vst [vmem:[#allocation66_spill] sm:$0xff] %v3628_v1  ;;  %v6154_v3 = vperm.slane %v3135_v34, 7  ;;  %v3648_v2 = vmul.f32 %v1668_v45, %v3119_v26  ;;  %v1676_v1 = vmul.f32 %v1668_v45, %v355_v38  ;;  %v1972_v46 = vperm.slane %v3138_v7, 7  ;;  %v280_v34 = vpop.f32.mrf.mxu0 }
 0x14b   :  { %6151 = vst [vmem:[#allocation67_spill] sm:$0xff] %v3631_v31  ;;  %v1816_v25 = vmul.f32 %v6153_v14, %v3091_v0  ;;  %v3645_v31 = vadd.f32 %v1524_v29, %v1512_v61  ;;  %v3652_v22 = vmul.f32 %v1820_v33, %v3119_v26  ;;  %v1828_v14 = vmul.f32 %v1820_v33, %v355_v38 }
 0x14c   :  { %6152 = vst [vmem:[#allocation68_spill] sm:$0xff] %v3634_v19  ;;  %v1968_v51 = vmul.f32 %v6154_v3, %v3091_v0  ;;  %v432_v19 = vadd.f32 %v431_v59, %v3121_v30  ;;  %v509_v57 = vadd.f32 %v508_v63, %v3121_v30  ;;  %v3656_v0 = vadd.f32 %v1676_v1, %v1664_v49 }
 0x14d   :  { %6155 = vst [vmem:[#allocation69_spill] sm:$0xff] %v3652_v22  ;;  %v3659_v61 = vmul.f32 %v1972_v46, %v3119_v26  ;;  %v1980_v29 = vmul.f32 %v1972_v46, %v355_v38  ;;  %v3662_v3 = vadd.f32 %v280_v34, %v3643_v58  ;;  %v3664_v45 = vadd.f32 %v1828_v14, %v1816_v25 }
 0x14e   :  { %v6157_v7 = vperm.slane %v3282_v42, 0  ;;  %v6158_v33 = vperm.slane %v3282_v42, 1  ;;  %v6159_v30 = vperm.slane %v3282_v42, 2  ;;  %v6160_v26 = vperm.slane %v3282_v42, 3 }
 0x14f   :  { %6156 = vst [vmem:[#allocation70_spill] sm:$0xff] %v3659_v61  ;;  %v3672_v1 = vadd.f32 %v1980_v29, %v1968_v51  ;;  %v6161_v38 = vperm.slane %v3282_v42, 4  ;;  %v6162_v25 = vperm.slane %v3282_v42, 5  ;;  %v6163_v51 = vperm.slane %v3282_v42, 6  ;;  %v6177_v61 = vld [vmem:[#allocation45_spill] sm:$0xff] }
 0x150   :  { %v917_v22 = vmul.f32 %v6157_v7, %v432_v19  ;;  %v1069_v59 = vmul.f32 %v6158_v33, %v432_v19  ;;  %v1221_v63 = vmul.f32 %v6159_v30, %v432_v19  ;;  %v1373_v49 = vmul.f32 %v6160_v26, %v432_v19 }
 0x151   :  { %v1525_v46 = vmul.f32 %v6161_v38, %v432_v19  ;;  %v1677_v14 = vmul.f32 %v6162_v25, %v432_v19  ;;  %v1829_v29 = vmul.f32 %v6163_v51, %v432_v19  ;;  %v434_v51 = vpop.f32.mrf.mxu2 }
 0x152   :  { %v3681_v34 = vadd.f32 %v917_v22, %v3325_v48  ;;  %v3684_v7 = vadd.f32 %v1069_v59, %v3328_v62  ;;  %v3687_v33 = vadd.f32 %v1221_v63, %v3331_v54  ;;  %v3692_v30 = vadd.f32 %v1373_v49, %v3334_v24 }
 0x153   :  { %v3695_v26 = vadd.f32 %v1525_v46, %v3339_v27  ;;  %v3698_v38 = vadd.f32 %v1677_v14, %v3342_v37  ;;  %v6164_v48 = vperm.slane %v3282_v42, 7  ;;  %v3703_v62 = vadd.f32 %v1829_v29, %v3345_v4 }
 0x154   :  { %v6165_v54 = vperm.slane %v3413_v23, 0  ;;  %v6166_v63 = vperm.slane %v3413_v23, 1  ;;  %v6167_v24 = vperm.slane %v3413_v23, 2  ;;  %v6168_v37 = vperm.slane %v3413_v23, 3 }
 0x155   :  { %v1981_v22 = vmul.f32 %v6164_v48, %v432_v19  ;;  %v6169_v42 = vperm.slane %v3413_v23, 4  ;;  %v6170_v4 = vperm.slane %v3413_v23, 5 }
 0x156   :  { %v918_v59 = vmul.f32 %v6165_v54, %v509_v57  ;;  %v1070_v25 = vmul.f32 %v6166_v63, %v509_v57  ;;  %v1222_v49 = vmul.f32 %v6167_v24, %v509_v57  ;;  %v1374_v46 = vmul.f32 %v6168_v37, %v509_v57 }
 0x157   :  { %v3712_v27 = vadd.f32 %v1981_v22, %v3348_v11  ;;  %v1526_v19 = vmul.f32 %v6169_v42, %v509_v57  ;;  %v1678_v14 = vmul.f32 %v6170_v4, %v509_v57  ;;  %v6171_v11 = vperm.slane %v3413_v23, 6 }
 0x158   :  { %v3721_v29 = vadd.f32 %v918_v59, %v3442_v55  ;;  %v3724_v48 = vadd.f32 %v1070_v25, %v3445_v28  ;;  %v3727_v54 = vadd.f32 %v1222_v49, %v3448_v8  ;;  %v3732_v63 = vadd.f32 %v1374_v46, %v3451_v5  ;;  %v357_v28 = vpop.f32.mrf.mxu1 }
 0x159   :  { %v1830_v22 = vmul.f32 %v6171_v11, %v509_v57  ;;  %v3735_v24 = vadd.f32 %v1526_v19, %v3454_v43  ;;  %v3738_v37 = vadd.f32 %v1678_v14, %v3457_v10  ;;  %v6172_v55 = vperm.slane %v3413_v23, 7  ;;  %v511_v11 = vpop.f32.mrf.mxu3 }
 0x15a   :  { %v3746_v8 = vadd.f32 %v357_v28, %v3643_v58  ;;  %v435_v49 = vadd.f32 %v434_v51, %v3643_v58  ;;  %v5923_v5 = vperm.slane %v3285_v6, 0  ;;  %v5922_v10 = vperm.slane %v3285_v6, 1 }
 0x15b   :  { %v1982_v59 = vmul.f32 %v6172_v55, %v509_v57  ;;  %v3743_v25 = vadd.f32 %v1830_v22, %v3460_v16  ;;  %v5920_v46 = vperm.slane %v3285_v6, 2  ;;  %v5921_v23 = vperm.slane %v3285_v6, 3 }
 0x15c   :  { %v933_v16 = vmul.f32 %v5923_v5, %v435_v49  ;;  %v5924_v57 = vperm.slane %v3285_v6, 4  ;;  %v5925_v42 = vperm.slane %v3285_v6, 5  ;;  %v5926_v19 = vperm.slane %v3285_v6, 6 }
 0x15d   :  { %v3751_v43 = vadd.f32 %v1982_v59, %v3463_v40  ;;  %v1085_v4 = vmul.f32 %v5922_v10, %v435_v49  ;;  %v1237_v40 = vmul.f32 %v5920_v46, %v435_v49  ;;  %v1389_v14 = vmul.f32 %v5921_v23, %v435_v49  ;;  %v6174_v10 = vld [vmem:[#allocation42_spill] sm:$0xff] }
 0x15e   :  { %v5927_v51 = vperm.slane %v3285_v6, 7  ;;  %v3769_v22 = vadd.f32 %v933_v16, %v3373_v15  ;;  %v1541_v55 = vmul.f32 %v5924_v57, %v435_v49  ;;  %v1693_v59 = vmul.f32 %v5925_v42, %v435_v49  ;;  %v6175_v16 = vld [vmem:[#allocation43_spill] sm:$0xff] }
 0x15f   :  { %v1845_v28 = vmul.f32 %v5926_v19, %v435_v49  ;;  %v3778_v46 = vadd.f32 %v1085_v4, %v3375_v50  ;;  %v3781_v23 = vadd.f32 %v1237_v40, %v3383_v20  ;;  %v3784_v5 = vadd.f32 %v1389_v14, %v6174_v10  ;;  %v6179_v4 = vld [vmem:[#allocation46_spill] sm:$0xff]  ;;  %v6181_v40 = vld [vmem:[#allocation47_spill] sm:$0xff] }
 0x160   :  { %6173 = vst [vmem:[#allocation71_spill] sm:$0xff] %v3769_v22  ;;  %v1997_v15 = vmul.f32 %v5927_v51, %v435_v49  ;;  %v3789_v57 = vadd.f32 %v1541_v55, %v6175_v16  ;;  %v6176_v22 = vld [vmem:[#allocation44_spill] sm:$0xff]  ;;  %v512_v50 = vadd.f32 %v511_v11, %v3643_v58  ;;  %v5928_v10 = vperm.slane %v6181_v40, 0 }
 0x161   :  { %v3792_v42 = vadd.f32 %v1693_v59, %v6176_v22  ;;  %v3795_v19 = vadd.f32 %v1845_v28, %v6177_v61  ;;  %v5929_v14 = vperm.slane %v6181_v40, 1  ;;  %v5930_v49 = vperm.slane %v6181_v40, 2 }
 0x162   :  { %v3799_v20 = vadd.f32 %v1997_v15, %v6179_v4  ;;  %v5931_v55 = vperm.slane %v6181_v40, 3  ;;  %v5932_v16 = vperm.slane %v6181_v40, 4  ;;  %v5933_v22 = vperm.slane %v6181_v40, 5 }
 0x163   :  { %6178 = vst [vmem:[#allocation42_spill] sm:$0xff] %v3795_v19  ;;  %v5935_v61 = vperm.slane %v6181_v40, 6  ;;  %v934_v58 = vmul.f32 %v5928_v10, %v512_v50  ;;  %v1086_v11 = vmul.f32 %v5929_v14, %v512_v50  ;;  %v1238_v59 = vmul.f32 %v5930_v49, %v512_v50  ;;  %v3834_v19 = vpop.permute.xlu0 %186 }
 0x164   :  { %6180 = vst [vmem:[#allocation43_spill] sm:$0xff] %v3799_v20  ;;  %v5934_v28 = vperm.slane %v6181_v40, 7  ;;  %v1390_v15 = vmul.f32 %v5931_v55, %v512_v50  ;;  %v1542_v4 = vmul.f32 %v5932_v16, %v512_v50  ;;  %v1694_v51 = vmul.f32 %v5933_v22, %v512_v50 }
 0x165   :  { %v1846_v10 = vmul.f32 %v5935_v61, %v512_v50  ;;  %v3824_v20 = vadd.f32 %v934_v58, %v3497_v9  ;;  %v3827_v14 = vadd.f32 %v1086_v11, %v3499_v17  ;;  %v3830_v49 = vadd.f32 %v1238_v59, %v3501_v41  ;;  %v283_v58 = vpop.f32.mrf.mxu0  ;;  %v6189_v11 = vld [vmem:[#allocation9_spill] sm:$0xff] }
 0x166   :  { %v1998_v55 = vmul.f32 %v5934_v28, %v512_v50  ;;  %v3837_v16 = vadd.f32 %v1390_v15, %v3503_v44  ;;  %v3840_v22 = vadd.f32 %v1542_v4, %v3505_v21  ;;  %v3843_v9 = vadd.f32 %v1694_v51, %v3507_v12 }
 0x167   :  { %6182 = vst [vmem:[#allocation44_spill] sm:$0xff] %v3827_v14  ;;  %v3846_v17 = vadd.f32 %v1846_v10, %v3509_v52  ;;  %v284_v50 = vadd.f32 %v283_v58, %v3834_v19  ;;  %v927_v59 = vperm.slane %v6189_v11, 0  ;;  %v1079_v44 = vperm.slane %v6189_v11, 1 }
 0x168   :  { %6183 = vst [vmem:[#allocation45_spill] sm:$0xff] %v3830_v49  ;;  %v3849_v41 = vadd.f32 %v1998_v55, %v3511_v13  ;;  %v1231_v15 = vperm.slane %v6189_v11, 2  ;;  %v1383_v21 = vperm.slane %v6189_v11, 3  ;;  %v1535_v12 = vperm.slane %v6189_v11, 4  ;;  %v3956_v49 = vpop.permute.xlu1 %191 }
 0x169   :  { %6184 = vst [vmem:[#allocation46_spill] sm:$0xff] %v3837_v16  ;;  %v1687_v51 = vperm.slane %v6189_v11, 5  ;;  %v3859_v52 = vmul.f32 %v927_v59, %v3662_v3  ;;  %v935_v10 = vmul.f32 %v927_v59, %v284_v50  ;;  %v3862_v13 = vmul.f32 %v1079_v44, %v3662_v3  ;;  %v360_v16 = vpop.f32.mrf.mxu1 }
 0x16a   :  { %6185 = vst [vmem:[#allocation47_spill] sm:$0xff] %v3840_v22  ;;  %v1087_v55 = vmul.f32 %v1079_v44, %v284_v50  ;;  %v3865_v4 = vmul.f32 %v1231_v15, %v3662_v3  ;;  %v1239_v58 = vmul.f32 %v1231_v15, %v284_v50  ;;  %v3868_v28 = vmul.f32 %v1383_v21, %v3662_v3 }
 0x16b   :  { %6186 = vst [vmem:[#allocation72_spill] sm:$0xff] %v3843_v9  ;;  %v1391_v61 = vmul.f32 %v1383_v21, %v284_v50  ;;  %v3877_v59 = vmul.f32 %v1535_v12, %v3662_v3  ;;  %v1543_v9 = vmul.f32 %v1535_v12, %v284_v50  ;;  %v3886_v15 = vmul.f32 %v1687_v51, %v3662_v3 }
 0x16c   :  { %6187 = vst [vmem:[#allocation73_spill] sm:$0xff] %v3846_v17  ;;  %v3874_v17 = vadd.f32 %v1087_v55, %v3537_v32  ;;  %v3880_v44 = vadd.f32 %v1239_v58, %v3544_v47  ;;  %v1695_v21 = vmul.f32 %v1687_v51, %v284_v50  ;;  %v1839_v32 = vperm.slane %v6189_v11, 6  ;;  %v6196_v55 = vld [vmem:[#allocation15_spill] sm:$0xff] }
 0x16d   :  { %6188 = vst [vmem:[#allocation74_spill] sm:$0xff] %v3849_v41  ;;  %v3871_v41 = vadd.f32 %v935_v10, %v3534_v60  ;;  %v3883_v22 = vadd.f32 %v1391_v61, %v3561_v35  ;;  %v3889_v60 = vadd.f32 %v1543_v9, %v3568_v18  ;;  %v1991_v10 = vperm.slane %v6189_v11, 7 }
 0x16e   :  { %6191 = vst [vmem:[#allocation75_spill] sm:$0xff] %v3874_v17  ;;  %v361_v12 = vadd.f32 %v360_v16, %v3834_v19  ;;  %v3895_v47 = vadd.f32 %v1695_v21, %v3583_v36  ;;  %v928_v35 = vperm.slane %v6196_v55, 0  ;;  %v1080_v61 = vperm.slane %v6196_v55, 1  ;;  %v6202_v17 = vld [vmem:[#allocation66_spill] sm:$0xff] }
 0x16f   :  { %6190 = vst [vmem:[#allocation9_spill] sm:$0xff] %v3871_v41  ;;  %v1232_v58 = vperm.slane %v6196_v55, 2  ;;  %v3901_v51 = vmul.f32 %v1839_v32, %v3662_v3  ;;  %v1847_v18 = vmul.f32 %v1839_v32, %v284_v50  ;;  %v3904_v9 = vmul.f32 %v1991_v10, %v3662_v3 }
 0x170   :  { %6192 = vst [vmem:[#allocation76_spill] sm:$0xff] %v3880_v44  ;;  %v3907_v11 = vmul.f32 %v928_v35, %v3746_v8  ;;  %v936_v16 = vmul.f32 %v928_v35, %v361_v12  ;;  %v3910_v36 = vmul.f32 %v1080_v61, %v3746_v8  ;;  %v1088_v21 = vmul.f32 %v1080_v61, %v361_v12 }
 0x171   :  { %6193 = vst [vmem:[#allocation77_spill] sm:$0xff] %v3883_v22  ;;  %v3919_v32 = vmul.f32 %v1232_v58, %v3746_v8  ;;  %v1240_v3 = vmul.f32 %v1232_v58, %v361_v12  ;;  %v1384_v35 = vperm.slane %v6196_v55, 3  ;;  %v1536_v61 = vperm.slane %v6196_v55, 4 }
 0x172   :  { %6194 = vst [vmem:[#allocation78_spill] sm:$0xff] %v3889_v60  ;;  %v1999_v60 = vmul.f32 %v1991_v10, %v284_v50  ;;  %v3922_v50 = vadd.f32 %v936_v16, %v3614_v53  ;;  %v6200_v10 = vld [vmem:[#allocation64_spill] sm:$0xff] }
 0x173   :  { %6195 = vst [vmem:[#allocation79_spill] sm:$0xff] %v3895_v47  ;;  %v3913_v47 = vadd.f32 %v1847_v18, %v3592_v39  ;;  %v3925_v44 = vadd.f32 %v1088_v21, %v6200_v10  ;;  %v3930_v39 = vadd.f32 %v1240_v3, %v6202_v17  ;;  %v1992_v18 = vperm.slane %v6196_v55, 7  ;;  %v437_v10 = vpop.f32.mrf.mxu2 }
 0x174   :  { %v3916_v22 = vadd.f32 %v1999_v60, %v3594_v56  ;;  %6199 = vst [vmem:[#allocation81_spill] sm:$0xff] %v3922_v50  ;;  %v1688_v56 = vperm.slane %v6196_v55, 5  ;;  %v1840_v60 = vperm.slane %v6196_v55, 6  ;;  %v3936_v58 = vmul.f32 %v1384_v35, %v3746_v8  ;;  %v6204_v55 = vld [vmem:[#allocation68_spill] sm:$0xff] }
 0x175   :  { %6197 = vst [vmem:[#allocation15_spill] sm:$0xff] %v3913_v47  ;;  %v1392_v53 = vmul.f32 %v1384_v35, %v361_v12  ;;  %v3939_v16 = vmul.f32 %v1536_v61, %v3746_v8  ;;  %v1544_v21 = vmul.f32 %v1536_v61, %v361_v12  ;;  %v3954_v41 = vmul.f32 %v1992_v18, %v3746_v8 }
 0x176   :  { %6198 = vst [vmem:[#allocation80_spill] sm:$0xff] %v3916_v22  ;;  %v3942_v50 = vmul.f32 %v1688_v56, %v3746_v8  ;;  %v1696_v17 = vmul.f32 %v1688_v56, %v361_v12  ;;  %v3945_v3 = vmul.f32 %v1840_v60, %v3746_v8  ;;  %v286_v22 = vpop.f32.mrf.mxu0  ;;  %v2000_v61 = vmul.f32 %v1992_v18, %v361_v12  ;;  %v6208_v8 = vld [vmem:[#allocation21_spill] sm:$0xff] }
 0x177   :  { %6201 = vst [vmem:[#allocation64_spill] sm:$0xff] %v3925_v44  ;;  %v514_v44 = vpop.f32.mrf.mxu3  ;;  %v3948_v47 = vadd.f32 %v1392_v53, %v6204_v55  ;;  %v3951_v35 = vadd.f32 %v1544_v21, %v3645_v31  ;;  %v3970_v31 = vadd.f32 %v286_v22, %v3956_v49  ;;  %v6210_v21 = vld [vmem:[#allocation10_spill] sm:$0xff]  ;;  %v6215_v22 = vperm.slane %v3285_v6, 4 }
 0x178   :  { %6203 = vst [vmem:[#allocation66_spill] sm:$0xff] %v3930_v39  ;;  %v1848_v39 = vmul.f32 %v1840_v60, %v361_v12  ;;  %v3959_v14 = vadd.f32 %v1696_v17, %v3656_v0  ;;  %v438_v60 = vadd.f32 %v437_v10, %v3834_v19  ;;  %v515_v53 = vadd.f32 %v514_v44, %v3834_v19  ;;  %v6209_v12 = vld [vmem:[#allocation53_spill] sm:$0xff] }
 0x179   :  { %6205 = vst [vmem:[#allocation68_spill] sm:$0xff] %v3951_v35  ;;  %v3967_v55 = vadd.f32 %v2000_v61, %v3672_v1  ;;  %v919_v18 = vadd.f32 %v6209_v12, %v6208_v8  ;;  %v6211_v0 = vperm.slane %v3285_v6, 0  ;;  %v6213_v10 = vperm.slane %v3285_v6, 2 }
 0x17a   :  { %v3962_v56 = vadd.f32 %v1848_v39, %v3664_v45  ;;  %v6212_v45 = vperm.slane %v3285_v6, 1  ;;  %v6214_v1 = vperm.slane %v3285_v6, 3  ;;  %v1545_v61 = vmul.f32 %v6215_v22, %v438_v60 }
 0x17b   :  { %6207 = vst [vmem:[#allocation83_spill] sm:$0xff] %v3967_v55  ;;  %v937_v17 = vmul.f32 %v6211_v0, %v438_v60  ;;  %v1241_v19 = vmul.f32 %v6213_v10, %v438_v60  ;;  %v6216_v55 = vperm.slane %v3285_v6, 5  ;;  %v6217_v12 = vperm.slane %v3285_v6, 6 }
 0x17c   :  { %6206 = vst [vmem:[#allocation82_spill] sm:$0xff] %v3962_v56  ;;  %v1089_v39 = vmul.f32 %v6212_v45, %v438_v60  ;;  %v1393_v44 = vmul.f32 %v6214_v1, %v438_v60  ;;  %v6218_v0 = vperm.slane %v3285_v6, 7 }
 0x17d   :  { %v1697_v8 = vmul.f32 %v6216_v55, %v438_v60  ;;  %v1849_v35 = vmul.f32 %v6217_v12, %v438_v60  ;;  %v3992_v45 = vadd.f32 %v937_v17, %v3681_v34  ;;  %v3998_v1 = vadd.f32 %v1241_v19, %v3687_v33 }
 0x17e   :  { %v2001_v56 = vmul.f32 %v6218_v0, %v438_v60  ;;  %v3995_v10 = vadd.f32 %v1089_v39, %v3684_v7  ;;  %v4001_v22 = vadd.f32 %v1393_v44, %v3692_v30  ;;  %v4004_v55 = vadd.f32 %v1545_v61, %v3695_v26 }
 0x17f   :  { %v4007_v12 = vadd.f32 %v1697_v8, %v3698_v38  ;;  %v4010_v6 = vadd.f32 %v1849_v35, %v3703_v62  ;;  %v6219_v7 = vperm.slane %v6181_v40, 0  ;;  %v6220_v33 = vperm.slane %v6181_v40, 1 }
 0x180   :  { %v4013_v34 = vadd.f32 %v2001_v56, %v3712_v27  ;;  %v6221_v30 = vperm.slane %v6181_v40, 2  ;;  %v6222_v26 = vperm.slane %v6181_v40, 3  ;;  %v6223_v38 = vperm.slane %v6181_v40, 4 }
 0x181   :  { %v938_v60 = vmul.f32 %v6219_v7, %v515_v53  ;;  %v1090_v17 = vmul.f32 %v6220_v33, %v515_v53  ;;  %v6224_v62 = vperm.slane %v6181_v40, 5  ;;  %v6225_v27 = vperm.slane %v6181_v40, 6 }
 0x182   :  { %v1242_v39 = vmul.f32 %v6221_v30, %v515_v53  ;;  %v1394_v19 = vmul.f32 %v6222_v26, %v515_v53  ;;  %v1546_v44 = vmul.f32 %v6223_v38, %v515_v53  ;;  %v6226_v61 = vperm.slane %v6181_v40, 7 }
 0x183   :  { %v1698_v35 = vmul.f32 %v6224_v62, %v515_v53  ;;  %v1850_v56 = vmul.f32 %v6225_v27, %v515_v53  ;;  %v4032_v0 = vadd.f32 %v938_v60, %v3721_v29  ;;  %v4035_v7 = vadd.f32 %v1090_v17, %v3724_v48  ;;  %v6229_v60 = vld [vmem:[#allocation54_spill] sm:$0xff]  ;;  %v6233_v62 = vld [vmem:[#allocation56_spill] sm:$0xff] }
 0x184   :  { %v2002_v8 = vmul.f32 %v6226_v61, %v515_v53  ;;  %v4038_v33 = vadd.f32 %v1242_v39, %v3727_v54  ;;  %v4041_v30 = vadd.f32 %v1394_v19, %v3732_v63  ;;  %v4044_v26 = vadd.f32 %v1546_v44, %v3735_v24  ;;  %v6228_v63 = vld [vmem:[#allocation23_spill] sm:$0xff]  ;;  %v6230_v39 = vld [vmem:[#allocation25_spill] sm:$0xff] }
 0x185   :  { %v4047_v38 = vadd.f32 %v1698_v35, %v3738_v37  ;;  %v4050_v40 = vadd.f32 %v1850_v56, %v3743_v25  ;;  %v939_v48 = vadd.f32 %v3859_v52, %v919_v18  ;;  %v6227_v54 = vperm.slane %v6210_v21, 0  ;;  %v6231_v37 = vld [vmem:[#allocation55_spill] sm:$0xff]  ;;  %v6234_v56 = vld [vmem:[#allocation29_spill] sm:$0xff] }
 0x186   :  { %v4053_v29 = vadd.f32 %v2002_v8, %v3751_v43  ;;  %v1071_v17 = vadd.f32 %v6229_v60, %v6228_v63  ;;  %v5959_v24 = vperm.slane %v6210_v21, 1  ;;  %v1223_v19 = vadd.f32 %v6231_v37, %v6230_v39  ;;  %v6232_v44 = vld [vmem:[#allocation27_spill] sm:$0xff]  ;;  %v6235_v61 = vld [vmem:[#allocation57_spill] sm:$0xff]  ;;  %v6237_v37 = vld [vmem:[#allocation58_spill] sm:$0xff] }
 0x187   :  { %v951_v53 = vmul.f32 %v6227_v54, %v3970_v31  ;;  %v5940_v25 = vperm.slane %v6210_v21, 2  ;;  %v1375_v43 = vadd.f32 %v6233_v62, %v6232_v44  ;;  %v5938_v35 = vperm.slane %v6210_v21, 3  ;;  %v6236_v39 = vld [vmem:[#allocation31_spill] sm:$0xff] }
 0x188   :  { %v1091_v18 = vadd.f32 %v3862_v13, %v1071_v17  ;;  %v1103_v27 = vmul.f32 %v5959_v24, %v3970_v31  ;;  %v1527_v8 = vadd.f32 %v6235_v61, %v6234_v56  ;;  %v1243_v54 = vadd.f32 %v3865_v4, %v1223_v19  ;;  %v363_v4 = vpop.f32.mrf.mxu1  ;;  %v6239_v56 = vld [vmem:[#allocation59_spill] sm:$0xff] }
 0x189   :  { %v4068_v52 = vadd.f32 %v951_v53, %v939_v48  ;;  %v1255_v63 = vmul.f32 %v5940_v25, %v3970_v31  ;;  %v1395_v60 = vadd.f32 %v3868_v28, %v1375_v43  ;;  %v1407_v48 = vmul.f32 %v5938_v35, %v3970_v31  ;;  %v6238_v43 = vld [vmem:[#allocation33_spill] sm:$0xff]  ;;  %v6248_v25 = vld [vmem:[#allocation63_spill] sm:$0xff] }
 0x18a   :  { %v4084_v13 = vadd.f32 %v1103_v27, %v1091_v18  ;;  %v1547_v53 = vadd.f32 %v3877_v59, %v1527_v8  ;;  %v5936_v17 = vperm.slane %v6210_v21, 4  ;;  %v1679_v44 = vadd.f32 %v6237_v37, %v6236_v39  ;;  %v6240_v8 = vld [vmem:[#allocation40_spill] sm:$0xff] }
 0x18b   :  { %v4090_v19 = vadd.f32 %v1255_v63, %v1243_v54  ;;  %v4092_v62 = vadd.f32 %v1407_v48, %v1395_v60  ;;  %v5937_v28 = vperm.slane %v6210_v21, 5  ;;  %v1831_v61 = vadd.f32 %v6239_v56, %v6238_v43  ;;  %v6241_v39 = vld [vmem:[#allocation60_spill] sm:$0xff]  ;;  %v6242_v56 = vld [vmem:[#allocation22_spill] sm:$0xff] }
 0x18c   :  { %v1559_v18 = vmul.f32 %v5936_v17, %v3970_v31  ;;  %v1699_v59 = vadd.f32 %v3886_v15, %v1679_v44  ;;  %v5939_v27 = vperm.slane %v6210_v21, 6  ;;  %v1983_v37 = vadd.f32 %v6241_v39, %v6240_v8  ;;  %v6243_v8 = vld [vmem:[#allocation61_spill] sm:$0xff] }
 0x18d   :  { %v1711_v54 = vmul.f32 %v5937_v28, %v3970_v31  ;;  %v1851_v63 = vadd.f32 %v3901_v51, %v1831_v61  ;;  %v5958_v60 = vperm.slane %v6210_v21, 7  ;;  %v364_v48 = vadd.f32 %v363_v4, %v3956_v49  ;;  %v6244_v61 = vld [vmem:[#allocation16_spill] sm:$0xff] }
 0x18e   :  { %v4110_v43 = vadd.f32 %v1559_v18, %v1547_v53  ;;  %v1863_v15 = vmul.f32 %v5939_v27, %v3970_v31  ;;  %v2003_v44 = vadd.f32 %v3904_v9, %v1983_v37  ;;  %v920_v39 = vadd.f32 %v6243_v8, %v6242_v56  ;;  %v6245_v4 = vld [vmem:[#allocation24_spill] sm:$0xff]  ;;  %v6246_v53 = vld [vmem:[#allocation62_spill] sm:$0xff] }
 0x18f   :  { %v4118_v17 = vadd.f32 %v1711_v54, %v1699_v59  ;;  %v2015_v51 = vmul.f32 %v5958_v60, %v3970_v31  ;;  %v5941_v28 = vperm.slane %v6244_v61, 0  ;;  %v1072_v18 = vadd.f32 %v6246_v53, %v6245_v4  ;;  %v6247_v37 = vld [vmem:[#allocation26_spill] sm:$0xff] }
 0x190   :  { %v4126_v35 = vadd.f32 %v1863_v15, %v1851_v63  ;;  %v940_v27 = vadd.f32 %v3907_v11, %v920_v39  ;;  %v5942_v9 = vperm.slane %v6244_v61, 1  ;;  %v1224_v56 = vadd.f32 %v6248_v25, %v6247_v37  ;;  %v6249_v11 = vld [vmem:[#allocation28_spill] sm:$0xff]  ;;  %v6250_v39 = vld [vmem:[#allocation65_spill] sm:$0xff]  ;;  %v6252_v37 = vld [vmem:[#allocation67_spill] sm:$0xff] }
 0x191   :  { %v4132_v59 = vadd.f32 %v2015_v51, %v2003_v44  ;;  %v952_v54 = vmul.f32 %v5941_v28, %v364_v48  ;;  %v1092_v31 = vadd.f32 %v3910_v36, %v1072_v18  ;;  %v5944_v8 = vperm.slane %v6244_v61, 2  ;;  %v6251_v51 = vld [vmem:[#allocation30_spill] sm:$0xff] }
 0x192   :  { %v1104_v63 = vmul.f32 %v5942_v9, %v364_v48  ;;  %v1244_v15 = vadd.f32 %v3919_v32, %v1224_v56  ;;  %v1376_v4 = vadd.f32 %v6250_v39, %v6249_v11  ;;  %v5943_v53 = vperm.slane %v6244_v61, 3  ;;  %v6253_v56 = vld [vmem:[#allocation32_spill] sm:$0xff] }
 0x193   :  { %v4144_v25 = vadd.f32 %v952_v54, %v940_v27  ;;  %v1256_v44 = vmul.f32 %v5944_v8, %v364_v48  ;;  %v1528_v36 = vadd.f32 %v6252_v37, %v6251_v51  ;;  %v5954_v18 = vperm.slane %v6244_v61, 4  ;;  %v440_v37 = vpop.f32.mrf.mxu2 }
 0x194   :  { %v4151_v28 = vadd.f32 %v1104_v63, %v1092_v31  ;;  %v1396_v9 = vadd.f32 %v3936_v58, %v1376_v4  ;;  %v1408_v32 = vmul.f32 %v5943_v53, %v364_v48  ;;  %v1680_v11 = vadd.f32 %v3648_v2, %v6253_v56  ;;  %v6254_v63 = vld [vmem:[#allocation34_spill] sm:$0xff]  ;;  %v6255_v4 = vld [vmem:[#allocation69_spill] sm:$0xff] }
 0x195   :  { %v4158_v27 = vadd.f32 %v1256_v44, %v1244_v15  ;;  %v1548_v54 = vadd.f32 %v3939_v16, %v1528_v36  ;;  %v1560_v39 = vmul.f32 %v5954_v18, %v364_v48  ;;  %v5945_v51 = vperm.slane %v6244_v61, 5  ;;  %v6256_v15 = vld [vmem:[#allocation41_spill] sm:$0xff]  ;;  %v6257_v44 = vld [vmem:[#allocation70_spill] sm:$0xff] }
 0x196   :  { %v4164_v31 = vadd.f32 %v1408_v32, %v1396_v9  ;;  %v1700_v58 = vadd.f32 %v3942_v50, %v1680_v11  ;;  %v1832_v53 = vadd.f32 %v6255_v4, %v6254_v63  ;;  %v5946_v8 = vperm.slane %v6244_v61, 6  ;;  %v6258_v11 = vld [vmem:[#allocation35_spill] sm:$0xff] }
 0x197   :  { %v4170_v2 = vadd.f32 %v1560_v39, %v1548_v54  ;;  %v1712_v16 = vmul.f32 %v5945_v51, %v364_v48  ;;  %v1984_v36 = vadd.f32 %v6257_v44, %v6256_v15  ;;  %v5953_v56 = vperm.slane %v6244_v61, 7  ;;  %v517_v44 = vpop.f32.mrf.mxu3 }
 0x198   :  { %v1852_v9 = vadd.f32 %v3945_v3, %v1832_v53  ;;  %v1864_v50 = vmul.f32 %v5946_v8, %v364_v48  ;;  %v441_v32 = vadd.f32 %v440_v37, %v3956_v49  ;;  %v5947_v63 = vperm.slane %v6258_v11, 0 }
 0x199   :  { %v4182_v4 = vadd.f32 %v1712_v16, %v1700_v58  ;;  %v2004_v54 = vadd.f32 %v3954_v41, %v1984_v36  ;;  %v2016_v39 = vmul.f32 %v5953_v56, %v364_v48  ;;  %v5948_v15 = vperm.slane %v6258_v11, 1  ;;  %v6259_v16 = vld [vmem:[#allocation71_spill] sm:$0xff]  ;;  %v6265_v56 = vld [vmem:[#allocation48_spill] sm:$0xff] }
 0x19a   :  { %v4188_v51 = vadd.f32 %v1864_v50, %v1852_v9  ;;  %v953_v3 = vmul.f32 %v5947_v63, %v441_v32  ;;  %v5949_v53 = vperm.slane %v6258_v11, 2  ;;  %v5950_v37 = vperm.slane %v6258_v11, 3 }
 0x19b   :  { %v4194_v8 = vadd.f32 %v2016_v39, %v2004_v54  ;;  %v1105_v41 = vmul.f32 %v5948_v15, %v441_v32  ;;  %v5951_v58 = vperm.slane %v6258_v11, 4  ;;  %v5952_v48 = vperm.slane %v6258_v11, 5 }
 0x19c   :  { %v4201_v36 = vadd.f32 %v953_v3, %v6259_v16  ;;  %v1257_v9 = vmul.f32 %v5949_v53, %v441_v32  ;;  %v1409_v50 = vmul.f32 %v5950_v37, %v441_v32  ;;  %v5956_v63 = vperm.slane %v6258_v11, 6 }
 0x19d   :  { %v4209_v54 = vadd.f32 %v1105_v41, %v3778_v46  ;;  %v1561_v39 = vmul.f32 %v5951_v58, %v441_v32  ;;  %v1713_v15 = vmul.f32 %v5952_v48, %v441_v32  ;;  %v5955_v3 = vperm.slane %v6258_v11, 7 }
 0x19e   :  { %v4217_v16 = vadd.f32 %v1257_v9, %v3781_v23  ;;  %v4220_v53 = vadd.f32 %v1409_v50, %v3784_v5  ;;  %v1865_v37 = vmul.f32 %v5956_v63, %v441_v32  ;;  %v518_v46 = vadd.f32 %v517_v44, %v3956_v49  ;;  %v6266_v9 = vld [vmem:[#allocation42_spill] sm:$0xff]  ;;  %v6268_v44 = vld [vmem:[#allocation43_spill] sm:$0xff]  ;;  %v366_v63 = vpop.f32.mrf.mxu1 }
 0x19f   :  { %6260 = vst [vmem:[#allocation21_spill] sm:$0xff] %v4209_v54  ;;  %v4226_v41 = vadd.f32 %v1561_v39, %v3789_v57  ;;  %v4229_v58 = vadd.f32 %v1713_v15, %v3792_v42  ;;  %v2017_v48 = vmul.f32 %v5955_v3, %v441_v32  ;;  %v5957_v23 = vperm.slane %v6265_v56, 0  ;;  %v197_v39 = vpop.permute.xlu2 %196 }
 0x1a0   :  { %6261 = vst [vmem:[#allocation53_spill] sm:$0xff] %v4217_v16  ;;  %v4235_v18 = vadd.f32 %v1865_v37, %v6266_v9  ;;  %v5960_v5 = vperm.slane %v6265_v56, 1  ;;  %v5961_v50 = vperm.slane %v6265_v56, 2  ;;  %v5962_v49 = vperm.slane %v6265_v56, 3 }
 0x1a1   :  { %6262 = vst [vmem:[#allocation10_spill] sm:$0xff] %v4220_v53  ;;  %v4241_v57 = vadd.f32 %v2017_v48, %v6268_v44  ;;  %v954_v42 = vmul.f32 %v5957_v23, %v518_v46  ;;  %v5963_v15 = vperm.slane %v6265_v56, 4  ;;  %v5964_v32 = vperm.slane %v6265_v56, 5  ;;  %v289_v44 = vpop.f32.mrf.mxu0 }
 0x1a2   :  { %6263 = vst [vmem:[#allocation23_spill] sm:$0xff] %v4226_v41  ;;  %v1106_v37 = vmul.f32 %v5960_v5, %v518_v46  ;;  %v1258_v9 = vmul.f32 %v5961_v50, %v518_v46  ;;  %v1410_v3 = vmul.f32 %v5962_v49, %v518_v46  ;;  %v5965_v5 = vperm.slane %v6265_v56, 7  ;;  %v520_v50 = vpop.f32.mrf.mxu3  ;;  %v6273_v49 = vld [vmem:[#allocation45_spill] sm:$0xff]  ;;  %v6275_v41 = vld [vmem:[#allocation46_spill] sm:$0xff] }
 0x1a3   :  { %6264 = vst [vmem:[#allocation54_spill] sm:$0xff] %v4229_v58  ;;  %v4255_v23 = vadd.f32 %v954_v42, %v3824_v20  ;;  %v1562_v60 = vmul.f32 %v5963_v15, %v518_v46  ;;  %v1714_v24 = vmul.f32 %v5964_v32, %v518_v46  ;;  %v6277_v20 = vperm.slane %v6265_v56, 6  ;;  %v6278_v15 = vld [vmem:[#allocation47_spill] sm:$0xff]  ;;  %v6280_v32 = vld [vmem:[#allocation72_spill] sm:$0xff] }
 0x1a4   :  { %6267 = vst [vmem:[#allocation25_spill] sm:$0xff] %v4235_v18  ;;  %v6271_v18 = vld [vmem:[#allocation44_spill] sm:$0xff]  ;;  %v4266_v48 = vadd.f32 %v1258_v9, %v6273_v49  ;;  %v4269_v53 = vadd.f32 %v1410_v3, %v6275_v41  ;;  %v2018_v54 = vmul.f32 %v5965_v5, %v518_v46  ;;  %v367_v49 = vadd.f32 %v366_v63, %v197_v39  ;;  %v6284_v41 = vld [vmem:[#allocation74_spill] sm:$0xff] }
 0x1a5   :  { %6269 = vst [vmem:[#allocation55_spill] sm:$0xff] %v4241_v57  ;;  %v443_v57 = vpop.f32.mrf.mxu2  ;;  %v4263_v58 = vadd.f32 %v1106_v37, %v6271_v18  ;;  %v1866_v42 = vmul.f32 %v6277_v20, %v518_v46  ;;  %v4277_v16 = vadd.f32 %v1714_v24, %v6280_v32  ;;  %v290_v18 = vadd.f32 %v289_v44, %v197_v39  ;;  %v6282_v37 = vld [vmem:[#allocation73_spill] sm:$0xff]  ;;  %v6295_v5 = vld [vmem:[#allocation76_spill] sm:$0xff] }
 0x1a6   :  { %6270 = vst [vmem:[#allocation27_spill] sm:$0xff] %v4255_v23  ;;  %v4274_v23 = vadd.f32 %v1562_v60, %v6278_v15  ;;  %v444_v9 = vadd.f32 %v443_v57, %v197_v39  ;;  %v521_v3 = vadd.f32 %v520_v50, %v197_v39  ;;  %v6286_v20 = vperm.slane %v6210_v21, 0 }
 0x1a7   :  { %6272 = vst [vmem:[#allocation56_spill] sm:$0xff] %v4263_v58  ;;  %v4282_v58 = vadd.f32 %v1866_v42, %v6282_v37  ;;  %v6287_v15 = vperm.slane %v6210_v21, 1  ;;  %v6288_v32 = vperm.slane %v6210_v21, 2  ;;  %v6289_v46 = vperm.slane %v6210_v21, 3  ;;  %v6293_v37 = vld [vmem:[#allocation9_spill] sm:$0xff] }
 0x1a8   :  { %6274 = vst [vmem:[#allocation29_spill] sm:$0xff] %v4266_v48  ;;  %v955_v60 = vmul.f32 %v6286_v20, %v290_v18  ;;  %v6290_v42 = vperm.slane %v6210_v21, 4  ;;  %v6291_v50 = vperm.slane %v6210_v21, 5  ;;  %v6294_v20 = vld [vmem:[#allocation75_spill] sm:$0xff] }
 0x1a9   :  { %6276 = vst [vmem:[#allocation57_spill] sm:$0xff] %v4269_v53  ;;  %v4285_v53 = vadd.f32 %v2018_v54, %v6284_v41  ;;  %v1107_v24 = vmul.f32 %v6287_v15, %v290_v18  ;;  %v1411_v44 = vmul.f32 %v6289_v46, %v290_v18  ;;  %v6292_v54 = vperm.slane %v6210_v21, 6  ;;  %v6300_v48 = vld [vmem:[#allocation79_spill] sm:$0xff] }
 0x1aa   :  { %6279 = vst [vmem:[#allocation31_spill] sm:$0xff] %v4274_v23  ;;  %v1563_v63 = vmul.f32 %v6290_v42, %v290_v18  ;;  %v1715_v57 = vmul.f32 %v6291_v50, %v290_v18  ;;  %v4302_v41 = vadd.f32 %v955_v60, %v6293_v37  ;;  %v6296_v46 = vperm.slane %v6210_v21, 7  ;;  %v6298_v23 = vld [vmem:[#allocation78_spill] sm:$0xff]  ;;  %v6302_v60 = vld [vmem:[#allocation15_spill] sm:$0xff] }
 0x1ab   :  { %6281 = vst [vmem:[#allocation58_spill] sm:$0xff] %v4277_v16  ;;  %v1259_v16 = vmul.f32 %v6288_v32, %v290_v18  ;;  %v1867_v39 = vmul.f32 %v6292_v54, %v290_v18  ;;  %v4305_v15 = vadd.f32 %v1107_v24, %v6294_v20  ;;  %v6304_v24 = vld [vmem:[#allocation80_spill] sm:$0xff]  ;;  %v6307_v21 = vperm.slane %v6244_v61, 1 }
 0x1ac   :  { %6283 = vst [vmem:[#allocation33_spill] sm:$0xff] %v4282_v58  ;;  %v6297_v58 = vld [vmem:[#allocation77_spill] sm:$0xff]  ;;  %v4316_v50 = vadd.f32 %v1563_v63, %v6298_v23  ;;  %v4319_v54 = vadd.f32 %v1715_v57, %v6300_v48  ;;  %v6309_v23 = vperm.slane %v6244_v61, 3  ;;  %v6310_v48 = vperm.slane %v6244_v61, 4 }
 0x1ad   :  { %6285 = vst [vmem:[#allocation59_spill] sm:$0xff] %v4285_v53  ;;  %v4308_v32 = vadd.f32 %v1259_v16, %v6295_v5  ;;  %v2019_v53 = vmul.f32 %v6296_v46, %v290_v18  ;;  %v4313_v42 = vadd.f32 %v1411_v44, %v6297_v58  ;;  %v4322_v37 = vadd.f32 %v1867_v39, %v6302_v60 }
 0x1ae   :  { %6299 = vst [vmem:[#allocation40_spill] sm:$0xff] %v4316_v50  ;;  %v6306_v16 = vperm.slane %v6244_v61, 0  ;;  %v1108_v18 = vmul.f32 %v6307_v21, %v367_v49  ;;  %v6308_v58 = vperm.slane %v6244_v61, 2  ;;  %v1412_v63 = vmul.f32 %v6309_v23, %v367_v49  ;;  %v6317_v50 = vld [vmem:[#allocation68_spill] sm:$0xff] }
 0x1af   :  { %6301 = vst [vmem:[#allocation60_spill] sm:$0xff] %v4319_v54  ;;  %v4325_v20 = vadd.f32 %v2019_v53, %v6304_v24  ;;  %v1564_v57 = vmul.f32 %v6310_v48, %v367_v49  ;;  %v6311_v39 = vperm.slane %v6244_v61, 5  ;;  %v6312_v53 = vperm.slane %v6244_v61, 6  ;;  %v6313_v24 = vld [vmem:[#allocation81_spill] sm:$0xff] }
 0x1b0   :  { %6303 = vst [vmem:[#allocation22_spill] sm:$0xff] %v4322_v37  ;;  %v956_v5 = vmul.f32 %v6306_v16, %v367_v49  ;;  %v1260_v44 = vmul.f32 %v6308_v58, %v367_v49  ;;  %v6315_v37 = vld [vmem:[#allocation66_spill] sm:$0xff]  ;;  %v6316_v23 = vperm.slane %v6244_v61, 7  ;;  %v4353_v48 = vadd.f32 %v1412_v63, %v3948_v47 }
 0x1b1   :  { %6305 = vst [vmem:[#allocation61_spill] sm:$0xff] %v4325_v20  ;;  %v1716_v46 = vmul.f32 %v6311_v39, %v367_v49  ;;  %v1868_v60 = vmul.f32 %v6312_v53, %v367_v49  ;;  %v6314_v20 = vld [vmem:[#allocation64_spill] sm:$0xff]  ;;  %v4356_v39 = vadd.f32 %v1564_v57, %v6317_v50  ;;  %v6321_v61 = vperm.slane %v6258_v11, 1 }
 0x1b2   :  { %v4342_v16 = vadd.f32 %v956_v5, %v6313_v24  ;;  %v4345_v21 = vadd.f32 %v1108_v18, %v6314_v20  ;;  %v4348_v58 = vadd.f32 %v1260_v44, %v6315_v37  ;;  %v2020_v54 = vmul.f32 %v6316_v23, %v367_v49  ;;  %v6318_v5 = vld [vmem:[#allocation82_spill] sm:$0xff]  ;;  %v6319_v20 = vld [vmem:[#allocation83_spill] sm:$0xff] }
 0x1b3   :  { %v4359_v53 = vadd.f32 %v1716_v46, %v3959_v14  ;;  %v4362_v24 = vadd.f32 %v1868_v60, %v6318_v5  ;;  %v6320_v37 = vperm.slane %v6258_v11, 0  ;;  %v1109_v49 = vmul.f32 %v6321_v61, %v444_v9 }
 0x1b4   :  { %v4365_v18 = vadd.f32 %v2020_v54, %v6319_v20  ;;  %v6322_v47 = vperm.slane %v6258_v11, 2  ;;  %v6323_v50 = vperm.slane %v6258_v11, 3  ;;  %v6324_v14 = vperm.slane %v6258_v11, 4 }
 0x1b5   :  { %v957_v44 = vmul.f32 %v6320_v37, %v444_v9  ;;  %v6325_v60 = vperm.slane %v6258_v11, 5  ;;  %v6326_v54 = vperm.slane %v6258_v11, 6  ;;  %v4385_v37 = vadd.f32 %v1109_v49, %v3995_v10 }
 0x1b6   :  { %v1261_v63 = vmul.f32 %v6322_v47, %v444_v9  ;;  %v1413_v57 = vmul.f32 %v6323_v50, %v444_v9  ;;  %v1565_v46 = vmul.f32 %v6324_v14, %v444_v9  ;;  %v6327_v47 = vperm.slane %v6258_v11, 7 }
 0x1b7   :  { %v1717_v23 = vmul.f32 %v6325_v60, %v444_v9  ;;  %v1869_v5 = vmul.f32 %v6326_v54, %v444_v9  ;;  %v4382_v20 = vadd.f32 %v957_v44, %v3992_v45  ;;  %v6329_v11 = vperm.slane %v6265_v56, 1 }
 0x1b8   :  { %v4388_v61 = vadd.f32 %v1261_v63, %v3998_v1  ;;  %v2021_v50 = vmul.f32 %v6327_v47, %v444_v9  ;;  %v4393_v14 = vadd.f32 %v1413_v57, %v4001_v22  ;;  %v4396_v60 = vadd.f32 %v1565_v46, %v4004_v55 }
 0x1b9   :  { %v4399_v54 = vadd.f32 %v1717_v23, %v4007_v12  ;;  %v4402_v45 = vadd.f32 %v1869_v5, %v4010_v6  ;;  %v6328_v1 = vperm.slane %v6265_v56, 0  ;;  %v1110_v9 = vmul.f32 %v6329_v11, %v521_v3  ;;  %v292_v5 = vpop.f32.mrf.mxu0 }
 0x1ba   :  { %v4405_v10 = vadd.f32 %v2021_v50, %v4013_v34  ;;  %v6330_v22 = vperm.slane %v6265_v56, 2  ;;  %v6331_v55 = vperm.slane %v6265_v56, 3  ;;  %v6332_v12 = vperm.slane %v6265_v56, 4 }
 0x1bb   :  { %v958_v44 = vmul.f32 %v6328_v1, %v521_v3  ;;  %v6333_v6 = vperm.slane %v6265_v56, 5  ;;  %v6334_v34 = vperm.slane %v6265_v56, 6  ;;  %v4425_v50 = vadd.f32 %v1110_v9, %v4035_v7 }
 0x1bc   :  { %v1262_v49 = vmul.f32 %v6330_v22, %v521_v3  ;;  %v1414_v63 = vmul.f32 %v6331_v55, %v521_v3  ;;  %v1566_v57 = vmul.f32 %v6332_v12, %v521_v3  ;;  %v6335_v11 = vperm.slane %v6265_v56, 7  ;;  %v4432_v55 = vpop.permute.xlu0 %201 }
 0x1bd   :  { %v1718_v46 = vmul.f32 %v6333_v6, %v521_v3  ;;  %v1870_v23 = vmul.f32 %v6334_v34, %v521_v3  ;;  %v4422_v47 = vadd.f32 %v958_v44, %v4032_v0  ;;  %v293_v56 = vadd.f32 %v292_v5, %v4432_v55 }
 0x1be   :  { %v4428_v1 = vadd.f32 %v1262_v49, %v4038_v33  ;;  %v2022_v22 = vmul.f32 %v6335_v11, %v521_v3  ;;  %v4435_v12 = vadd.f32 %v1414_v63, %v4041_v30  ;;  %v4438_v6 = vadd.f32 %v1566_v57, %v4044_v26  ;;  %v6336_v3 = vld [vmem:[#allocation11_spill] sm:$0xff]  ;;  %v369_v11 = vpop.f32.mrf.mxu1 }
 0x1bf   :  { %v4441_v0 = vadd.f32 %v1718_v46, %v4047_v38  ;;  %v4444_v7 = vadd.f32 %v1870_v23, %v4050_v40  ;;  %v5967_v44 = vperm.slane %v6336_v3, 0  ;;  %v5966_v9 = vperm.slane %v6336_v3, 1 }
 0x1c0   :  { %v4447_v33 = vadd.f32 %v2022_v22, %v4053_v29  ;;  %v5968_v30 = vperm.slane %v6336_v3, 2  ;;  %v5969_v26 = vperm.slane %v6336_v3, 3  ;;  %v5970_v49 = vperm.slane %v6336_v3, 4 }
 0x1c1   :  { %v5971_v38 = vperm.slane %v6336_v3, 5  ;;  %v971_v40 = vmul.f32 %v5967_v44, %v293_v56  ;;  %v1123_v29 = vmul.f32 %v5966_v9, %v293_v56  ;;  %v5974_v63 = vperm.slane %v6336_v3, 6 }
 0x1c2   :  { %v5972_v57 = vperm.slane %v6336_v3, 7  ;;  %v1275_v46 = vmul.f32 %v5968_v30, %v293_v56  ;;  %v1427_v34 = vmul.f32 %v5969_v26, %v293_v56  ;;  %v1579_v23 = vmul.f32 %v5970_v49, %v293_v56 }
 0x1c3   :  { %v1731_v5 = vmul.f32 %v5971_v38, %v293_v56  ;;  %v4471_v22 = vadd.f32 %v971_v40, %v4068_v52  ;;  %v4474_v9 = vadd.f32 %v1123_v29, %v4084_v13  ;;  %v1883_v44 = vmul.f32 %v5974_v63, %v293_v56  ;;  %v6339_v29 = vld [vmem:[#allocation17_spill] sm:$0xff] }
 0x1c4   :  { %v2035_v30 = vmul.f32 %v5972_v57, %v293_v56  ;;  %v4481_v26 = vadd.f32 %v1275_v46, %v4090_v19  ;;  %v4484_v49 = vadd.f32 %v1427_v34, %v4092_v62  ;;  %v4487_v38 = vadd.f32 %v1579_v23, %v4110_v43  ;;  %v446_v57 = vpop.f32.mrf.mxu2 }
 0x1c5   :  { %v4490_v52 = vadd.f32 %v1731_v5, %v4118_v17  ;;  %v4493_v13 = vadd.f32 %v1883_v44, %v4126_v35  ;;  %v370_v56 = vadd.f32 %v369_v11, %v4432_v55  ;;  %v5973_v19 = vperm.slane %v6339_v29, 0 }
 0x1c6   :  { %v4496_v40 = vadd.f32 %v2035_v30, %v4132_v59  ;;  %v5975_v46 = vperm.slane %v6339_v29, 1  ;;  %v5976_v62 = vperm.slane %v6339_v29, 2  ;;  %v5977_v43 = vperm.slane %v6339_v29, 3 }
 0x1c7   :  { %6337 = vst [vmem:[#allocation16_spill] sm:$0xff] %v4493_v13  ;;  %v5978_v34 = vperm.slane %v6339_v29, 4  ;;  %v972_v17 = vmul.f32 %v5973_v19, %v370_v56  ;;  %v5980_v35 = vperm.slane %v6339_v29, 5  ;;  %v5979_v59 = vperm.slane %v6339_v29, 6 }
 0x1c8   :  { %6338 = vst [vmem:[#allocation24_spill] sm:$0xff] %v4496_v40  ;;  %v1124_v30 = vmul.f32 %v5975_v46, %v370_v56  ;;  %v1276_v23 = vmul.f32 %v5976_v62, %v370_v56  ;;  %v1428_v5 = vmul.f32 %v5977_v43, %v370_v56  ;;  %v6341_v46 = vperm.slane %v6339_v29, 7 }
 0x1c9   :  { %v1580_v11 = vmul.f32 %v5978_v34, %v370_v56  ;;  %v4518_v19 = vadd.f32 %v972_v17, %v4144_v25  ;;  %v1732_v63 = vmul.f32 %v5980_v35, %v370_v56  ;;  %v1884_v44 = vmul.f32 %v5979_v59, %v370_v56 }
 0x1ca   :  { %v2036_v40 = vmul.f32 %v6341_v46, %v370_v56  ;;  %v4527_v62 = vadd.f32 %v1124_v30, %v4151_v28  ;;  %v4530_v43 = vadd.f32 %v1276_v23, %v4158_v27  ;;  %v4533_v34 = vadd.f32 %v1428_v5, %v4164_v31  ;;  %v6349_v46 = vld [vmem:[#allocation36_spill] sm:$0xff]  ;;  %v523_v23 = vpop.f32.mrf.mxu3  ;;  %v295_v5 = vpop.f32.mrf.mxu0 }
 0x1cb   :  { %6340 = vst [vmem:[#allocation62_spill] sm:$0xff] %v4518_v19  ;;  %v4536_v25 = vadd.f32 %v1580_v11, %v4170_v2  ;;  %v4539_v17 = vadd.f32 %v1732_v63, %v4182_v4  ;;  %v4542_v59 = vadd.f32 %v1884_v44, %v4188_v51  ;;  %v447_v28 = vadd.f32 %v446_v57, %v4432_v55  ;;  %v6363_v19 = vld [vmem:[#allocation25_spill] sm:$0xff] }
 0x1cc   :  { %6342 = vst [vmem:[#allocation26_spill] sm:$0xff] %v4527_v62  ;;  %v4545_v56 = vadd.f32 %v2036_v40, %v4194_v8  ;;  %v5981_v27 = vperm.slane %v6349_v46, 0  ;;  %v5982_v30 = vperm.slane %v6349_v46, 1  ;;  %v5983_v31 = vperm.slane %v6349_v46, 2  ;;  %v6361_v62 = vld [vmem:[#allocation54_spill] sm:$0xff] }
 0x1cd   :  { %6343 = vst [vmem:[#allocation63_spill] sm:$0xff] %v4530_v43  ;;  %v5984_v2 = vperm.slane %v6349_v46, 3  ;;  %v5985_v4 = vperm.slane %v6349_v46, 4  ;;  %v5986_v51 = vperm.slane %v6349_v46, 5  ;;  %v6350_v8 = vperm.slane %v6349_v46, 6  ;;  %v6359_v43 = vld [vmem:[#allocation23_spill] sm:$0xff] }
 0x1ce   :  { %6344 = vst [vmem:[#allocation28_spill] sm:$0xff] %v4533_v34  ;;  %v973_v57 = vmul.f32 %v5981_v27, %v447_v28  ;;  %v1125_v40 = vmul.f32 %v5982_v30, %v447_v28  ;;  %v1277_v44 = vmul.f32 %v5983_v31, %v447_v28  ;;  %v6351_v27 = vperm.slane %v6349_v46, 7  ;;  %v6357_v34 = vld [vmem:[#allocation10_spill] sm:$0xff] }
 0x1cf   :  { %6345 = vst [vmem:[#allocation65_spill] sm:$0xff] %v4536_v25  ;;  %v1429_v11 = vmul.f32 %v5984_v2, %v447_v28  ;;  %v1581_v35 = vmul.f32 %v5985_v4, %v447_v28  ;;  %v1733_v63 = vmul.f32 %v5986_v51, %v447_v28  ;;  %v6355_v25 = vld [vmem:[#allocation53_spill] sm:$0xff] }
 0x1d0   :  { %6346 = vst [vmem:[#allocation30_spill] sm:$0xff] %v4539_v17  ;;  %v4573_v30 = vadd.f32 %v973_v57, %v4201_v36  ;;  %v6353_v17 = vld [vmem:[#allocation21_spill] sm:$0xff]  ;;  %v4579_v2 = vadd.f32 %v1277_v44, %v6355_v25  ;;  %v6365_v36 = vld [vmem:[#allocation55_spill] sm:$0xff] }
 0x1d1   :  { %6347 = vst [vmem:[#allocation67_spill] sm:$0xff] %v4542_v59  ;;  %v2037_v59 = vmul.f32 %v6351_v27, %v447_v28  ;;  %v4576_v31 = vadd.f32 %v1125_v40, %v6353_v17  ;;  %v4582_v4 = vadd.f32 %v1429_v11, %v6357_v34  ;;  %v4585_v51 = vadd.f32 %v1581_v35, %v6359_v43  ;;  %v6367_v57 = vld [vmem:[#allocation49_spill] sm:$0xff] }
 0x1d2   :  { %6348 = vst [vmem:[#allocation32_spill] sm:$0xff] %v4545_v56  ;;  %v1885_v56 = vmul.f32 %v6350_v8, %v447_v28  ;;  %v4588_v8 = vadd.f32 %v1733_v63, %v6361_v62  ;;  %v524_v17 = vadd.f32 %v523_v23, %v4432_v55  ;;  %v5987_v25 = vperm.slane %v6367_v57, 0  ;;  %v6372_v23 = vld [vmem:[#allocation29_spill] sm:$0xff] }
 0x1d3   :  { %6352 = vst [vmem:[#allocation34_spill] sm:$0xff] %v4573_v30  ;;  %v4594_v27 = vadd.f32 %v2037_v59, %v6365_v36  ;;  %v5988_v40 = vperm.slane %v6367_v57, 1  ;;  %v5989_v34 = vperm.slane %v6367_v57, 2  ;;  %v5990_v43 = vperm.slane %v6367_v57, 3 }
 0x1d4   :  { %6354 = vst [vmem:[#allocation69_spill] sm:$0xff] %v4576_v31  ;;  %v4591_v28 = vadd.f32 %v1885_v56, %v6363_v19  ;;  %v5991_v35 = vperm.slane %v6367_v57, 4  ;;  %v5992_v62 = vperm.slane %v6367_v57, 5  ;;  %v5993_v19 = vperm.slane %v6367_v57, 6  ;;  %v6375_v31 = vld [vmem:[#allocation57_spill] sm:$0xff] }
 0x1d5   :  { %6356 = vst [vmem:[#allocation41_spill] sm:$0xff] %v4579_v2  ;;  %v974_v59 = vmul.f32 %v5987_v25, %v524_v17  ;;  %v1126_v55 = vmul.f32 %v5988_v40, %v524_v17  ;;  %v1278_v56 = vmul.f32 %v5989_v34, %v524_v17  ;;  %v1430_v63 = vmul.f32 %v5990_v43, %v524_v17  ;;  %v372_v25 = vpop.f32.mrf.mxu1  ;;  %v6368_v40 = vld [vmem:[#allocation27_spill] sm:$0xff]  ;;  %v6370_v34 = vld [vmem:[#allocation56_spill] sm:$0xff]  ;;  %v298_v2 = vpop.f32.mrf.mxu0 }
 0x1d6   :  { %6358 = vst [vmem:[#allocation70_spill] sm:$0xff] %v4582_v4  ;;  %v1582_v44 = vmul.f32 %v5991_v35, %v524_v17  ;;  %v1734_v11 = vmul.f32 %v5992_v62, %v524_v17  ;;  %v1886_v36 = vmul.f32 %v5993_v19, %v524_v17  ;;  %v6374_v43 = vperm.slane %v6367_v57, 7  ;;  %v526_v4 = vpop.f32.mrf.mxu3  ;;  %v207_v62 = vpop.permute.xlu1 %206  ;;  %v6376_v19 = vld [vmem:[#allocation31_spill] sm:$0xff] }
 0x1d7   :  { %6360 = vst [vmem:[#allocation35_spill] sm:$0xff] %v4585_v51  ;;  %v4626_v51 = vadd.f32 %v1278_v56, %v6372_v23  ;;  %v4631_v30 = vadd.f32 %v1430_v63, %v6375_v31  ;;  %v6381_v56 = vld [vmem:[#allocation59_spill] sm:$0xff] }
 0x1d8   :  { %6362 = vst [vmem:[#allocation71_spill] sm:$0xff] %v4588_v8  ;;  %v4623_v8 = vadd.f32 %v1126_v55, %v6370_v34  ;;  %v2038_v35 = vmul.f32 %v6374_v43, %v524_v17  ;;  %v4634_v13 = vadd.f32 %v1582_v44, %v6376_v19  ;;  %v6379_v34 = vld [vmem:[#allocation33_spill] sm:$0xff]  ;;  %v373_v17 = vadd.f32 %v372_v25, %v207_v62  ;;  %v4645_v43 = vpop.permute.xlu2 %211  ;;  %v6383_v19 = vld [vmem:[#allocation12_spill] sm:$0xff] }
 0x1d9   :  { %6364 = vst [vmem:[#allocation48_spill] sm:$0xff] %v4591_v28  ;;  %v4620_v28 = vadd.f32 %v974_v59, %v6368_v40  ;;  %v6377_v40 = vld [vmem:[#allocation58_spill] sm:$0xff]  ;;  %v4640_v55 = vadd.f32 %v1886_v36, %v6379_v34  ;;  %v4648_v31 = vadd.f32 %v298_v2, %v4645_v43  ;;  %v6387_v34 = vperm.slane %v6336_v3, 3 }
 0x1da   :  { %6366 = vst [vmem:[#allocation42_spill] sm:$0xff] %v4594_v27  ;;  %v449_v27 = vpop.f32.mrf.mxu2  ;;  %v4637_v59 = vadd.f32 %v1734_v11, %v6377_v40  ;;  %v4643_v23 = vadd.f32 %v2038_v35, %v6381_v56  ;;  %v6384_v11 = vperm.slane %v6336_v3, 0  ;;  %v6385_v40 = vperm.slane %v6336_v3, 1 }
 0x1db   :  { %6369 = vst [vmem:[#allocation43_spill] sm:$0xff] %v4620_v28  ;;  %v527_v28 = vadd.f32 %v526_v4, %v207_v62  ;;  %v6388_v4 = vperm.slane %v6336_v3, 4  ;;  %v6390_v44 = vperm.slane %v6336_v3, 6 }
 0x1dc   :  { %6371 = vst [vmem:[#allocation44_spill] sm:$0xff] %v4623_v8  ;;  %v450_v8 = vadd.f32 %v449_v27, %v207_v62 }
 0x1dd   :  { %6373 = vst [vmem:[#allocation45_spill] sm:$0xff] %v4626_v51  ;;  %v296_v51 = vadd.f32 %v295_v5, %v207_v62  ;;  %v6386_v5 = vperm.slane %v6336_v3, 2  ;;  %v6389_v62 = vperm.slane %v6336_v3, 5 }
 0x1de   :  { %6378 = vst [vmem:[#allocation46_spill] sm:$0xff] %v4637_v59  ;;  %v6393_v59 = vld [vmem:[#allocation60_spill] sm:$0xff] }
 0x1df   :  { %6380 = vst [vmem:[#allocation47_spill] sm:$0xff] %v4640_v55  ;;  %v975_v36 = vmul.f32 %v6384_v11, %v296_v51  ;;  %v1127_v35 = vmul.f32 %v6385_v40, %v296_v51  ;;  %v1279_v25 = vmul.f32 %v6386_v5, %v296_v51  ;;  %v1431_v27 = vmul.f32 %v6387_v34, %v296_v51  ;;  %v6392_v55 = vld [vmem:[#allocation40_spill] sm:$0xff] }
 0x1e0   :  { %6382 = vst [vmem:[#allocation72_spill] sm:$0xff] %v4643_v23  ;;  %v1583_v2 = vmul.f32 %v6388_v4, %v296_v51  ;;  %v1735_v56 = vmul.f32 %v6389_v62, %v296_v51  ;;  %v1887_v63 = vmul.f32 %v6390_v44, %v296_v51  ;;  %v6391_v11 = vperm.slane %v6336_v3, 7  ;;  %v6394_v3 = vld [vmem:[#allocation22_spill] sm:$0xff] }
 0x1e1   :  { %v4669_v40 = vadd.f32 %v975_v36, %v4302_v41  ;;  %v4672_v5 = vadd.f32 %v1127_v35, %v4305_v15  ;;  %v4675_v34 = vadd.f32 %v1279_v25, %v4308_v32  ;;  %v4678_v4 = vadd.f32 %v1431_v27, %v4313_v42  ;;  %v6395_v41 = vld [vmem:[#allocation61_spill] sm:$0xff] }
 0x1e2   :  { %v2039_v23 = vmul.f32 %v6391_v11, %v296_v51  ;;  %v4681_v62 = vadd.f32 %v1583_v2, %v6392_v55  ;;  %v4684_v44 = vadd.f32 %v1735_v56, %v6393_v59  ;;  %v4687_v51 = vadd.f32 %v1887_v63, %v6394_v3 }
 0x1e3   :  { %v6396_v15 = vperm.slane %v6339_v29, 0  ;;  %v6397_v32 = vperm.slane %v6339_v29, 1  ;;  %v6398_v42 = vperm.slane %v6339_v29, 2  ;;  %v6399_v55 = vperm.slane %v6339_v29, 3 }
 0x1e4   :  { %v4690_v36 = vadd.f32 %v2039_v23, %v6395_v41  ;;  %v6400_v59 = vperm.slane %v6339_v29, 4  ;;  %v6401_v63 = vperm.slane %v6339_v29, 5  ;;  %v6402_v23 = vperm.slane %v6339_v29, 6 }
 0x1e5   :  { %v976_v35 = vmul.f32 %v6396_v15, %v373_v17  ;;  %v1128_v25 = vmul.f32 %v6397_v32, %v373_v17  ;;  %v1280_v27 = vmul.f32 %v6398_v42, %v373_v17  ;;  %v1432_v2 = vmul.f32 %v6399_v55, %v373_v17 }
 0x1e6   :  { %v1584_v56 = vmul.f32 %v6400_v59, %v373_v17  ;;  %v1736_v11 = vmul.f32 %v6401_v63, %v373_v17  ;;  %v1888_v3 = vmul.f32 %v6402_v23, %v373_v17  ;;  %v6403_v41 = vperm.slane %v6339_v29, 7 }
 0x1e7   :  { %v4709_v32 = vadd.f32 %v976_v35, %v4342_v16  ;;  %v4712_v42 = vadd.f32 %v1128_v25, %v4345_v21  ;;  %v4715_v55 = vadd.f32 %v1280_v27, %v4348_v58  ;;  %v4718_v59 = vadd.f32 %v1432_v2, %v4353_v48 }
 0x1e8   :  { %v2040_v15 = vmul.f32 %v6403_v41, %v373_v17  ;;  %v4721_v63 = vadd.f32 %v1584_v56, %v4356_v39  ;;  %v4724_v23 = vadd.f32 %v1736_v11, %v4359_v53  ;;  %v4727_v29 = vadd.f32 %v1888_v3, %v4362_v24 }
 0x1e9   :  { %v6404_v21 = vperm.slane %v6349_v46, 0  ;;  %v6405_v58 = vperm.slane %v6349_v46, 1  ;;  %v6406_v48 = vperm.slane %v6349_v46, 2  ;;  %v6407_v39 = vperm.slane %v6349_v46, 3 }
 0x1ea   :  { %v4730_v16 = vadd.f32 %v2040_v15, %v4365_v18  ;;  %v6408_v53 = vperm.slane %v6349_v46, 4  ;;  %v6409_v24 = vperm.slane %v6349_v46, 5  ;;  %v6410_v18 = vperm.slane %v6349_v46, 6 }
 0x1eb   :  { %v977_v17 = vmul.f32 %v6404_v21, %v450_v8  ;;  %v1129_v35 = vmul.f32 %v6405_v58, %v450_v8  ;;  %v1281_v25 = vmul.f32 %v6406_v48, %v450_v8  ;;  %v1433_v27 = vmul.f32 %v6407_v39, %v450_v8 }
 0x1ec   :  { %v1585_v2 = vmul.f32 %v6408_v53, %v450_v8  ;;  %v1737_v56 = vmul.f32 %v6409_v24, %v450_v8  ;;  %v1889_v11 = vmul.f32 %v6410_v18, %v450_v8  ;;  %v6411_v3 = vperm.slane %v6349_v46, 7 }
 0x1ed   :  { %v4749_v15 = vadd.f32 %v977_v17, %v4382_v20  ;;  %v4752_v21 = vadd.f32 %v1129_v35, %v4385_v37  ;;  %v4755_v58 = vadd.f32 %v1281_v25, %v4388_v61  ;;  %v4758_v48 = vadd.f32 %v1433_v27, %v4393_v14 }
 0x1ee   :  { %v2041_v41 = vmul.f32 %v6411_v3, %v450_v8  ;;  %v4761_v39 = vadd.f32 %v1585_v2, %v4396_v60  ;;  %v4764_v53 = vadd.f32 %v1737_v56, %v4399_v54  ;;  %v4767_v46 = vadd.f32 %v1889_v11, %v4402_v45 }
 0x1ef   :  { %v6412_v37 = vperm.slane %v6367_v57, 0  ;;  %v6413_v61 = vperm.slane %v6367_v57, 1  ;;  %v6414_v14 = vperm.slane %v6367_v57, 2  ;;  %v6415_v60 = vperm.slane %v6367_v57, 3 }
 0x1f0   :  { %v4770_v20 = vadd.f32 %v2041_v41, %v4405_v10  ;;  %v6416_v54 = vperm.slane %v6367_v57, 4  ;;  %v6417_v45 = vperm.slane %v6367_v57, 5  ;;  %v6418_v10 = vperm.slane %v6367_v57, 6 }
 0x1f1   :  { %v978_v8 = vmul.f32 %v6412_v37, %v527_v28  ;;  %v1130_v17 = vmul.f32 %v6413_v61, %v527_v28  ;;  %v1282_v35 = vmul.f32 %v6414_v14, %v527_v28  ;;  %v1434_v25 = vmul.f32 %v6415_v60, %v527_v28 }
 0x1f2   :  { %v1586_v27 = vmul.f32 %v6416_v54, %v527_v28  ;;  %v1738_v2 = vmul.f32 %v6417_v45, %v527_v28  ;;  %v1890_v24 = vmul.f32 %v6418_v10, %v527_v28  ;;  %v6419_v56 = vperm.slane %v6367_v57, 7 }
 0x1f3   :  { %v4789_v11 = vadd.f32 %v978_v8, %v4422_v47  ;;  %v4792_v3 = vadd.f32 %v1130_v17, %v4425_v50  ;;  %v4795_v41 = vadd.f32 %v1282_v35, %v4428_v1  ;;  %v4798_v37 = vadd.f32 %v1434_v25, %v4435_v12  ;;  %v375_v35 = vpop.f32.mrf.mxu1 }
 0x1f4   :  { %v2042_v18 = vmul.f32 %v6419_v56, %v527_v28  ;;  %v4801_v61 = vadd.f32 %v1586_v27, %v4438_v6  ;;  %v4804_v14 = vadd.f32 %v1738_v2, %v4441_v0  ;;  %v4807_v28 = vadd.f32 %v1890_v24, %v4444_v7 }
 0x1f5   :  { %v6420_v50 = vperm.slane %v6383_v19, 0  ;;  %v6421_v12 = vperm.slane %v6383_v19, 1  ;;  %v6001_v6 = vperm.slane %v6383_v19, 2  ;;  %v5999_v8 = vperm.slane %v6383_v19, 3 }
 0x1f6   :  { %v4810_v47 = vadd.f32 %v2042_v18, %v4447_v33  ;;  %v5998_v0 = vperm.slane %v6383_v19, 4  ;;  %v5997_v7 = vperm.slane %v6383_v19, 5  ;;  %v5994_v17 = vperm.slane %v6383_v19, 6  ;;  %v6425_v18 = vld [vmem:[#allocation18_spill] sm:$0xff] }
 0x1f7   :  { %v991_v1 = vmul.f32 %v6420_v50, %v4648_v31  ;;  %v1143_v57 = vmul.f32 %v6421_v12, %v4648_v31  ;;  %v5995_v33 = vperm.slane %v6383_v19, 7  ;;  %v1295_v54 = vmul.f32 %v6001_v6, %v4648_v31  ;;  %v6436_v6 = vld [vmem:[#allocation63_spill] sm:$0xff] }
 0x1f8   :  { %v1447_v27 = vmul.f32 %v5999_v8, %v4648_v31  ;;  %v1599_v45 = vmul.f32 %v5998_v0, %v4648_v31  ;;  %v376_v56 = vadd.f32 %v375_v35, %v4645_v43  ;;  %v5996_v50 = vperm.slane %v6425_v18, 0 }
 0x1f9   :  { %v4825_v60 = vadd.f32 %v991_v1, %v4471_v22  ;;  %v4828_v25 = vadd.f32 %v1143_v57, %v4474_v9  ;;  %v1751_v22 = vmul.f32 %v5997_v7, %v4648_v31  ;;  %v1903_v9 = vmul.f32 %v5994_v17, %v4648_v31  ;;  %v6428_v57 = vld [vmem:[#allocation16_spill] sm:$0xff] }
 0x1fa   :  { %v2055_v2 = vmul.f32 %v5995_v33, %v4648_v31  ;;  %v4849_v10 = vadd.f32 %v1295_v54, %v4481_v26  ;;  %v4852_v24 = vadd.f32 %v1447_v27, %v4484_v49  ;;  %v4857_v1 = vadd.f32 %v1599_v45, %v4487_v38  ;;  %v6430_v31 = vld [vmem:[#allocation24_spill] sm:$0xff] }
 0x1fb   :  { %6422 = vst [vmem:[#allocation73_spill] sm:$0xff] %v4828_v25  ;;  %v4860_v12 = vadd.f32 %v1751_v22, %v4490_v52  ;;  %v4863_v17 = vadd.f32 %v1903_v9, %v6428_v57  ;;  %v992_v26 = vmul.f32 %v5996_v50, %v376_v56  ;;  %v6000_v49 = vperm.slane %v6425_v18, 1  ;;  %v452_v22 = vpop.f32.mrf.mxu2  ;;  %v6432_v9 = vld [vmem:[#allocation62_spill] sm:$0xff]  ;;  %v6462_v25 = vld [vmem:[#allocation48_spill] sm:$0xff] }
 0x1fc   :  { %6423 = vst [vmem:[#allocation74_spill] sm:$0xff] %v4849_v10  ;;  %v4866_v33 = vadd.f32 %v2055_v2, %v6430_v31  ;;  %v6002_v35 = vperm.slane %v6425_v18, 2  ;;  %v6003_v54 = vperm.slane %v6425_v18, 3  ;;  %v6004_v38 = vperm.slane %v6425_v18, 4  ;;  %v6460_v10 = vld [vmem:[#allocation71_spill] sm:$0xff] }
 0x1fd   :  { %6424 = vst [vmem:[#allocation9_spill] sm:$0xff] %v4852_v24  ;;  %v6005_v52 = vperm.slane %v6425_v18, 5  ;;  %v6006_v27 = vperm.slane %v6425_v18, 6  ;;  %v6007_v45 = vperm.slane %v6425_v18, 7  ;;  %v4878_v2 = vadd.f32 %v992_v26, %v6432_v9  ;;  %v6434_v9 = vld [vmem:[#allocation26_spill] sm:$0xff]  ;;  %v6458_v24 = vld [vmem:[#allocation35_spill] sm:$0xff] }
 0x1fe   :  { %6426 = vst [vmem:[#allocation75_spill] sm:$0xff] %v4857_v1  ;;  %v1144_v57 = vmul.f32 %v6000_v49, %v376_v56  ;;  %v1296_v31 = vmul.f32 %v6002_v35, %v376_v56  ;;  %v1448_v50 = vmul.f32 %v6003_v54, %v376_v56  ;;  %v1600_v7 = vmul.f32 %v6004_v38, %v376_v56 }
 0x1ff   :  { %6427 = vst [vmem:[#allocation76_spill] sm:$0xff] %v4860_v12  ;;  %v1752_v0 = vmul.f32 %v6005_v52, %v376_v56  ;;  %v1904_v8 = vmul.f32 %v6006_v27, %v376_v56  ;;  %v2056_v26 = vmul.f32 %v6007_v45, %v376_v56  ;;  %v453_v38 = vadd.f32 %v452_v22, %v4645_v43  ;;  %v6442_v52 = vld [vmem:[#allocation30_spill] sm:$0xff]  ;;  %v6444_v27 = vld [vmem:[#allocation67_spill] sm:$0xff]  ;;  %v6446_v56 = vld [vmem:[#allocation32_spill] sm:$0xff] }
 0x200   :  { %6429 = vst [vmem:[#allocation77_spill] sm:$0xff] %v4863_v17  ;;  %v4895_v49 = vadd.f32 %v1144_v57, %v6434_v9  ;;  %v4898_v35 = vadd.f32 %v1296_v31, %v6436_v6  ;;  %v6448_v9 = vld [vmem:[#allocation37_spill] sm:$0xff] }
 0x201   :  { %6431 = vst [vmem:[#allocation78_spill] sm:$0xff] %v4866_v33  ;;  %v6440_v33 = vld [vmem:[#allocation65_spill] sm:$0xff]  ;;  %v4908_v12 = vadd.f32 %v1752_v0, %v6442_v52  ;;  %v4911_v1 = vadd.f32 %v1904_v8, %v6444_v27  ;;  %v4914_v57 = vadd.f32 %v2056_v26, %v6446_v56  ;;  %v6008_v6 = vperm.slane %v6448_v9, 0 }
 0x202   :  { %6433 = vst [vmem:[#allocation79_spill] sm:$0xff] %v4878_v2  ;;  %v6438_v2 = vld [vmem:[#allocation28_spill] sm:$0xff]  ;;  %v4905_v17 = vadd.f32 %v1600_v7, %v6440_v33  ;;  %v6009_v31 = vperm.slane %v6448_v9, 1  ;;  %v6011_v22 = vperm.slane %v6448_v9, 3  ;;  %v301_v7 = vpop.f32.mrf.mxu0  ;;  %v6012_v33 = vperm.slane %v6448_v9, 4 }
 0x203   :  { %6435 = vst [vmem:[#allocation15_spill] sm:$0xff] %v4895_v49  ;;  %v4901_v54 = vadd.f32 %v1448_v50, %v6438_v2  ;;  %v6010_v50 = vperm.slane %v6448_v9, 2  ;;  %v529_v2 = vpop.f32.mrf.mxu3  ;;  %v6013_v0 = vperm.slane %v6448_v9, 5  ;;  %v993_v27 = vmul.f32 %v6008_v6, %v453_v38  ;;  %v6456_v49 = vld [vmem:[#allocation70_spill] sm:$0xff] }
 0x204   :  { %6437 = vst [vmem:[#allocation80_spill] sm:$0xff] %v4898_v35  ;;  %v1145_v26 = vmul.f32 %v6009_v31, %v453_v38  ;;  %v1449_v45 = vmul.f32 %v6011_v22, %v453_v38  ;;  %v6449_v52 = vperm.slane %v6448_v9, 6  ;;  %v6450_v6 = vperm.slane %v6448_v9, 7  ;;  %v6454_v35 = vld [vmem:[#allocation41_spill] sm:$0xff] }
 0x205   :  { %6439 = vst [vmem:[#allocation81_spill] sm:$0xff] %v4901_v54  ;;  %v1297_v56 = vmul.f32 %v6010_v50, %v453_v38  ;;  %v1753_v8 = vmul.f32 %v6013_v0, %v453_v38  ;;  %v6452_v54 = vld [vmem:[#allocation69_spill] sm:$0xff] }
 0x206   :  { %6441 = vst [vmem:[#allocation64_spill] sm:$0xff] %v4905_v17  ;;  %v6451_v17 = vld [vmem:[#allocation34_spill] sm:$0xff]  ;;  %v4944_v50 = vadd.f32 %v1145_v26, %v6452_v54  ;;  %v530_v54 = vadd.f32 %v529_v2, %v4645_v43 }
 0x207   :  { %6443 = vst [vmem:[#allocation66_spill] sm:$0xff] %v4908_v12  ;;  %v2057_v12 = vmul.f32 %v6450_v6, %v453_v38  ;;  %v4941_v31 = vadd.f32 %v993_v27, %v6451_v17  ;;  %v4947_v22 = vadd.f32 %v1297_v56, %v6454_v35  ;;  %v6464_v17 = vld [vmem:[#allocation42_spill] sm:$0xff] }
 0x208   :  { %6445 = vst [vmem:[#allocation68_spill] sm:$0xff] %v4911_v1  ;;  %v1905_v1 = vmul.f32 %v6449_v52, %v453_v38  ;;  %v4956_v52 = vadd.f32 %v1753_v8, %v6460_v10  ;;  %v6466_v27 = vld [vmem:[#allocation50_spill] sm:$0xff] }
 0x209   :  { %6447 = vst [vmem:[#allocation82_spill] sm:$0xff] %v4914_v57  ;;  %v1601_v57 = vmul.f32 %v6012_v33, %v453_v38  ;;  %v4950_v33 = vadd.f32 %v1449_v45, %v6456_v49  ;;  %v4962_v6 = vadd.f32 %v2057_v12, %v6464_v17  ;;  %v6014_v35 = vperm.slane %v6466_v27, 0 }
 0x20a   :  { %6453 = vst [vmem:[#allocation83_spill] sm:$0xff] %v4944_v50  ;;  %v4959_v38 = vadd.f32 %v1905_v1, %v6462_v25  ;;  %v6015_v26 = vperm.slane %v6466_v27, 1  ;;  %v6016_v49 = vperm.slane %v6466_v27, 2  ;;  %v6018_v45 = vperm.slane %v6466_v27, 4 }
 0x20b   :  { %6455 = vst [vmem:[#allocation11_spill] sm:$0xff] %v4947_v22  ;;  %v4953_v0 = vadd.f32 %v1601_v57, %v6458_v24  ;;  %v6017_v24 = vperm.slane %v6466_v27, 3  ;;  %v6019_v10 = vperm.slane %v6466_v27, 5  ;;  %v6020_v25 = vperm.slane %v6466_v27, 6  ;;  %v6471_v57 = vld [vmem:[#allocation45_spill] sm:$0xff]  ;;  %v304_v22 = vpop.f32.mrf.mxu0 }
 0x20c   :  { %6457 = vst [vmem:[#allocation17_spill] sm:$0xff] %v4950_v33  ;;  %v994_v1 = vmul.f32 %v6014_v35, %v530_v54  ;;  %v1146_v43 = vmul.f32 %v6015_v26, %v530_v54  ;;  %v1298_v12 = vmul.f32 %v6016_v49, %v530_v54  ;;  %v1602_v8 = vmul.f32 %v6018_v45, %v530_v54  ;;  %v378_v35 = vpop.f32.mrf.mxu1  ;;  %v6467_v26 = vld [vmem:[#allocation43_spill] sm:$0xff]  ;;  %v6469_v49 = vld [vmem:[#allocation44_spill] sm:$0xff]  ;;  %v532_v33 = vpop.f32.mrf.mxu3 }
 0x20d   :  { %6459 = vst [vmem:[#allocation36_spill] sm:$0xff] %v4953_v0  ;;  %v1450_v2 = vmul.f32 %v6017_v24, %v530_v54  ;;  %v1754_v56 = vmul.f32 %v6019_v10, %v530_v54  ;;  %v1906_v17 = vmul.f32 %v6020_v25, %v530_v54  ;;  %v6473_v24 = vperm.slane %v6466_v27, 7  ;;  %v217_v10 = vpop.permute.xlu0 %216 }
 0x20e   :  { %6461 = vst [vmem:[#allocation21_spill] sm:$0xff] %v4956_v52  ;;  %v4991_v52 = vadd.f32 %v1146_v43, %v6469_v49  ;;  %v4994_v0 = vadd.f32 %v1298_v12, %v6471_v57  ;;  %v5002_v25 = vadd.f32 %v1602_v8, %v4634_v13  ;;  %v6475_v49 = vld [vmem:[#allocation47_spill] sm:$0xff]  ;;  %v5010_v12 = vpop.permute.xlu1 %221  ;;  %v6476_v57 = vld [vmem:[#allocation72_spill] sm:$0xff]  ;;  %v6478_v13 = vld [vmem:[#allocation13_spill] sm:$0xff]  ;;  %v6485_v8 = vperm.slane %v6383_v19, 6 }
 0x20f   :  { %6463 = vst [vmem:[#allocation53_spill] sm:$0xff] %v4959_v38  ;;  %v4988_v38 = vadd.f32 %v994_v1, %v6467_v26  ;;  %v2058_v45 = vmul.f32 %v6473_v24, %v530_v54  ;;  %v4999_v50 = vadd.f32 %v1450_v2, %v4631_v30  ;;  %v6474_v26 = vld [vmem:[#allocation46_spill] sm:$0xff]  ;;  %v5008_v43 = vadd.f32 %v1906_v17, %v6475_v49 }
 0x210   :  { %6465 = vst [vmem:[#allocation10_spill] sm:$0xff] %v4962_v6  ;;  %v455_v6 = vpop.f32.mrf.mxu2  ;;  %v5005_v1 = vadd.f32 %v1754_v56, %v6474_v26  ;;  %v302_v54 = vadd.f32 %v301_v7, %v217_v10  ;;  %v379_v24 = vadd.f32 %v378_v35, %v217_v10  ;;  %v5016_v30 = vadd.f32 %v304_v22, %v5010_v12 }
 0x211   :  { %6468 = vst [vmem:[#allocation23_spill] sm:$0xff] %v4988_v38  ;;  %v533_v38 = vadd.f32 %v532_v33, %v217_v10  ;;  %v6479_v56 = vperm.slane %v6383_v19, 0  ;;  %v6480_v26 = vperm.slane %v6383_v19, 1  ;;  %v6482_v7 = vperm.slane %v6383_v19, 3 }
 0x212   :  { %6470 = vst [vmem:[#allocation54_spill] sm:$0xff] %v4991_v52  ;;  %v456_v52 = vadd.f32 %v455_v6, %v217_v10  ;;  %v6483_v33 = vperm.slane %v6383_v19, 4  ;;  %v6484_v35 = vperm.slane %v6383_v19, 5  ;;  %v1907_v2 = vmul.f32 %v6485_v8, %v302_v54 }
 0x213   :  { %6472 = vst [vmem:[#allocation25_spill] sm:$0xff] %v4994_v0  ;;  %v5013_v0 = vadd.f32 %v2058_v45, %v6476_v57  ;;  %v995_v17 = vmul.f32 %v6479_v56, %v302_v54  ;;  %v1147_v49 = vmul.f32 %v6480_v26, %v302_v54  ;;  %v6481_v45 = vperm.slane %v6383_v19, 2 }
 0x214   :  { %v1451_v6 = vmul.f32 %v6482_v7, %v302_v54  ;;  %v1603_v22 = vmul.f32 %v6483_v33, %v302_v54  ;;  %v1755_v10 = vmul.f32 %v6484_v35, %v302_v54  ;;  %v6486_v56 = vperm.slane %v6383_v19, 7 }
 0x215   :  { %6477 = vst [vmem:[#allocation55_spill] sm:$0xff] %v5013_v0  ;;  %v1299_v57 = vmul.f32 %v6481_v45, %v302_v54  ;;  %v5037_v26 = vadd.f32 %v995_v17, %v4669_v40  ;;  %v5040_v45 = vadd.f32 %v1147_v49, %v4672_v5  ;;  %v5055_v19 = vadd.f32 %v1907_v2, %v4687_v51 }
 0x216   :  { %v2059_v0 = vmul.f32 %v6486_v56, %v302_v54  ;;  %v5046_v33 = vadd.f32 %v1451_v6, %v4678_v4  ;;  %v5049_v35 = vadd.f32 %v1603_v22, %v4681_v62  ;;  %v5052_v8 = vadd.f32 %v1755_v10, %v4684_v44 }
 0x217   :  { %v5043_v7 = vadd.f32 %v1299_v57, %v4675_v34  ;;  %v6487_v5 = vperm.slane %v6425_v18, 0  ;;  %v6488_v34 = vperm.slane %v6425_v18, 1  ;;  %v6489_v4 = vperm.slane %v6425_v18, 2 }
 0x218   :  { %v5058_v40 = vadd.f32 %v2059_v0, %v4690_v36  ;;  %v6490_v62 = vperm.slane %v6425_v18, 3  ;;  %v6491_v44 = vperm.slane %v6425_v18, 4  ;;  %v6492_v51 = vperm.slane %v6425_v18, 5 }
 0x219   :  { %v996_v54 = vmul.f32 %v6487_v5, %v379_v24  ;;  %v1148_v17 = vmul.f32 %v6488_v34, %v379_v24  ;;  %v1300_v49 = vmul.f32 %v6489_v4, %v379_v24  ;;  %v6493_v36 = vperm.slane %v6425_v18, 6 }
 0x21a   :  { %v1452_v57 = vmul.f32 %v6490_v62, %v379_v24  ;;  %v1604_v6 = vmul.f32 %v6491_v44, %v379_v24  ;;  %v1756_v2 = vmul.f32 %v6492_v51, %v379_v24  ;;  %v6494_v22 = vperm.slane %v6425_v18, 7 }
 0x21b   :  { %v1908_v0 = vmul.f32 %v6493_v36, %v379_v24  ;;  %v5077_v56 = vadd.f32 %v996_v54, %v4709_v32  ;;  %v5080_v5 = vadd.f32 %v1148_v17, %v4712_v42  ;;  %v5083_v34 = vadd.f32 %v1300_v49, %v4715_v55 }
 0x21c   :  { %v2060_v10 = vmul.f32 %v6494_v22, %v379_v24  ;;  %v5086_v4 = vadd.f32 %v1452_v57, %v4718_v59  ;;  %v5089_v62 = vadd.f32 %v1604_v6, %v4721_v63  ;;  %v5092_v44 = vadd.f32 %v1756_v2, %v4724_v23 }
 0x21d   :  { %v5095_v18 = vadd.f32 %v1908_v0, %v4727_v29  ;;  %v6495_v42 = vperm.slane %v6448_v9, 0  ;;  %v6496_v55 = vperm.slane %v6448_v9, 1  ;;  %v6497_v59 = vperm.slane %v6448_v9, 2 }
 0x21e   :  { %v5098_v32 = vadd.f32 %v2060_v10, %v4730_v16  ;;  %v6498_v63 = vperm.slane %v6448_v9, 3  ;;  %v6499_v23 = vperm.slane %v6448_v9, 4  ;;  %v6500_v29 = vperm.slane %v6448_v9, 5 }
 0x21f   :  { %v997_v24 = vmul.f32 %v6495_v42, %v456_v52  ;;  %v1149_v54 = vmul.f32 %v6496_v55, %v456_v52  ;;  %v1301_v17 = vmul.f32 %v6497_v59, %v456_v52  ;;  %v6501_v16 = vperm.slane %v6448_v9, 6 }
 0x220   :  { %v1453_v49 = vmul.f32 %v6498_v63, %v456_v52  ;;  %v1605_v57 = vmul.f32 %v6499_v23, %v456_v52  ;;  %v1757_v6 = vmul.f32 %v6500_v29, %v456_v52  ;;  %v6502_v2 = vperm.slane %v6448_v9, 7 }
 0x221   :  { %v1909_v51 = vmul.f32 %v6501_v16, %v456_v52  ;;  %v5117_v0 = vadd.f32 %v997_v24, %v4749_v15  ;;  %v5120_v22 = vadd.f32 %v1149_v54, %v4752_v21  ;;  %v5123_v10 = vadd.f32 %v1301_v17, %v4755_v58 }
 0x222   :  { %v2061_v36 = vmul.f32 %v6502_v2, %v456_v52  ;;  %v5126_v42 = vadd.f32 %v1453_v49, %v4758_v48  ;;  %v5129_v55 = vadd.f32 %v1605_v57, %v4761_v39  ;;  %v5132_v59 = vadd.f32 %v1757_v6, %v4764_v53 }
 0x223   :  { %v5135_v9 = vadd.f32 %v1909_v51, %v4767_v46  ;;  %v6503_v21 = vperm.slane %v6466_v27, 0  ;;  %v6504_v58 = vperm.slane %v6466_v27, 1  ;;  %v6505_v48 = vperm.slane %v6466_v27, 2 }
 0x224   :  { %v5138_v15 = vadd.f32 %v2061_v36, %v4770_v20  ;;  %v6506_v39 = vperm.slane %v6466_v27, 3  ;;  %v6507_v53 = vperm.slane %v6466_v27, 4  ;;  %v6508_v46 = vperm.slane %v6466_v27, 5 }
 0x225   :  { %v998_v52 = vmul.f32 %v6503_v21, %v533_v38  ;;  %v1150_v24 = vmul.f32 %v6504_v58, %v533_v38  ;;  %v1302_v54 = vmul.f32 %v6505_v48, %v533_v38  ;;  %v6509_v20 = vperm.slane %v6466_v27, 6 }
 0x226   :  { %v1454_v17 = vmul.f32 %v6506_v39, %v533_v38  ;;  %v1606_v63 = vmul.f32 %v6507_v53, %v533_v38  ;;  %v1758_v49 = vmul.f32 %v6508_v46, %v533_v38  ;;  %v6510_v57 = vperm.slane %v6466_v27, 7 }
 0x227   :  { %v1910_v23 = vmul.f32 %v6509_v20, %v533_v38  ;;  %v5157_v6 = vadd.f32 %v998_v52, %v4789_v11  ;;  %v5160_v16 = vadd.f32 %v1150_v24, %v4792_v3  ;;  %v5163_v51 = vadd.f32 %v1302_v54, %v4795_v41  ;;  %v381_v24 = vpop.f32.mrf.mxu1  ;;  %v6515_v54 = vld [vmem:[#allocation73_spill] sm:$0xff]  ;;  %v6517_v20 = vld [vmem:[#allocation74_spill] sm:$0xff] }
 0x228   :  { %v2062_v29 = vmul.f32 %v6510_v57, %v533_v38  ;;  %v5166_v2 = vadd.f32 %v1454_v17, %v4798_v37  ;;  %v5169_v36 = vadd.f32 %v1606_v63, %v4801_v61  ;;  %v5172_v21 = vadd.f32 %v1758_v49, %v4804_v14  ;;  %v6519_v57 = vld [vmem:[#allocation9_spill] sm:$0xff] }
 0x229   :  { %v5175_v38 = vadd.f32 %v1910_v23, %v4807_v28  ;;  %v6512_v3 = vperm.slane %v6478_v13, 0  ;;  %v6513_v37 = vperm.slane %v6478_v13, 1  ;;  %v6027_v61 = vperm.slane %v6478_v13, 2 }
 0x22a   :  { %v5178_v11 = vadd.f32 %v2062_v29, %v4810_v47  ;;  %v6024_v52 = vperm.slane %v6478_v13, 3  ;;  %v6022_v14 = vperm.slane %v6478_v13, 4  ;;  %v6021_v28 = vperm.slane %v6478_v13, 5 }
 0x22b   :  { %v1011_v41 = vmul.f32 %v6512_v3, %v5016_v30  ;;  %v1163_v27 = vmul.f32 %v6513_v37, %v5016_v30  ;;  %v6023_v58 = vperm.slane %v6478_v13, 6  ;;  %v6025_v47 = vperm.slane %v6478_v13, 7 }
 0x22c   :  { %6511 = vst [vmem:[#allocation49_spill] sm:$0xff] %v5178_v11  ;;  %v1315_v17 = vmul.f32 %v6027_v61, %v5016_v30  ;;  %v1467_v53 = vmul.f32 %v6024_v52, %v5016_v30  ;;  %v1619_v63 = vmul.f32 %v6022_v14, %v5016_v30  ;;  %v382_v3 = vadd.f32 %v381_v24, %v5010_v12  ;;  %v6561_v11 = vld [vmem:[#allocation53_spill] sm:$0xff] }
 0x22d   :  { %v5193_v48 = vadd.f32 %v1011_v41, %v4825_v60  ;;  %v5196_v39 = vadd.f32 %v1163_v27, %v6515_v54  ;;  %v1771_v60 = vmul.f32 %v6021_v28, %v5016_v30  ;;  %v1923_v46 = vmul.f32 %v6023_v58, %v5016_v30  ;;  %v6521_v41 = vld [vmem:[#allocation19_spill] sm:$0xff]  ;;  %v6524_v28 = vld [vmem:[#allocation76_spill] sm:$0xff]  ;;  %v6526_v58 = vld [vmem:[#allocation77_spill] sm:$0xff] }
 0x22e   :  { %v2075_v49 = vmul.f32 %v6025_v47, %v5016_v30  ;;  %v5217_v23 = vadd.f32 %v1315_v17, %v6517_v20  ;;  %v5220_v29 = vadd.f32 %v1467_v53, %v6519_v57  ;;  %v6026_v37 = vperm.slane %v6521_v41, 0  ;;  %v6522_v27 = vld [vmem:[#allocation75_spill] sm:$0xff]  ;;  %v6528_v30 = vld [vmem:[#allocation78_spill] sm:$0xff] }
 0x22f   :  { %6514 = vst [vmem:[#allocation27_spill] sm:$0xff] %v5193_v48  ;;  %v5225_v54 = vadd.f32 %v1619_v63, %v6522_v27  ;;  %v5228_v14 = vadd.f32 %v1771_v60, %v6524_v28  ;;  %v5231_v52 = vadd.f32 %v1923_v46, %v6526_v58  ;;  %v6028_v53 = vperm.slane %v6521_v41, 1  ;;  %v458_v46 = vpop.f32.mrf.mxu2  ;;  %v6559_v48 = vld [vmem:[#allocation21_spill] sm:$0xff] }
 0x230   :  { %6516 = vst [vmem:[#allocation56_spill] sm:$0xff] %v5196_v39  ;;  %v5234_v47 = vadd.f32 %v2075_v49, %v6528_v30  ;;  %v1012_v17 = vmul.f32 %v6026_v37, %v382_v3  ;;  %v6029_v24 = vperm.slane %v6521_v41, 2  ;;  %v6030_v20 = vperm.slane %v6521_v41, 3  ;;  %v6530_v49 = vld [vmem:[#allocation79_spill] sm:$0xff] }
 0x231   :  { %6518 = vst [vmem:[#allocation29_spill] sm:$0xff] %v5217_v23  ;;  %v6031_v63 = vperm.slane %v6521_v41, 4  ;;  %v6032_v28 = vperm.slane %v6521_v41, 5  ;;  %v1164_v27 = vmul.f32 %v6028_v53, %v382_v3  ;;  %v6532_v58 = vperm.slane %v6521_v41, 6 }
 0x232   :  { %6520 = vst [vmem:[#allocation57_spill] sm:$0xff] %v5220_v29  ;;  %v5246_v57 = vadd.f32 %v1012_v17, %v6530_v49  ;;  %v1316_v30 = vmul.f32 %v6029_v24, %v382_v3  ;;  %v1468_v37 = vmul.f32 %v6030_v20, %v382_v3  ;;  %v6533_v17 = vperm.slane %v6521_v41, 7 }
 0x233   :  { %6523 = vst [vmem:[#allocation31_spill] sm:$0xff] %v5225_v54  ;;  %v1620_v61 = vmul.f32 %v6031_v63, %v382_v3  ;;  %v1772_v60 = vmul.f32 %v6032_v28, %v382_v3  ;;  %v459_v63 = vadd.f32 %v458_v46, %v5010_v12  ;;  %v6540_v54 = vld [vmem:[#allocation64_spill] sm:$0xff]  ;;  %v6542_v28 = vld [vmem:[#allocation66_spill] sm:$0xff]  ;;  %v535_v46 = vpop.f32.mrf.mxu3 }
 0x234   :  { %6525 = vst [vmem:[#allocation58_spill] sm:$0xff] %v5228_v14  ;;  %v2076_v49 = vmul.f32 %v6533_v17, %v382_v3  ;;  %v6538_v14 = vld [vmem:[#allocation81_spill] sm:$0xff] }
 0x235   :  { %6527 = vst [vmem:[#allocation33_spill] sm:$0xff] %v5231_v52  ;;  %v6536_v52 = vld [vmem:[#allocation80_spill] sm:$0xff]  ;;  %v5269_v20 = vadd.f32 %v1468_v37, %v6538_v14  ;;  %v5273_v29 = vadd.f32 %v1620_v61, %v6540_v54  ;;  %v5276_v23 = vadd.f32 %v1772_v60, %v6542_v28  ;;  %v307_v61 = vpop.f32.mrf.mxu0 }
 0x236   :  { %6529 = vst [vmem:[#allocation59_spill] sm:$0xff] %v5234_v47  ;;  %v1924_v47 = vmul.f32 %v6532_v58, %v382_v3  ;;  %v5266_v24 = vadd.f32 %v1316_v30, %v6536_v52  ;;  %v6544_v58 = vld [vmem:[#allocation68_spill] sm:$0xff]  ;;  %v6546_v3 = vld [vmem:[#allocation82_spill] sm:$0xff] }
 0x237   :  { %6531 = vst [vmem:[#allocation12_spill] sm:$0xff] %v5246_v57  ;;  %v6534_v57 = vld [vmem:[#allocation15_spill] sm:$0xff] }
 0x238   :  { %v5263_v53 = vadd.f32 %v1164_v27, %v6534_v57  ;;  %6537 = vst [vmem:[#allocation60_spill] sm:$0xff] %v5266_v24  ;;  %v5279_v39 = vadd.f32 %v1924_v47, %v6544_v58  ;;  %v5282_v57 = vadd.f32 %v2076_v49, %v6546_v3  ;;  %v6548_v27 = vld [vmem:[#allocation38_spill] sm:$0xff]  ;;  %v6555_v24 = vld [vmem:[#allocation17_spill] sm:$0xff] }
 0x239   :  { %6539 = vst [vmem:[#allocation22_spill] sm:$0xff] %v5269_v20  ;;  %v6033_v52 = vperm.slane %v6548_v27, 0  ;;  %v6034_v30 = vperm.slane %v6548_v27, 1  ;;  %v6035_v14 = vperm.slane %v6548_v27, 2  ;;  %v6036_v37 = vperm.slane %v6548_v27, 3  ;;  %v6553_v20 = vld [vmem:[#allocation11_spill] sm:$0xff] }
 0x23a   :  { %6535 = vst [vmem:[#allocation40_spill] sm:$0xff] %v5263_v53  ;;  %v6037_v54 = vperm.slane %v6548_v27, 4  ;;  %v6038_v28 = vperm.slane %v6548_v27, 5  ;;  %v6549_v60 = vperm.slane %v6548_v27, 6  ;;  %v6557_v53 = vld [vmem:[#allocation36_spill] sm:$0xff] }
 0x23b   :  { %6541 = vst [vmem:[#allocation61_spill] sm:$0xff] %v5273_v29  ;;  %v1013_v17 = vmul.f32 %v6033_v52, %v459_v63  ;;  %v1165_v49 = vmul.f32 %v6034_v30, %v459_v63  ;;  %v1317_v58 = vmul.f32 %v6035_v14, %v459_v63  ;;  %v1469_v3 = vmul.f32 %v6036_v37, %v459_v63  ;;  %v6551_v29 = vld [vmem:[#allocation83_spill] sm:$0xff] }
 0x23c   :  { %6543 = vst [vmem:[#allocation18_spill] sm:$0xff] %v5276_v23  ;;  %v1773_v47 = vmul.f32 %v6038_v28, %v459_v63  ;;  %v6550_v52 = vperm.slane %v6548_v27, 7 }
 0x23d   :  { %6545 = vst [vmem:[#allocation16_spill] sm:$0xff] %v5279_v39  ;;  %v1925_v39 = vmul.f32 %v6549_v60, %v459_v63  ;;  %v5309_v30 = vadd.f32 %v1013_v17, %v4941_v31  ;;  %v5312_v14 = vadd.f32 %v1165_v49, %v6551_v29  ;;  %v5315_v37 = vadd.f32 %v1317_v58, %v6553_v20  ;;  %v6563_v31 = vld [vmem:[#allocation10_spill] sm:$0xff]  ;;  %v6565_v17 = vld [vmem:[#allocation51_spill] sm:$0xff] }
 0x23e   :  { %6547 = vst [vmem:[#allocation24_spill] sm:$0xff] %v5282_v57  ;;  %v1621_v57 = vmul.f32 %v6037_v54, %v459_v63  ;;  %v2077_v23 = vmul.f32 %v6550_v52, %v459_v63  ;;  %v5318_v54 = vadd.f32 %v1469_v3, %v6555_v24  ;;  %v5324_v60 = vadd.f32 %v1773_v47, %v6559_v48 }
 0x23f   :  { %6552 = vst [vmem:[#allocation62_spill] sm:$0xff] %v5312_v14  ;;  %v5327_v63 = vadd.f32 %v1925_v39, %v6561_v11  ;;  %v536_v29 = vadd.f32 %v535_v46, %v5010_v12  ;;  %v6039_v20 = vperm.slane %v6565_v17, 0  ;;  %v6040_v49 = vperm.slane %v6565_v17, 1  ;;  %v6568_v46 = vld [vmem:[#allocation25_spill] sm:$0xff] }
 0x240   :  { %6554 = vst [vmem:[#allocation26_spill] sm:$0xff] %v5315_v37  ;;  %v5321_v28 = vadd.f32 %v1621_v57, %v6557_v53  ;;  %v5330_v52 = vadd.f32 %v2077_v23, %v6563_v31  ;;  %v6041_v24 = vperm.slane %v6565_v17, 2  ;;  %v6042_v53 = vperm.slane %v6565_v17, 3  ;;  %v310_v37 = vpop.f32.mrf.mxu0 }
 0x241   :  { %6556 = vst [vmem:[#allocation63_spill] sm:$0xff] %v5318_v54  ;;  %v6043_v57 = vperm.slane %v6565_v17, 4  ;;  %v6044_v48 = vperm.slane %v6565_v17, 5  ;;  %v6045_v11 = vperm.slane %v6565_v17, 6  ;;  %v1014_v39 = vmul.f32 %v6039_v20, %v536_v29  ;;  %v384_v20 = vpop.f32.mrf.mxu1  ;;  %v538_v54 = vpop.f32.mrf.mxu3 }
 0x242   :  { %6558 = vst [vmem:[#allocation28_spill] sm:$0xff] %v5321_v28  ;;  %v1166_v12 = vmul.f32 %v6040_v49, %v536_v29  ;;  %v1318_v23 = vmul.f32 %v6041_v24, %v536_v29  ;;  %v1470_v47 = vmul.f32 %v6042_v53, %v536_v29  ;;  %v6566_v49 = vld [vmem:[#allocation23_spill] sm:$0xff]  ;;  %v6567_v24 = vld [vmem:[#allocation54_spill] sm:$0xff]  ;;  %v6570_v53 = vperm.slane %v6565_v17, 7 }
 0x243   :  { %6560 = vst [vmem:[#allocation65_spill] sm:$0xff] %v5324_v60  ;;  %v1622_v58 = vmul.f32 %v6043_v57, %v536_v29  ;;  %v1774_v3 = vmul.f32 %v6044_v48, %v536_v29  ;;  %v1926_v31 = vmul.f32 %v6045_v11, %v536_v29  ;;  %v227_v48 = vpop.permute.xlu2 %226 }
 0x244   :  { %6562 = vst [vmem:[#allocation30_spill] sm:$0xff] %v5327_v63  ;;  %v5356_v63 = vadd.f32 %v1014_v39, %v6566_v49  ;;  %v5359_v60 = vadd.f32 %v1166_v12, %v6567_v24  ;;  %v5362_v28 = vadd.f32 %v1318_v23, %v6568_v46  ;;  %v2078_v57 = vmul.f32 %v6570_v53, %v536_v29  ;;  %v5378_v39 = vpop.permute.xlu0 %231  ;;  %v6571_v12 = vld [vmem:[#allocation55_spill] sm:$0xff] }
 0x245   :  { %6564 = vst [vmem:[#allocation67_spill] sm:$0xff] %v5330_v52  ;;  %v461_v52 = vpop.f32.mrf.mxu2  ;;  %v5367_v14 = vadd.f32 %v1470_v47, %v4999_v50  ;;  %v5370_v11 = vadd.f32 %v1622_v58, %v5002_v25  ;;  %v5373_v49 = vadd.f32 %v1774_v3, %v5005_v1  ;;  %v5376_v24 = vadd.f32 %v1926_v31, %v5008_v43  ;;  %v6573_v25 = vld [vmem:[#allocation14_spill] sm:$0xff] }
 0x246   :  { %6569 = vst [vmem:[#allocation32_spill] sm:$0xff] %v5362_v28  ;;  %v5381_v23 = vadd.f32 %v2078_v57, %v6571_v12  ;;  %v308_v29 = vadd.f32 %v307_v61, %v227_v48  ;;  %v385_v53 = vadd.f32 %v384_v20, %v227_v48  ;;  %v462_v46 = vadd.f32 %v461_v52, %v227_v48 }
 0x247   :  { %v539_v28 = vadd.f32 %v538_v54, %v227_v48  ;;  %v5384_v50 = vadd.f32 %v310_v37, %v5378_v39  ;;  %v6574_v58 = vperm.slane %v6478_v13, 0  ;;  %v6575_v3 = vperm.slane %v6478_v13, 1 }
 0x248   :  { %6572 = vst [vmem:[#allocation37_spill] sm:$0xff] %v5381_v23  ;;  %v6576_v57 = vperm.slane %v6478_v13, 2  ;;  %v6577_v61 = vperm.slane %v6478_v13, 3  ;;  %v6578_v54 = vperm.slane %v6478_v13, 4  ;;  %v6579_v20 = vperm.slane %v6478_v13, 5 }
 0x249   :  { %v1015_v43 = vmul.f32 %v6574_v58, %v308_v29  ;;  %v1167_v31 = vmul.f32 %v6575_v3, %v308_v29  ;;  %v6580_v1 = vperm.slane %v6478_v13, 6  ;;  %v6581_v58 = vperm.slane %v6478_v13, 7 }
 0x24a   :  { %v1319_v12 = vmul.f32 %v6576_v57, %v308_v29  ;;  %v1471_v52 = vmul.f32 %v6577_v61, %v308_v29  ;;  %v1623_v37 = vmul.f32 %v6578_v54, %v308_v29  ;;  %v1775_v48 = vmul.f32 %v6579_v20, %v308_v29 }
 0x24b   :  { %v1927_v47 = vmul.f32 %v6580_v1, %v308_v29  ;;  %v2079_v23 = vmul.f32 %v6581_v58, %v308_v29  ;;  %v5405_v3 = vadd.f32 %v1015_v43, %v5037_v26  ;;  %v5408_v57 = vadd.f32 %v1167_v31, %v5040_v45 }
 0x24c   :  { %v5411_v61 = vadd.f32 %v1319_v12, %v5043_v7  ;;  %v5414_v54 = vadd.f32 %v1471_v52, %v5046_v33  ;;  %v5417_v20 = vadd.f32 %v1623_v37, %v5049_v35  ;;  %v5420_v1 = vadd.f32 %v1775_v48, %v5052_v8 }
 0x24d   :  { %v5423_v13 = vadd.f32 %v1927_v47, %v5055_v19  ;;  %v5426_v26 = vadd.f32 %v2079_v23, %v5058_v40  ;;  %v6582_v45 = vperm.slane %v6521_v41, 0  ;;  %v6583_v7 = vperm.slane %v6521_v41, 1 }
 0x24e   :  { %v6584_v33 = vperm.slane %v6521_v41, 2  ;;  %v6585_v35 = vperm.slane %v6521_v41, 3  ;;  %v6586_v8 = vperm.slane %v6521_v41, 4  ;;  %v6587_v19 = vperm.slane %v6521_v41, 5 }
 0x24f   :  { %v1016_v29 = vmul.f32 %v6582_v45, %v385_v53  ;;  %v1168_v43 = vmul.f32 %v6583_v7, %v385_v53  ;;  %v6588_v40 = vperm.slane %v6521_v41, 6  ;;  %v6589_v37 = vperm.slane %v6521_v41, 7 }
 0x250   :  { %v1320_v31 = vmul.f32 %v6584_v33, %v385_v53  ;;  %v1472_v12 = vmul.f32 %v6585_v35, %v385_v53  ;;  %v1624_v52 = vmul.f32 %v6586_v8, %v385_v53  ;;  %v1776_v47 = vmul.f32 %v6587_v19, %v385_v53 }
 0x251   :  { %v1928_v23 = vmul.f32 %v6588_v40, %v385_v53  ;;  %v2080_v48 = vmul.f32 %v6589_v37, %v385_v53  ;;  %v5445_v58 = vadd.f32 %v1016_v29, %v5077_v56  ;;  %v5448_v45 = vadd.f32 %v1168_v43, %v5080_v5 }
 0x252   :  { %v5451_v7 = vadd.f32 %v1320_v31, %v5083_v34  ;;  %v5454_v33 = vadd.f32 %v1472_v12, %v5086_v4  ;;  %v5457_v35 = vadd.f32 %v1624_v52, %v5089_v62  ;;  %v5460_v8 = vadd.f32 %v1776_v47, %v5092_v44 }
 0x253   :  { %v5463_v41 = vadd.f32 %v1928_v23, %v5095_v18  ;;  %v5466_v56 = vadd.f32 %v2080_v48, %v5098_v32  ;;  %v6590_v5 = vperm.slane %v6548_v27, 0  ;;  %v6591_v34 = vperm.slane %v6548_v27, 1 }
 0x254   :  { %v6592_v4 = vperm.slane %v6548_v27, 2  ;;  %v6593_v62 = vperm.slane %v6548_v27, 3  ;;  %v6594_v44 = vperm.slane %v6548_v27, 4  ;;  %v6595_v18 = vperm.slane %v6548_v27, 5 }
 0x255   :  { %v1017_v53 = vmul.f32 %v6590_v5, %v462_v46  ;;  %v1169_v29 = vmul.f32 %v6591_v34, %v462_v46  ;;  %v6596_v32 = vperm.slane %v6548_v27, 6  ;;  %v6597_v47 = vperm.slane %v6548_v27, 7 }
 0x256   :  { %v1321_v43 = vmul.f32 %v6592_v4, %v462_v46  ;;  %v1473_v31 = vmul.f32 %v6593_v62, %v462_v46  ;;  %v1625_v12 = vmul.f32 %v6594_v44, %v462_v46  ;;  %v1777_v52 = vmul.f32 %v6595_v18, %v462_v46 }
 0x257   :  { %v1929_v19 = vmul.f32 %v6596_v32, %v462_v46  ;;  %v2081_v40 = vmul.f32 %v6597_v47, %v462_v46  ;;  %v5485_v23 = vadd.f32 %v1017_v53, %v5117_v0  ;;  %v5488_v37 = vadd.f32 %v1169_v29, %v5120_v22 }
 0x258   :  { %v5491_v48 = vadd.f32 %v1321_v43, %v5123_v10  ;;  %v5494_v5 = vadd.f32 %v1473_v31, %v5126_v42  ;;  %v5497_v34 = vadd.f32 %v1625_v12, %v5129_v55  ;;  %v5500_v4 = vadd.f32 %v1777_v52, %v5132_v59 }
 0x259   :  { %v5503_v27 = vadd.f32 %v1929_v19, %v5135_v9  ;;  %v5506_v0 = vadd.f32 %v2081_v40, %v5138_v15  ;;  %v6599_v22 = vperm.slane %v6565_v17, 0  ;;  %v6600_v10 = vperm.slane %v6565_v17, 1 }
 0x25a   :  { %v6601_v42 = vperm.slane %v6565_v17, 2  ;;  %v6602_v55 = vperm.slane %v6565_v17, 3  ;;  %v6603_v59 = vperm.slane %v6565_v17, 4  ;;  %v6604_v9 = vperm.slane %v6565_v17, 5 }
 0x25b   :  { %6598 = vst [vmem:[#allocation34_spill] sm:$0xff] %v5506_v0  ;;  %v1018_v46 = vmul.f32 %v6599_v22, %v539_v28  ;;  %v1170_v53 = vmul.f32 %v6600_v10, %v539_v28  ;;  %v6605_v15 = vperm.slane %v6565_v17, 6  ;;  %v6606_v12 = vperm.slane %v6565_v17, 7 }
 0x25c   :  { %v1322_v29 = vmul.f32 %v6601_v42, %v539_v28  ;;  %v1474_v43 = vmul.f32 %v6602_v55, %v539_v28  ;;  %v1626_v62 = vmul.f32 %v6603_v59, %v539_v28  ;;  %v1778_v31 = vmul.f32 %v6604_v9, %v539_v28  ;;  %v6618_v55 = vld [vmem:[#allocation27_spill] sm:$0xff]  ;;  %v6619_v59 = vld [vmem:[#allocation56_spill] sm:$0xff] }
 0x25d   :  { %v1930_v44 = vmul.f32 %v6605_v15, %v539_v28  ;;  %v2082_v18 = vmul.f32 %v6606_v12, %v539_v28  ;;  %v5525_v52 = vadd.f32 %v1018_v46, %v5157_v6  ;;  %v5528_v32 = vadd.f32 %v1170_v53, %v5160_v16  ;;  %v6614_v6 = vld [vmem:[#allocation49_spill] sm:$0xff] }
 0x25e   :  { %v5531_v19 = vadd.f32 %v1322_v29, %v5163_v51  ;;  %v5534_v47 = vadd.f32 %v1474_v43, %v5166_v2  ;;  %v5537_v40 = vadd.f32 %v1626_v62, %v5169_v36  ;;  %v5540_v22 = vadd.f32 %v1778_v31, %v5172_v21  ;;  %v387_v29 = vpop.f32.mrf.mxu1 }
 0x25f   :  { %6607 = vst [vmem:[#allocation69_spill] sm:$0xff] %v5525_v52  ;;  %v5543_v28 = vadd.f32 %v1930_v44, %v5175_v38  ;;  %v5546_v17 = vadd.f32 %v2082_v18, %v6614_v6  ;;  %v6616_v16 = vperm.slane %v6573_v25, 0  ;;  %v6617_v2 = vperm.slane %v6573_v25, 1  ;;  %v6620_v6 = vld [vmem:[#allocation29_spill] sm:$0xff] }
 0x260   :  { %6608 = vst [vmem:[#allocation41_spill] sm:$0xff] %v5528_v32  ;;  %v6050_v36 = vperm.slane %v6573_v25, 2  ;;  %v6048_v10 = vperm.slane %v6573_v25, 3  ;;  %v6047_v21 = vperm.slane %v6573_v25, 4  ;;  %v6046_v38 = vperm.slane %v6573_v25, 5  ;;  %v6633_v32 = vld [vmem:[#allocation16_spill] sm:$0xff] }
 0x261   :  { %6609 = vst [vmem:[#allocation70_spill] sm:$0xff] %v5531_v19  ;;  %v1031_v51 = vmul.f32 %v6616_v16, %v5384_v50  ;;  %v1183_v46 = vmul.f32 %v6617_v2, %v5384_v50  ;;  %v6049_v53 = vperm.slane %v6573_v25, 6  ;;  %v6051_v42 = vperm.slane %v6573_v25, 7 }
 0x262   :  { %6610 = vst [vmem:[#allocation35_spill] sm:$0xff] %v5534_v47  ;;  %v1335_v9 = vmul.f32 %v6050_v36, %v5384_v50  ;;  %v1487_v31 = vmul.f32 %v6048_v10, %v5384_v50  ;;  %v1639_v15 = vmul.f32 %v6047_v21, %v5384_v50  ;;  %v1791_v44 = vmul.f32 %v6046_v38, %v5384_v50  ;;  %v6623_v21 = vld [vmem:[#allocation58_spill] sm:$0xff]  ;;  %v2411_v47 = vld [vmem:[#allocation3 + $0x1c0] sm:$0xff] }
 0x263   :  { %6611 = vst [vmem:[#allocation71_spill] sm:$0xff] %v5537_v40  ;;  %v1039_v43 = vadd.f32 %v1031_v51, %v6618_v55  ;;  %v1191_v62 = vadd.f32 %v1183_v46, %v6619_v59  ;;  %v1943_v12 = vmul.f32 %v6049_v53, %v5384_v50  ;;  %v2095_v18 = vmul.f32 %v6051_v42, %v5384_v50  ;;  %v6621_v51 = vld [vmem:[#allocation57_spill] sm:$0xff]  ;;  %v6622_v59 = vld [vmem:[#allocation31_spill] sm:$0xff] }
 0x264   :  { %6612 = vst [vmem:[#allocation48_spill] sm:$0xff] %v5540_v22  ;;  %v1343_v16 = vadd.f32 %v1335_v9, %v6620_v6  ;;  %v1495_v2 = vadd.f32 %v1487_v31, %v6621_v51  ;;  %v5585_v46 = vstv %s5875_s3  ;;  %v388_v55 = vadd.f32 %v387_v29, %v5378_v39  ;;  %v6624_v53 = vld [vmem:[#allocation33_spill] sm:$0xff]  ;;  %s2524_s3 = smov [#allocation6]  }
 0x265   :  { %6613 = vst [vmem:[#allocation42_spill] sm:$0xff] %v5543_v28  ;;  %v1647_v38 = vadd.f32 %v1639_v15, %v6622_v59  ;;  %v1799_v10 = vadd.f32 %v1791_v44, %v6623_v21  ;;  %v1951_v36 = vadd.f32 %v1943_v12, %v6624_v53  ;;  %v2113_v50 = vmul.f32 %v5585_v46, %v1039_v43  ;;  %v2404_v44 = vld [vmem:[#allocation3] sm:$0xff]  ;;  %s2309_s26 = sshll.u32 %s2524_s3, 4  ;;  %s2310_s26 = int_to_ptr.vmem [resolvable:$true] %s2309_s26 }
 0x266   :  { %6615 = vst [vmem:[#allocation50_spill] sm:$0xff] %v5546_v17  ;;  %v6625_v17 = vld [vmem:[#allocation59_spill] sm:$0xff]  ;;  %v2121_v9 = vmul.f32 %v5585_v46, %v1191_v62  ;;  %v2129_v31 = vmul.f32 %v5585_v46, %v1343_v16  ;;  %v2137_v6 = vmul.f32 %v5585_v46, %v1495_v2  ;;  %v2405_v12 = vld [vmem:[#allocation3 + $0x40] sm:$0xff] }
 0x267   :  { %v2103_v28 = vadd.f32 %v2095_v18, %v6625_v17  ;;  %v2145_v51 = vmul.f32 %v5585_v46, %v1647_v38  ;;  %v2153_v29 = vmul.f32 %v5585_v46, %v1799_v10  ;;  %v2161_v15 = vmul.f32 %v5585_v46, %v1951_v36  ;;  %v2406_v18 = vld [vmem:[#allocation3 + $0x80] sm:$0xff]  ;;  %v6626_v36 = vld [vmem:[#allocation20_spill] sm:$0xff] }
 0x268   :  { %v2177_v53 = vadd.f32 %v2404_v44, %v2113_v50  ;;  %v2185_v17 = vadd.f32 %v2405_v12, %v2121_v9  ;;  %v2193_v43 = vadd.f32 %v2406_v18, %v2129_v31  ;;  %v2407_v59 = vld [vmem:[#allocation3 + $0xc0] sm:$0xff]  ;;  %v6056_v19 = vperm.slane %v6626_v36, 0  ;;  %v6627_v12 = vld [vmem:[#allocation12_spill] sm:$0xff] }
 0x269   :  { %v2169_v21 = vmul.f32 %v5585_v46, %v2103_v28  ;;  %v2201_v62 = vadd.f32 %v2407_v59, %v2137_v6  ;;  %v2408_v42 = vld [vmem:[#allocation3 + $0x100] sm:$0xff]  ;;  %v6055_v28 = vperm.slane %v6626_v36, 1  ;;  %v6053_v50 = vperm.slane %v6626_v36, 2  ;;  %v6628_v18 = vld [vmem:[#allocation40_spill] sm:$0xff] }
 0x26a   :  { %v2209_v16 = vadd.f32 %v2408_v42, %v2145_v51  ;;  %v2409_v22 = vld [vmem:[#allocation3 + $0x140] sm:$0xff]  ;;  %2241 = vst [vmem:[#allocation6] sm:$0xff] %v2177_v53  ;;  %v6052_v9 = vperm.slane %v6626_v36, 3  ;;  %v6054_v31 = vperm.slane %v6626_v36, 4  ;;  %v6057_v42 = vperm.slane %v6626_v36, 5  ;;  %v6629_v59 = vld [vmem:[#allocation60_spill] sm:$0xff] }
 0x26b   :  { %v2217_v2 = vadd.f32 %v2409_v22, %v2153_v29  ;;  %v2410_v40 = vld [vmem:[#allocation3 + $0x180] sm:$0xff]  ;;  %v2233_v10 = vadd.f32 %v2411_v47, %v2169_v21  ;;  %2249 = vst [vmem:[#allocation6 + $0x40] sm:$0xff] %v2185_v17  ;;  %v6058_v22 = vperm.slane %v6626_v36, 6  ;;  %v1032_v47 = vmul.f32 %v6056_v19, %v388_v55  ;;  %v6632_v19 = vld [vmem:[#allocation18_spill] sm:$0xff] }
 0x26c   :  { %v2225_v38 = vadd.f32 %v2410_v40, %v2161_v15  ;;  %v2092_v40 = vperm.slane %v6626_v36, 7  ;;  %2257 = vst [vmem:[#allocation6 + $0x80] sm:$0xff] %v2193_v43  ;;  %v1184_v6 = vmul.f32 %v6055_v28, %v388_v55  ;;  %v1336_v51 = vmul.f32 %v6053_v50, %v388_v55 }
 0x26d   :  { %v1488_v29 = vmul.f32 %v6052_v9, %v388_v55  ;;  %2265 = vst [vmem:[#allocation6 + $0xc0] sm:$0xff] %v2201_v62  ;;  %v1640_v15 = vmul.f32 %v6054_v31, %v388_v55  ;;  %v1792_v21 = vmul.f32 %v6057_v42, %v388_v55  ;;  %v1944_v44 = vmul.f32 %v6058_v22, %v388_v55  ;;  %v6630_v62 = vld [vmem:[#allocation22_spill] sm:$0xff]  ;;  %v6631_v31 = vld [vmem:[#allocation61_spill] sm:$0xff]  ;;  %v6634_v22 = vld [vmem:[#allocation24_spill] sm:$0xff] }
 0x26e   :  { %v2096_v53 = vmul.f32 %v2092_v40, %v388_v55  ;;  %2273 = vst [vmem:[#allocation6 + $0x100] sm:$0xff] %v2209_v16  ;;  %v1040_v17 = vadd.f32 %v1032_v47, %v6627_v12  ;;  %v1192_v43 = vadd.f32 %v1184_v6, %v6628_v18  ;;  %v1344_v9 = vadd.f32 %v1336_v51, %v6629_v59  ;;  %v464_v51 = vpop.f32.mrf.mxu2  ;;  %v2416_v12 = vld [vmem:[#allocation3 + $0x108] sm:$0xff] }
 0x26f   :  { %v1496_v50 = vadd.f32 %v1488_v29, %v6630_v62  ;;  %2281 = vst [vmem:[#allocation6 + $0x140] sm:$0xff] %v2217_v2  ;;  %v1648_v28 = vadd.f32 %v1640_v15, %v6631_v31  ;;  %v1800_v42 = vadd.f32 %v1792_v21, %v6632_v19  ;;  %v1952_v52 = vadd.f32 %v1944_v44, %v6633_v32  ;;  %v2413_v29 = vld [vmem:[#allocation3 + $0x48] sm:$0xff] }
 0x270   :  { %v2104_v0 = vadd.f32 %v2096_v53, %v6634_v22  ;;  %2289 = vst [vmem:[#allocation6 + $0x180] sm:$0xff] %v2225_v38  ;;  %v2114_v55 = vmul.f32 %v5585_v46, %v1040_v17  ;;  %v2122_v16 = vmul.f32 %v5585_v46, %v1192_v43  ;;  %v2130_v47 = vmul.f32 %v5585_v46, %v1344_v9  ;;  %v2412_v22 = vld [vmem:[#allocation3 + $0x8] sm:$0xff] }
 0x271   :  { %v2138_v6 = vmul.f32 %v5585_v46, %v1496_v50  ;;  %2297 = vst [vmem:[#allocation6 + $0x1c0] sm:$0xff] %v2233_v10  ;;  %v2146_v2 = vmul.f32 %v5585_v46, %v1648_v28  ;;  %v2154_v31 = vmul.f32 %v5585_v46, %v1800_v42  ;;  %v2162_v19 = vmul.f32 %v5585_v46, %v1952_v52  ;;  %v2414_v21 = vld [vmem:[#allocation3 + $0x88] sm:$0xff]  ;;  %v6635_v52 = vld [vmem:[#allocation39_spill] sm:$0xff] }
 0x272   :  { %v2170_v32 = vmul.f32 %v5585_v46, %v2104_v0  ;;  %v2178_v38 = vadd.f32 %v2412_v22, %v2114_v55  ;;  %v2186_v15 = vadd.f32 %v2413_v29, %v2122_v16  ;;  %v2194_v44 = vadd.f32 %v2414_v21, %v2130_v47  ;;  %v2415_v53 = vld [vmem:[#allocation3 + $0xc8] sm:$0xff] }
 0x273   :  { %v2202_v9 = vadd.f32 %v2415_v53, %v2138_v6  ;;  %v2210_v50 = vadd.f32 %v2416_v12, %v2146_v2  ;;  %v2417_v10 = vld [vmem:[#allocation3 + $0x148] sm:$0xff]  ;;  %v465_v0 = vadd.f32 %v464_v51, %v5378_v39  ;;  %v6064_v59 = vperm.slane %v6635_v52, 0 }
 0x274   :  { %v2218_v17 = vadd.f32 %v2417_v10, %v2154_v31  ;;  %v2418_v28 = vld [vmem:[#allocation3 + $0x188] sm:$0xff]  ;;  %2242 = vst [vmem:[#allocation6 + $0x8] sm:$0xff] %v2178_v38  ;;  %v6063_v62 = vperm.slane %v6635_v52, 1  ;;  %v6061_v55 = vperm.slane %v6635_v52, 2  ;;  %v6060_v16 = vperm.slane %v6635_v52, 3 }
 0x275   :  { %v2226_v18 = vadd.f32 %v2418_v28, %v2162_v19  ;;  %v2419_v42 = vld [vmem:[#allocation3 + $0x1c8] sm:$0xff]  ;;  %2250 = vst [vmem:[#allocation6 + $0x48] sm:$0xff] %v2186_v15  ;;  %v6059_v47 = vperm.slane %v6635_v52, 4  ;;  %v6062_v6 = vperm.slane %v6635_v52, 5  ;;  %v6065_v2 = vperm.slane %v6635_v52, 6  ;;  %v6638_v28 = vld [vmem:[#allocation63_spill] sm:$0xff] }
 0x276   :  { %v2234_v43 = vadd.f32 %v2419_v42, %v2170_v32  ;;  %2258 = vst [vmem:[#allocation6 + $0x88] sm:$0xff] %v2194_v44  ;;  %v1033_v31 = vmul.f32 %v6064_v59, %v465_v0  ;;  %v1185_v19 = vmul.f32 %v6063_v62, %v465_v0  ;;  %v1337_v32 = vmul.f32 %v6061_v55, %v465_v0  ;;  %v6636_v44 = vld [vmem:[#allocation62_spill] sm:$0xff]  ;;  %v6640_v55 = vld [vmem:[#allocation65_spill] sm:$0xff] }
 0x277   :  { %v2093_v51 = vperm.slane %v6635_v52, 7  ;;  %2266 = vst [vmem:[#allocation6 + $0xc8] sm:$0xff] %v2202_v9  ;;  %v1489_v22 = vmul.f32 %v6060_v16, %v465_v0  ;;  %v1641_v38 = vmul.f32 %v6059_v47, %v465_v0  ;;  %v1793_v29 = vmul.f32 %v6062_v6, %v465_v0  ;;  %v6637_v12 = vld [vmem:[#allocation26_spill] sm:$0xff]  ;;  %v6639_v47 = vld [vmem:[#allocation28_spill] sm:$0xff] }
 0x278   :  { %v1945_v15 = vmul.f32 %v6065_v2, %v465_v0  ;;  %2274 = vst [vmem:[#allocation6 + $0x108] sm:$0xff] %v2210_v50  ;;  %v1041_v21 = vadd.f32 %v1033_v31, %v5309_v30  ;;  %v1193_v53 = vadd.f32 %v1185_v19, %v6636_v44  ;;  %v1345_v10 = vadd.f32 %v1337_v32, %v6637_v12  ;;  %v6641_v62 = vld [vmem:[#allocation30_spill] sm:$0xff]  ;;  %v6642_v50 = vld [vmem:[#allocation67_spill] sm:$0xff]  ;;  %v541_v32 = vpop.f32.mrf.mxu3 }
 0x279   :  { %v2097_v9 = vmul.f32 %v2093_v51, %v465_v0  ;;  %2282 = vst [vmem:[#allocation6 + $0x148] sm:$0xff] %v2218_v17  ;;  %v1497_v42 = vadd.f32 %v1489_v22, %v6638_v28  ;;  %v1649_v16 = vadd.f32 %v1641_v38, %v6639_v47  ;;  %v1801_v6 = vadd.f32 %v1793_v29, %v6640_v55  ;;  %v2421_v38 = vld [vmem:[#allocation3 + $0x50] sm:$0xff] }
 0x27a   :  { %v1953_v59 = vadd.f32 %v1945_v15, %v6641_v62  ;;  %2290 = vst [vmem:[#allocation6 + $0x188] sm:$0xff] %v2226_v18  ;;  %v2115_v30 = vmul.f32 %v5585_v46, %v1041_v21  ;;  %v2123_v31 = vmul.f32 %v5585_v46, %v1193_v53  ;;  %v2131_v19 = vmul.f32 %v5585_v46, %v1345_v10  ;;  %v2420_v62 = vld [vmem:[#allocation3 + $0x10] sm:$0xff] }
 0x27b   :  { %v2105_v2 = vadd.f32 %v2097_v9, %v6642_v50  ;;  %2298 = vst [vmem:[#allocation6 + $0x1c8] sm:$0xff] %v2234_v43  ;;  %v2139_v17 = vmul.f32 %v5585_v46, %v1497_v42  ;;  %v2147_v0 = vmul.f32 %v5585_v46, %v1649_v16  ;;  %v2155_v47 = vmul.f32 %v5585_v46, %v1801_v6  ;;  %v2422_v15 = vld [vmem:[#allocation3 + $0x90] sm:$0xff] }
 0x27c   :  { %v2163_v55 = vmul.f32 %v5585_v46, %v1953_v59  ;;  %v2179_v22 = vadd.f32 %v2420_v62, %v2115_v30  ;;  %v2187_v29 = vadd.f32 %v2421_v38, %v2123_v31  ;;  %v2195_v21 = vadd.f32 %v2422_v15, %v2131_v19  ;;  %v2423_v44 = vld [vmem:[#allocation3 + $0xd0] sm:$0xff] }
 0x27d   :  { %v2171_v18 = vmul.f32 %v5585_v46, %v2105_v2  ;;  %v2203_v53 = vadd.f32 %v2423_v44, %v2139_v17  ;;  %v2424_v43 = vld [vmem:[#allocation3 + $0x110] sm:$0xff]  ;;  %v542_v59 = vadd.f32 %v541_v32, %v5378_v39  ;;  %v6643_v2 = vld [vmem:[#allocation52_spill] sm:$0xff] }
 0x27e   :  { %v2211_v12 = vadd.f32 %v2424_v43, %v2147_v0  ;;  %v2425_v10 = vld [vmem:[#allocation3 + $0x150] sm:$0xff]  ;;  %2243 = vst [vmem:[#allocation6 + $0x10] sm:$0xff] %v2179_v22  ;;  %v1030_v50 = vperm.slane %v6643_v2, 0  ;;  %v1182_v30 = vperm.slane %v6643_v2, 1  ;;  %v1334_v31 = vperm.slane %v6643_v2, 2 }
 0x27f   :  { %v2219_v9 = vadd.f32 %v2425_v10, %v2155_v47  ;;  %v2426_v16 = vld [vmem:[#allocation3 + $0x190] sm:$0xff]  ;;  %2251 = vst [vmem:[#allocation6 + $0x50] sm:$0xff] %v2187_v29  ;;  %v1486_v19 = vperm.slane %v6643_v2, 3  ;;  %v1638_v17 = vperm.slane %v6643_v2, 4  ;;  %v1790_v0 = vperm.slane %v6643_v2, 5 }
 0x280   :  { %v2227_v28 = vadd.f32 %v2426_v16, %v2163_v55  ;;  %v2427_v6 = vld [vmem:[#allocation3 + $0x1d0] sm:$0xff]  ;;  %2259 = vst [vmem:[#allocation6 + $0x90] sm:$0xff] %v2195_v21  ;;  %v1034_v47 = vmul.f32 %v1030_v50, %v542_v59  ;;  %v1186_v39 = vmul.f32 %v1182_v30, %v542_v59  ;;  %v1942_v55 = vperm.slane %v6643_v2, 6 }
 0x281   :  { %v2235_v42 = vadd.f32 %v2427_v6, %v2171_v18  ;;  %v6066_v32 = vperm.slane %v6643_v2, 7  ;;  %2267 = vst [vmem:[#allocation6 + $0xd0] sm:$0xff] %v2203_v53  ;;  %v1338_v18 = vmul.f32 %v1334_v31, %v542_v59  ;;  %v1490_v62 = vmul.f32 %v1486_v19, %v542_v59  ;;  %v6644_v53 = vld [vmem:[#allocation32_spill] sm:$0xff] }
 0x282   :  { %v1642_v22 = vmul.f32 %v1638_v17, %v542_v59  ;;  %v1794_v38 = vmul.f32 %v1790_v0, %v542_v59  ;;  %2275 = vst [vmem:[#allocation6 + $0x110] sm:$0xff] %v2211_v12  ;;  %v1042_v29 = vadd.f32 %v1034_v47, %v5356_v63  ;;  %v1194_v15 = vadd.f32 %v1186_v39, %v5359_v60  ;;  %v6645_v12 = vld [vmem:[#allocation37_spill] sm:$0xff] }
 0x283   :  { %v1946_v21 = vmul.f32 %v1942_v55, %v542_v59  ;;  %v2098_v44 = vmul.f32 %v6066_v32, %v542_v59  ;;  %2283 = vst [vmem:[#allocation6 + $0x150] sm:$0xff] %v2219_v9  ;;  %v1346_v43 = vadd.f32 %v1338_v18, %v6644_v53  ;;  %v1498_v10 = vadd.f32 %v1490_v62, %v5367_v14  ;;  %v313_v18 = vpop.f32.mrf.mxu0  ;;  %v2431_v53 = vld [vmem:[#allocation3 + $0xd8] sm:$0xff] }
 0x284   :  { %v1650_v16 = vadd.f32 %v1642_v22, %v5370_v11  ;;  %v1802_v6 = vadd.f32 %v1794_v38, %v5373_v49  ;;  %2291 = vst [vmem:[#allocation6 + $0x190] sm:$0xff] %v2227_v28  ;;  %v2116_v47 = vmul.f32 %v5585_v46, %v1042_v29  ;;  %v2124_v39 = vmul.f32 %v5585_v46, %v1194_v15  ;;  %v2428_v28 = vld [vmem:[#allocation3 + $0x18] sm:$0xff]  ;;  %v390_v29 = vpop.f32.mrf.mxu1  ;;  %v467_v15 = vpop.f32.mrf.mxu2 }
 0x285   :  { %v1954_v63 = vadd.f32 %v1946_v21, %v5376_v24  ;;  %v2106_v60 = vadd.f32 %v2098_v44, %v6645_v12  ;;  %2299 = vst [vmem:[#allocation6 + $0x1d0] sm:$0xff] %v2235_v42  ;;  %v2132_v9 = vmul.f32 %v5585_v46, %v1346_v43  ;;  %v2140_v59 = vmul.f32 %v5585_v46, %v1498_v10  ;;  %v2429_v22 = vld [vmem:[#allocation3 + $0x58] sm:$0xff]  ;;  %v5722_v42 = vpop.permute.xlu1 %236 }
 0x286   :  { %v2148_v14 = vmul.f32 %v5585_v46, %v1650_v16  ;;  %v2156_v11 = vmul.f32 %v5585_v46, %v1802_v6  ;;  %v2180_v62 = vadd.f32 %v2428_v28, %v2116_v47  ;;  %v2188_v38 = vadd.f32 %v2429_v22, %v2124_v39  ;;  %v2430_v21 = vld [vmem:[#allocation3 + $0x98] sm:$0xff] }
 0x287   :  { %v2164_v49 = vmul.f32 %v5585_v46, %v1954_v63  ;;  %v2172_v24 = vmul.f32 %v5585_v46, %v2106_v60  ;;  %v2196_v44 = vadd.f32 %v2430_v21, %v2132_v9  ;;  %v2204_v43 = vadd.f32 %v2431_v53, %v2140_v59  ;;  %v2432_v10 = vld [vmem:[#allocation3 + $0x118] sm:$0xff] }
 0x288   :  { %v2212_v16 = vadd.f32 %v2432_v10, %v2148_v14  ;;  %v2433_v6 = vld [vmem:[#allocation3 + $0x158] sm:$0xff]  ;;  %2244 = vst [vmem:[#allocation6 + $0x18] sm:$0xff] %v2180_v62  ;;  %v314_v63 = vadd.f32 %v313_v18, %v5722_v42  ;;  %v391_v39 = vadd.f32 %v390_v29, %v5722_v42  ;;  %v5727_v22 = vadd.f32 %v467_v15, %v5722_v42 }
 0x289   :  { %v2220_v12 = vadd.f32 %v2433_v6, %v2156_v11  ;;  %v2434_v60 = vld [vmem:[#allocation3 + $0x198] sm:$0xff]  ;;  %2252 = vst [vmem:[#allocation6 + $0x58] sm:$0xff] %v2188_v38  ;;  %v6646_v9 = vperm.slane %v6573_v25, 0  ;;  %v6647_v14 = vperm.slane %v6573_v25, 1  ;;  %v6648_v62 = vperm.slane %v6573_v25, 2 }
 0x28a   :  { %v2228_v32 = vadd.f32 %v2434_v60, %v2164_v49  ;;  %v2435_v47 = vld [vmem:[#allocation3 + $0x1d8] sm:$0xff]  ;;  %2260 = vst [vmem:[#allocation6 + $0x98] sm:$0xff] %v2196_v44  ;;  %v6649_v49 = vperm.slane %v6573_v25, 3  ;;  %v6651_v29 = vperm.slane %v6573_v25, 5  ;;  %v6652_v44 = vperm.slane %v6573_v25, 6 }
 0x28b   :  { %v2236_v28 = vadd.f32 %v2435_v47, %v2172_v24  ;;  %v1035_v59 = vmul.f32 %v6646_v9, %v314_v63  ;;  %v1187_v11 = vmul.f32 %v6647_v14, %v314_v63  ;;  %v1339_v18 = vmul.f32 %v6648_v62, %v314_v63  ;;  %2268 = vst [vmem:[#allocation6 + $0xd8] sm:$0xff] %v2204_v43 }
 0x28c   :  { %v1491_v21 = vmul.f32 %v6649_v49, %v314_v63  ;;  %v6650_v24 = vperm.slane %v6573_v25, 4  ;;  %v1795_v15 = vmul.f32 %v6651_v29, %v314_v63  ;;  %v1947_v53 = vmul.f32 %v6652_v44, %v314_v63  ;;  %2276 = vst [vmem:[#allocation6 + $0x118] sm:$0xff] %v2212_v16  ;;  %v2436_v16 = vld [vmem:[#allocation3 + $0x20] sm:$0xff] }
 0x28d   :  { %v6653_v10 = vperm.slane %v6573_v25, 7  ;;  %v1043_v60 = vadd.f32 %v1035_v59, %v5405_v3  ;;  %v1195_v47 = vadd.f32 %v1187_v11, %v5408_v57  ;;  %v1347_v9 = vadd.f32 %v1339_v18, %v5411_v61  ;;  %2284 = vst [vmem:[#allocation6 + $0x158] sm:$0xff] %v2220_v12  ;;  %v2439_v11 = vld [vmem:[#allocation3 + $0xe0] sm:$0xff] }
 0x28e   :  { %v1643_v38 = vmul.f32 %v6650_v24, %v314_v63  ;;  %v1499_v43 = vadd.f32 %v1491_v21, %v5414_v54  ;;  %v1803_v62 = vadd.f32 %v1795_v15, %v5420_v1  ;;  %v1955_v49 = vadd.f32 %v1947_v53, %v5423_v13  ;;  %2292 = vst [vmem:[#allocation6 + $0x198] sm:$0xff] %v2228_v32  ;;  %v2437_v32 = vld [vmem:[#allocation3 + $0x60] sm:$0xff] }
 0x28f   :  { %v2099_v6 = vmul.f32 %v6653_v10, %v314_v63  ;;  %v2117_v25 = vmul.f32 %v5585_v46, %v1043_v60  ;;  %v2125_v3 = vmul.f32 %v5585_v46, %v1195_v47  ;;  %v2133_v57 = vmul.f32 %v5585_v46, %v1347_v9  ;;  %2300 = vst [vmem:[#allocation6 + $0x1d8] sm:$0xff] %v2236_v28  ;;  %v2438_v63 = vld [vmem:[#allocation3 + $0xa0] sm:$0xff] }
 0x290   :  { %v1651_v14 = vadd.f32 %v1643_v38, %v5417_v20  ;;  %v2141_v61 = vmul.f32 %v5585_v46, %v1499_v43  ;;  %v2157_v20 = vmul.f32 %v5585_v46, %v1803_v62  ;;  %v2165_v1 = vmul.f32 %v5585_v46, %v1955_v49  ;;  %v2440_v21 = vld [vmem:[#allocation3 + $0x120] sm:$0xff] }
 0x291   :  { %v2107_v24 = vadd.f32 %v2099_v6, %v5426_v26  ;;  %v2181_v26 = vadd.f32 %v2436_v16, %v2117_v25  ;;  %v2189_v12 = vadd.f32 %v2437_v32, %v2125_v3  ;;  %v2197_v59 = vadd.f32 %v2438_v63, %v2133_v57  ;;  %v2441_v29 = vld [vmem:[#allocation3 + $0x160] sm:$0xff] }
 0x292   :  { %v2149_v54 = vmul.f32 %v5585_v46, %v1651_v14  ;;  %v2205_v18 = vadd.f32 %v2439_v11, %v2141_v61  ;;  %v2221_v28 = vadd.f32 %v2441_v29, %v2157_v20  ;;  %v2442_v15 = vld [vmem:[#allocation3 + $0x1a0] sm:$0xff]  ;;  %v6654_v6 = vperm.slane %v6626_v36, 0 }
 0x293   :  { %v2173_v13 = vmul.f32 %v5585_v46, %v2107_v24  ;;  %v2229_v44 = vadd.f32 %v2442_v15, %v2165_v1  ;;  %v2443_v53 = vld [vmem:[#allocation3 + $0x1e0] sm:$0xff]  ;;  %2245 = vst [vmem:[#allocation6 + $0x20] sm:$0xff] %v2181_v26  ;;  %v6655_v47 = vperm.slane %v6626_v36, 1  ;;  %v6656_v43 = vperm.slane %v6626_v36, 2  ;;  %v2448_v15 = vld [vmem:[#allocation3 + $0x128] sm:$0xff] }
 0x294   :  { %v2213_v38 = vadd.f32 %v2440_v21, %v2149_v54  ;;  %v1036_v60 = vmul.f32 %v6654_v6, %v391_v39  ;;  %v6657_v62 = vperm.slane %v6626_v36, 3  ;;  %2253 = vst [vmem:[#allocation6 + $0x60] sm:$0xff] %v2189_v12  ;;  %v6658_v24 = vperm.slane %v6626_v36, 4 }
 0x295   :  { %v2237_v10 = vadd.f32 %v2443_v53, %v2173_v13  ;;  %v1188_v9 = vmul.f32 %v6655_v47, %v391_v39  ;;  %v1340_v14 = vmul.f32 %v6656_v43, %v391_v39  ;;  %v6659_v3 = vperm.slane %v6626_v36, 5  ;;  %2261 = vst [vmem:[#allocation6 + $0xa0] sm:$0xff] %v2197_v59  ;;  %v2449_v53 = vld [vmem:[#allocation3 + $0x168] sm:$0xff] }
 0x296   :  { %v1492_v49 = vmul.f32 %v6657_v62, %v391_v39  ;;  %v1644_v25 = vmul.f32 %v6658_v24, %v391_v39  ;;  %v6660_v61 = vperm.slane %v6626_v36, 6  ;;  %v2100_v20 = vmul.f32 %v2092_v40, %v391_v39  ;;  %2269 = vst [vmem:[#allocation6 + $0xe0] sm:$0xff] %v2205_v18  ;;  %v2446_v18 = vld [vmem:[#allocation3 + $0xa8] sm:$0xff] }
 0x297   :  { %v1796_v57 = vmul.f32 %v6659_v3, %v391_v39  ;;  %v1044_v1 = vadd.f32 %v1036_v60, %v5445_v58  ;;  %v1196_v13 = vadd.f32 %v1188_v9, %v5448_v45  ;;  %v1348_v16 = vadd.f32 %v1340_v14, %v5451_v7  ;;  %2277 = vst [vmem:[#allocation6 + $0x120] sm:$0xff] %v2213_v38  ;;  %v2447_v38 = vld [vmem:[#allocation3 + $0xe8] sm:$0xff] }
 0x298   :  { %v1948_v54 = vmul.f32 %v6660_v61, %v391_v39  ;;  %v1500_v26 = vadd.f32 %v1492_v49, %v5454_v33  ;;  %v1652_v32 = vadd.f32 %v1644_v25, %v5457_v35  ;;  %v2108_v11 = vadd.f32 %v2100_v20, %v5466_v56  ;;  %2285 = vst [vmem:[#allocation6 + $0x160] sm:$0xff] %v2221_v28  ;;  %v2444_v56 = vld [vmem:[#allocation3 + $0x28] sm:$0xff] }
 0x299   :  { %v1804_v12 = vadd.f32 %v1796_v57, %v5460_v8  ;;  %v2118_v36 = vmul.f32 %v5585_v46, %v1044_v1  ;;  %v2126_v58 = vmul.f32 %v5585_v46, %v1196_v13  ;;  %v2134_v45 = vmul.f32 %v5585_v46, %v1348_v16  ;;  %2293 = vst [vmem:[#allocation6 + $0x1a0] sm:$0xff] %v2229_v44  ;;  %v2445_v39 = vld [vmem:[#allocation3 + $0x68] sm:$0xff] }
 0x29a   :  { %v1956_v63 = vadd.f32 %v1948_v54, %v5463_v41  ;;  %v2142_v7 = vmul.f32 %v5585_v46, %v1500_v26  ;;  %v2150_v33 = vmul.f32 %v5585_v46, %v1652_v32  ;;  %v2174_v41 = vmul.f32 %v5585_v46, %v2108_v11  ;;  %2301 = vst [vmem:[#allocation6 + $0x1e0] sm:$0xff] %v2237_v10  ;;  %v2450_v60 = vld [vmem:[#allocation3 + $0x1a8] sm:$0xff] }
 0x29b   :  { %v2158_v35 = vmul.f32 %v5585_v46, %v1804_v12  ;;  %v2182_v40 = vadd.f32 %v2444_v56, %v2118_v36  ;;  %v2190_v59 = vadd.f32 %v2445_v39, %v2126_v58  ;;  %v2198_v21 = vadd.f32 %v2446_v18, %v2134_v45  ;;  %v2451_v9 = vld [vmem:[#allocation3 + $0x1e8] sm:$0xff] }
 0x29c   :  { %v2166_v8 = vmul.f32 %v5585_v46, %v1956_v63  ;;  %v2206_v29 = vadd.f32 %v2447_v38, %v2142_v7  ;;  %v2214_v28 = vadd.f32 %v2448_v15, %v2150_v33  ;;  %v2238_v43 = vadd.f32 %v2451_v9, %v2174_v41  ;;  %v6668_v45 = vld [vmem:[#allocation34_spill] sm:$0xff]  ;;  %v2454_v41 = vld [vmem:[#allocation3 + $0xb0] sm:$0xff] }
 0x29d   :  { %v2222_v6 = vadd.f32 %v2449_v53, %v2158_v35  ;;  %2246 = vst [vmem:[#allocation6 + $0x28] sm:$0xff] %v2182_v40  ;;  %v6661_v44 = vperm.slane %v6635_v52, 0  ;;  %v6662_v62 = vperm.slane %v6635_v52, 1  ;;  %v6663_v10 = vperm.slane %v6635_v52, 2  ;;  %v2453_v35 = vld [vmem:[#allocation3 + $0x70] sm:$0xff] }
 0x29e   :  { %v2230_v47 = vadd.f32 %v2450_v60, %v2166_v8  ;;  %v6664_v25 = vperm.slane %v6635_v52, 3  ;;  %2254 = vst [vmem:[#allocation6 + $0x68] sm:$0xff] %v2190_v59  ;;  %v6665_v57 = vperm.slane %v6635_v52, 4  ;;  %v6666_v54 = vperm.slane %v6635_v52, 5  ;;  %v2455_v40 = vld [vmem:[#allocation3 + $0xf0] sm:$0xff] }
 0x29f   :  { %v1037_v14 = vmul.f32 %v6661_v44, %v5727_v22  ;;  %v1189_v49 = vmul.f32 %v6662_v62, %v5727_v22  ;;  %v1341_v24 = vmul.f32 %v6663_v10, %v5727_v22  ;;  %v6667_v1 = vperm.slane %v6635_v52, 6  ;;  %2262 = vst [vmem:[#allocation6 + $0xa8] sm:$0xff] %v2198_v21  ;;  %v2456_v59 = vld [vmem:[#allocation3 + $0x130] sm:$0xff] }
 0x2a0   :  { %v1493_v3 = vmul.f32 %v6664_v25, %v5727_v22  ;;  %v1645_v61 = vmul.f32 %v6665_v57, %v5727_v22  ;;  %v1797_v20 = vmul.f32 %v6666_v54, %v5727_v22  ;;  %v2101_v16 = vmul.f32 %v2093_v51, %v5727_v22  ;;  %2270 = vst [vmem:[#allocation6 + $0xe8] sm:$0xff] %v2206_v29  ;;  %v544_v51 = vpop.f32.mrf.mxu3  ;;  %v2457_v38 = vld [vmem:[#allocation3 + $0x170] sm:$0xff]  ;;  %v6676_v54 = vld [vmem:[#allocation42_spill] sm:$0xff] }
 0x2a1   :  { %v1949_v13 = vmul.f32 %v6667_v1, %v5727_v22  ;;  %v1045_v26 = vadd.f32 %v1037_v14, %v5485_v23  ;;  %v1197_v32 = vadd.f32 %v1189_v49, %v5488_v37  ;;  %v1349_v12 = vadd.f32 %v1341_v24, %v5491_v48  ;;  %2278 = vst [vmem:[#allocation6 + $0x128] sm:$0xff] %v2214_v28  ;;  %v2452_v22 = vld [vmem:[#allocation3 + $0x30] sm:$0xff]  ;;  %v6672_v24 = vld [vmem:[#allocation70_spill] sm:$0xff] }
 0x2a2   :  { %v1501_v63 = vadd.f32 %v1493_v3, %v5494_v5  ;;  %v1653_v11 = vadd.f32 %v1645_v61, %v5497_v34  ;;  %v1805_v36 = vadd.f32 %v1797_v20, %v5500_v4  ;;  %v2109_v7 = vadd.f32 %v2101_v16, %v6668_v45  ;;  %2286 = vst [vmem:[#allocation6 + $0x168] sm:$0xff] %v2222_v6  ;;  %v2458_v15 = vld [vmem:[#allocation3 + $0x1b0] sm:$0xff]  ;;  %v6675_v61 = vld [vmem:[#allocation48_spill] sm:$0xff] }
 0x2a3   :  { %v1957_v58 = vadd.f32 %v1949_v13, %v5503_v27  ;;  %v2119_v52 = vmul.f32 %v5585_v46, %v1045_v26  ;;  %v2127_v23 = vmul.f32 %v5585_v46, %v1197_v32  ;;  %v2135_v37 = vmul.f32 %v5585_v46, %v1349_v12  ;;  %2294 = vst [vmem:[#allocation6 + $0x1a8] sm:$0xff] %v2230_v47  ;;  %v2459_v53 = vld [vmem:[#allocation3 + $0x1f0] sm:$0xff] }
 0x2a4   :  { %v2143_v48 = vmul.f32 %v5585_v46, %v1501_v63  ;;  %v2151_v5 = vmul.f32 %v5585_v46, %v1653_v11  ;;  %v2159_v34 = vmul.f32 %v5585_v46, %v1805_v36  ;;  %v2175_v27 = vmul.f32 %v5585_v46, %v2109_v7  ;;  %2302 = vst [vmem:[#allocation6 + $0x1e8] sm:$0xff] %v2238_v43  ;;  %v6673_v25 = vld [vmem:[#allocation35_spill] sm:$0xff]  ;;  %v2460_v11 = vld [vmem:[#allocation3 + $0x38] sm:$0xff] }
 0x2a5   :  { %v2167_v4 = vmul.f32 %v5585_v46, %v1957_v58  ;;  %v2183_v33 = vadd.f32 %v2452_v22, %v2119_v52  ;;  %v2191_v8 = vadd.f32 %v2453_v35, %v2127_v23  ;;  %v2199_v56 = vadd.f32 %v2454_v41, %v2135_v37  ;;  %v2461_v58 = vld [vmem:[#allocation3 + $0x78] sm:$0xff] }
 0x2a6   :  { %v2207_v39 = vadd.f32 %v2455_v40, %v2143_v48  ;;  %v2215_v18 = vadd.f32 %v2456_v59, %v2151_v5  ;;  %v545_v21 = vadd.f32 %v544_v51, %v5722_v42  ;;  %v2223_v29 = vadd.f32 %v2457_v38, %v2159_v34  ;;  %v2462_v7 = vld [vmem:[#allocation3 + $0xb8] sm:$0xff] }
 0x2a7   :  { %2247 = vst [vmem:[#allocation6 + $0x30] sm:$0xff] %v2183_v33  ;;  %v2231_v28 = vadd.f32 %v2458_v15, %v2167_v4  ;;  %v2239_v6 = vadd.f32 %v2459_v53, %v2175_v27  ;;  %v2463_v37 = vld [vmem:[#allocation3 + $0xf8] sm:$0xff] }
 0x2a8   :  { %2255 = vst [vmem:[#allocation6 + $0x70] sm:$0xff] %v2191_v8  ;;  %v1038_v60 = vmul.f32 %v1030_v50, %v545_v21  ;;  %v1190_v47 = vmul.f32 %v1182_v30, %v545_v21  ;;  %v1342_v9 = vmul.f32 %v1334_v31, %v545_v21  ;;  %v1494_v42 = vmul.f32 %v1486_v19, %v545_v21  ;;  %v6670_v30 = vld [vmem:[#allocation69_spill] sm:$0xff]  ;;  %v2464_v5 = vld [vmem:[#allocation3 + $0x138] sm:$0xff] }
 0x2a9   :  { %2263 = vst [vmem:[#allocation6 + $0xb0] sm:$0xff] %v2199_v56  ;;  %v1646_v43 = vmul.f32 %v1638_v17, %v545_v21  ;;  %v1798_v44 = vmul.f32 %v1790_v0, %v545_v21  ;;  %v1950_v14 = vmul.f32 %v1942_v55, %v545_v21  ;;  %v6669_v50 = vperm.slane %v6643_v2, 7  ;;  %v6671_v31 = vld [vmem:[#allocation41_spill] sm:$0xff]  ;;  %v6674_v17 = vld [vmem:[#allocation71_spill] sm:$0xff]  ;;  %v6677_v55 = vld [vmem:[#allocation50_spill] sm:$0xff] }
 0x2aa   :  { %2271 = vst [vmem:[#allocation6 + $0xf0] sm:$0xff] %v2207_v39  ;;  %v1046_v49 = vadd.f32 %v1038_v60, %v6670_v30  ;;  %v1198_v10 = vadd.f32 %v1190_v47, %v6671_v31  ;;  %v1350_v19 = vadd.f32 %v1342_v9, %v6672_v24  ;;  %v1502_v3 = vadd.f32 %v1494_v42, %v6673_v25  ;;  %v2465_v4 = vld [vmem:[#allocation3 + $0x178] sm:$0xff] }
 0x2ab   :  { %v2102_v62 = vmul.f32 %v6669_v50, %v545_v21  ;;  %2279 = vst [vmem:[#allocation6 + $0x130] sm:$0xff] %v2215_v18  ;;  %v1654_v57 = vadd.f32 %v1646_v43, %v6674_v17  ;;  %v1806_v0 = vadd.f32 %v1798_v44, %v6675_v61  ;;  %v1958_v20 = vadd.f32 %v1950_v14, %v6676_v54  ;;  %v2466_v51 = vld [vmem:[#allocation3 + $0x1b8] sm:$0xff] }
 0x2ac   :  { %2287 = vst [vmem:[#allocation6 + $0x170] sm:$0xff] %v2223_v29  ;;  %v2120_v2 = vmul.f32 %v5585_v46, %v1046_v49  ;;  %v2128_v13 = vmul.f32 %v5585_v46, %v1198_v10  ;;  %v2136_v16 = vmul.f32 %v5585_v46, %v1350_v19  ;;  %v2144_v26 = vmul.f32 %v5585_v46, %v1502_v3  ;;  %v2467_v33 = vld [vmem:[#allocation3 + $0x1f8] sm:$0xff] }
 0x2ad   :  { %v2110_v1 = vadd.f32 %v2102_v62, %v6677_v55  ;;  %2295 = vst [vmem:[#allocation6 + $0x1b0] sm:$0xff] %v2231_v28  ;;  %v2152_v32 = vmul.f32 %v5585_v46, %v1654_v57  ;;  %v2160_v12 = vmul.f32 %v5585_v46, %v1806_v0  ;;  %v2168_v63 = vmul.f32 %v5585_v46, %v1958_v20 }
 0x2ae   :  { %2303 = vst [vmem:[#allocation6 + $0x1f0] sm:$0xff] %v2239_v6  ;;  %v2184_v36 = vadd.f32 %v2460_v11, %v2120_v2  ;;  %v2192_v45 = vadd.f32 %v2461_v58, %v2128_v13  ;;  %v2200_v52 = vadd.f32 %v2462_v7, %v2136_v16  ;;  %v2208_v48 = vadd.f32 %v2463_v37, %v2144_v26 }
 0x2af   :  { %v2176_v23 = vmul.f32 %v5585_v46, %v2110_v1  ;;  %v2216_v34 = vadd.f32 %v2464_v5, %v2152_v32  ;;  %v2224_v27 = vadd.f32 %v2465_v4, %v2160_v12  ;;  %v2232_v22 = vadd.f32 %v2466_v51, %v2168_v63 }
 0x2b0   :  { %2248 = vst [vmem:[#allocation6 + $0x38] sm:$0xff] %v2184_v36 }
 0x2b1   :  { %2256 = vst [vmem:[#allocation6 + $0x78] sm:$0xff] %v2192_v45  ;;  %v2240_v35 = vadd.f32 %v2467_v33, %v2176_v23 }
 0x2b2   :  { %2264 = vst [vmem:[#allocation6 + $0xb8] sm:$0xff] %v2200_v52 }
 0x2b3   :  { %2272 = vst [vmem:[#allocation6 + $0xf8] sm:$0xff] %v2208_v48 }
 0x2b4   :  { %2280 = vst [vmem:[#allocation6 + $0x138] sm:$0xff] %v2216_v34 }
 0x2b5   :  { %2288 = vst [vmem:[#allocation6 + $0x178] sm:$0xff] %v2224_v27 }
 0x2b6   :  { %2296 = vst [vmem:[#allocation6 + $0x1b8] sm:$0xff] %v2232_v22 }
 0x2b7   :  { %2304 = vst [vmem:[#allocation6 + $0x1f8] sm:$0xff] %v2240_v35 }
 0x2b8   :  { %2317 = dma.vmem_to_hbm [thread:$0]  %s2310_s26, 8192, %s2312_s29, [#allocation5], %s2521_s20, %s2521_s20, %s2522_s21  }
 0x2b9   :  { %2518 = dma.done.wait [#allocation5], 8192  }
 0x2ba   :  { %2519 = vsyncadd [#allocation5], 4294959104 }
 0x2bb   :  { %2322 = vsyncpa [#allocation4], 1 }
 0x2bc   :  { %2323 = vsyncpa [#allocation5], 1 }

</bundles_post_ra>
